<compile_context>
chip_gen: v7x
topology: tpu7x:2x2x1
jax: 0.10.0
libtpu: 0.0.40
codegen_flags: <defaults>
</compile_context>

<pallas_src>
import functools

import numpy as np
import jax
import jax.numpy as jnp
from jax.experimental import pallas as pl
from jax.experimental.pallas import tpu as pltpu


# ---------------------------------------------------------------------------
# small helpers
# ---------------------------------------------------------------------------

def _round_up(x, m):
    return (x + m - 1) // m * m


def _vmem_capacity_bytes():
    try:
        return int(pltpu.get_tpu_info().vmem_capacity_bytes)
    except Exception:
        return 64 << 20          # conservative fallback (v7x per-core VMEM)


def _pad2(x, rows, cols):
    return jnp.pad(x, ((0, rows - x.shape[0]), (0, cols - x.shape[1])))


def _pack_gate_weights(w_t, in_dim_p, H, Hp):
    """w_t: (in_dim, 4H) in PyTorch gate order [i|f|g|o]; pad each gate block to Hp."""
    blocks = [_pad2(w_t[:, k * H:(k + 1) * H], in_dim_p, Hp) for k in range(4)]
    return jnp.concatenate(blocks, axis=1)            # (in_dim_p, 4*Hp)


def _pack_gate_bias(b, H, Hp):
    blocks = [jnp.pad(b[k * H:(k + 1) * H], (0, Hp - H)) for k in range(4)]
    return jnp.concatenate(blocks).reshape(1, 4 * Hp)


def _sigmoid(x):
    # single-EUP-op sigmoid (exact identity): sigmoid(x) = 0.5 * tanh(x/2) + 0.5
    return 0.5 * jnp.tanh(0.5 * x) + 0.5


# -------- generation-aware tile selection (all static Python ints) ----------

def _pick_recurrence_tiles(Bp, T, Hp, gin_bytes, w_bytes, budget, two_cores, sub):
    """Pick (TB, TC) so the double-buffered bf16 gate stream + resident Whh +
    f32 h/c scratch fit the per-generation VMEM budget."""
    tb_cands = [d for d in range(min(Bp, 256), sub - 1, -sub) if Bp % d == 0]
    if not tb_cands:
        tb_cands = [Bp]
    if two_cores:
        # prefer >=2 batch tiles so the "parallel" axis can shard across both TCs
        split = [d for d in tb_cands if Bp // d >= 2]
        rest = [d for d in tb_cands if Bp // d < 2]
        tb_cands = split + rest
    whh_bytes = Hp * 4 * Hp * w_bytes                  # single resident copy
    for TB in tb_cands:
        for TC in (8, 4, 2, 1):
            if TC > T:
                continue
            need = (2 * TC * TB * 4 * Hp * gin_bytes   # double-buffered gate stream
                    + whh_bytes                        # resident Whh (Buffered(1))
                    + 2 * TB * Hp * 4                  # h / c scratch (f32)
                    + 2 * TB * Hp * 4)                 # h_last out (double-buffered)
            if need <= budget:
                return TB, TC
    return min(tb_cands), 1


def _pick_proj_time_tile(T, TB, Ep, Hp, in_bytes, gin_bytes, budget):
    """Time tile of the input-projection GEMM: no serial dependency, so grow it
    until VMEM (or an M-cap) limits it; must divide T."""
    wih_bytes = Ep * 4 * Hp * in_bytes                 # resident Wih (Buffered(1))
    best = 1
    for tc in range(1, min(T, 64) + 1):
        if T % tc:
            continue
        need = (wih_bytes
                + 2 * tc * TB * Ep * in_bytes          # emb blocks (double-buffered)
                + 2 * tc * TB * 4 * Hp * gin_bytes)    # gates_in blocks
        if need <= budget and tc * TB <= 2048:
            best = tc
    return best


def _pick_fc_vocab_tile(Vp, Hp, TB, w_bytes, budget):
    for TV in (2048, 1024, 512):
        if Vp % TV:
            continue
        need = (2 * Hp * TV * w_bytes + 2 * TB * TV * 4 + 2 * TV * 4
                + 2 * TB * Hp * 4)
        if need <= budget:
            return TV
    return 512


# ---------------------------------------------------------------------------
# kernels
# ---------------------------------------------------------------------------

def input_proj_kernel(emb_ref, wih_ref, b_ref, gin_ref):
    # emb_ref: (TCp, TB, Ep)  wih_ref: (Ep, 4Hp)  b_ref: (1, 4Hp)  gin_ref: (TCp, TB, 4Hp)
    tc, tb, ep = emb_ref.shape
    x = emb_ref[...].reshape(tc * tb, ep)              # layout-preserving merge
    y = jnp.dot(x, wih_ref[...], preferred_element_type=jnp.float32) + b_ref[...]
    gin_ref[...] = y.reshape(tc, tb, -1).astype(gin_ref.dtype)


def lstm_recurrence_kernel(gin_ref, whh_ref, hlast_ref, h_sc, c_sc):
    # gin_ref: (TC, TB, 4Hp) [bf16 stream]  whh_ref: (Hp, 4Hp)  hlast_ref: (TB, Hp)
    t_chunk = pl.program_id(1)                         # time axis ("arbitrary", innermost)
    tc = gin_ref.shape[0]
    Hp = h_sc.shape[1]

    @pl.when(t_chunk == 0)
    def _():
        h_sc[...] = jnp.zeros_like(h_sc)
        c_sc[...] = jnp.zeros_like(c_sc)

    # Fully-unrolled recurrence over the streamed chunk (tc <= 8, static) so the
    # scheduler can overlap the elementwise tail of step t with the Whh matmul of
    # step t+1.  Only h @ Whh remains on the serial critical path.
    for t in range(tc):
        hw = jnp.dot(h_sc[...].astype(whh_ref.dtype), whh_ref[...],
                     preferred_element_type=jnp.float32)        # (TB, 4Hp) f32
        gates = gin_ref[t].astype(jnp.float32) + hw
        # PyTorch gate order i, f, g, o — each slice is a lane-aligned 128-multiple.
        i_g = _sigmoid(gates[:, 0 * Hp:1 * Hp])
        f_g = _sigmoid(gates[:, 1 * Hp:2 * Hp])
        g_g = jnp.tanh(gates[:, 2 * Hp:3 * Hp])
        o_g = _sigmoid(gates[:, 3 * Hp:4 * Hp])
        c_new = f_g * c_sc[...] + i_g * g_g
        c_sc[...] = c_new
        h_sc[...] = o_g * jnp.tanh(c_new)

    # Only the final chunk's hidden state is needed -> keep the big store off the
    # serial critical path of every other chunk.
    @pl.when(t_chunk == pl.num_programs(1) - 1)
    def _():
        hlast_ref[...] = h_sc[...]


def fc_kernel(h_ref, wfc_ref, bfc_ref, out_ref):
    # h_ref: (TB, Hp) f32   wfc_ref: (Hp, TV)   bfc_ref: (1, TV)   out_ref: (TB, TV) f32
    out_ref[...] = (jnp.dot(h_ref[...].astype(wfc_ref.dtype), wfc_ref[...],
                            preferred_element_type=jnp.float32)
                    + bfc_ref[...])


# ---------------------------------------------------------------------------
# wrapper
# ---------------------------------------------------------------------------

def init_params(key, vocab_size, embedding_dim, hidden_dim):
    ks = jax.random.split(key, 7)
    H = hidden_dim
    return {
        "embedding": jax.random.normal(ks[0], (vocab_size, embedding_dim),
                                       jnp.float32) * 0.1,
        "weight_ih": jax.random.normal(ks[1], (4 * H, embedding_dim),
                                       jnp.float32) * 0.1,
        "weight_hh": jax.random.normal(ks[2], (4 * H, H), jnp.float32) * 0.1,
        "bias_ih": jax.random.normal(ks[3], (4 * H,), jnp.float32) * 0.1,
        "bias_hh": jax.random.normal(ks[4], (4 * H,), jnp.float32) * 0.1,
        "fc_w": jax.random.normal(ks[5], (vocab_size, H), jnp.float32) * 0.1,
        "fc_b": jax.random.normal(ks[6], (vocab_size,), jnp.float32) * 0.1,
    }


@functools.partial(jax.jit, static_argnames=("mm_dtype",))
def text_generation_forward(tokens, params, mm_dtype=jnp.bfloat16):
    # tokens: (B, T) int32.  mm_dtype=bf16 (default) halves weight / gates_in HBM
    # bytes and doubles MXU rate; accumulation stays f32.  Pass mm_dtype=jnp.float32
    # for near-f32 numerics (MXU still uses multi-pass bf16 under DEFAULT precision).
    B, T = tokens.shape
    V, E = params["embedding"].shape
    H = params["weight_hh"].shape[1]
    f32 = jnp.float32
    w_bytes = int(np.dtype(mm_dtype).itemsize)

    # ----- padded / tiled sizes -------------------------------------------
    sub = 8 if w_bytes == 4 else 16         # sublane pack of the streamed dtype
    Hp = _round_up(H, 128)                  # lane-aligned per-gate blocks
    Ep = _round_up(E, 128)
    Vp = _round_up(V, 512)                  # >=512-wide lane-dense fc vocab tiles
    Bp = _round_up(B, sub)

    # generation-aware VMEM budget (v5e/v6e: 128 MiB, v7x: 64 MiB per TC)
    vmem_cap = _vmem_capacity_bytes()
    vmem_limit = int(min(max(vmem_cap * 4 // 5, 32 << 20), 120 << 20))
    budget = vmem_limit * 3 // 4
    two_cores = vmem_cap <= (72 << 20)      # heuristic: small VMEM => v7x (2 TCs)

    TB, TC = _pick_recurrence_tiles(Bp, T, Hp, w_bytes, w_bytes, budget,
                                    two_cores, sub)
    TCp = _pick_proj_time_tile(T, TB, Ep, Hp, w_bytes, w_bytes, budget)
    TV = _pick_fc_vocab_tile(Vp, Hp, TB, w_bytes, budget)

    T_pad = _round_up(T, TC)                # front-padded time for the recurrence
    nb, nt, ntp, nv = Bp // TB, T_pad // TC, T // TCp, Vp // TV

    cparams = functools.partial(pltpu.CompilerParams, vmem_limit_bytes=vmem_limit)

    # ----- parameter packing (constant-folded / fused by XLA under jit) ----
    emb_tab = jnp.pad(params["embedding"], ((0, 0), (0, Ep - E))).astype(mm_dtype)
    wih_p = _pack_gate_weights(params["weight_ih"].T, Ep, H, Hp).astype(mm_dtype)
    whh_p = _pack_gate_weights(params["weight_hh"].T, Hp, H, Hp).astype(mm_dtype)
    bias_p = _pack_gate_bias(
        (params["bias_ih"] + params["bias_hh"]).astype(f32), H, Hp)       # (1, 4Hp) f32
    wfc_p = _pad2(params["fc_w"].T, Hp, Vp).astype(mm_dtype)              # (Hp, Vp)
    bfc_p = jnp.pad(params["fc_b"], (0, Vp - V)).reshape(1, Vp).astype(f32)

    # ----- embedding lookup (gather kept as XLA glue), time-major layout ---
    tok_p = jnp.pad(tokens, ((0, Bp - B), (0, 0)))                        # (Bp, T)
    emb_tbe = jnp.transpose(emb_tab[tok_p], (1, 0, 2))                    # (T, Bp, Ep)

    # ----- 1) input projection: one large tiled GEMM, Wih resident ---------
    gates_in = pl.pallas_call(
        input_proj_kernel,
        out_shape=jax.ShapeDtypeStruct((T, Bp, 4 * Hp), mm_dtype),
        grid=(ntp, nb),
        in_specs=[
            pl.BlockSpec((TCp, TB, Ep), lambda t, b: (t, b, 0)),
            pl.BlockSpec((Ep, 4 * Hp), lambda t, b: (0, 0),
                         pipeline_mode=pl.Buffered(1)),         # resident, single copy
            pl.BlockSpec((1, 4 * Hp), lambda t, b: (0, 0)),
        ],
        out_specs=pl.BlockSpec((TCp, TB, 4 * Hp), lambda t, b: (t, b, 0)),
        compiler_params=cparams(dimension_semantics=("parallel", "parallel")),
    )(emb_tbe, wih_p, bias_p)

    # Front-pad with zero pre-activation gates when T is not a multiple of the
    # chunk: a zero gate chunk leaves h = c = 0 unchanged, so results match.
    if T_pad > T:
        gates_in = jnp.concatenate(
            [jnp.zeros((T_pad - T, Bp, 4 * Hp), gates_in.dtype), gates_in], axis=0)

    # ----- 2) LSTM recurrence: stream bf16 gate chunks, h/c in VMEM scratch
    h_last = pl.pallas_call(
        lstm_recurrence_kernel,
        out_shape=jax.ShapeDtypeStruct((Bp, Hp), f32),
        grid=(nb, nt),
        in_specs=[
            pl.BlockSpec((TC, TB, 4 * Hp), lambda b, t: (t, b, 0)),   # streamed
            pl.BlockSpec((Hp, 4 * Hp), lambda b, t: (0, 0),
                         pipeline_mode=pl.Buffered(1)),               # resident Whh
        ],
        out_specs=pl.BlockSpec((TB, Hp), lambda b, t: (b, 0)),
        scratch_shapes=[
            pltpu.VMEM((TB, Hp), f32),   # h
            pltpu.VMEM((TB, Hp), f32),   # c
        ],
        compiler_params=cparams(dimension_semantics=("parallel", "arbitrary")),
    )(gates_in, whh_p)

    # ----- 3) fc on the last hidden state, tiled over vocab ----------------
    logits_p = pl.pallas_call(
        fc_kernel,
        out_shape=jax.ShapeDtypeStruct((Bp, Vp), f32),
        grid=(nb, nv),
        in_specs=[
            pl.BlockSpec((TB, Hp), lambda b, j: (b, 0)),
            pl.BlockSpec((Hp, TV), lambda b, j: (0, j)),
            pl.BlockSpec((1, TV), lambda b, j: (0, j)),
        ],
        out_specs=pl.BlockSpec((TB, TV), lambda b, j: (b, j)),
        compiler_params=cparams(dimension_semantics=("parallel", "parallel")),
    )(h_last, wfc_p, bfc_p)

    return logits_p[:B, :V]


# ---------------------------------------------------------------------------
# pure-JAX reference (matches PyTorch nn.LSTM semantics)
# ---------------------------------------------------------------------------

def reference_forward(tokens, params):
    B, T = tokens.shape
    H = params["weight_hh"].shape[1]
    emb = params["embedding"][tokens]            # (B, T, E)
    h = jnp.zeros((B, H), jnp.float32)
    c = jnp.zeros((B, H), jnp.float32)
    wih_t = params["weight_ih"].T
    whh_t = params["weight_hh"].T
    bias = params["bias_ih"] + params["bias_hh"]
    for t in range(T):
        gates = emb[:, t, :] @ wih_t + h @ whh_t + bias
        i = jax.nn.sigmoid(gates[:, 0:H])
        f = jax.nn.sigmoid(gates[:, H:2 * H])
        g = jnp.tanh(gates[:, 2 * H:3 * H])
        o = jax.nn.sigmoid(gates[:, 3 * H:4 * H])
        c = f * c + i * g
        h = o * jnp.tanh(c)
    return h @ params["fc_w"].T + params["fc_b"]


if __name__ == "__main__":
    vocab_size, embedding_dim, hidden_dim = 64, 32, 32
    B, T = 2, 8

    key = jax.random.PRNGKey(0)
    pkey, tkey = jax.random.split(key)
    params = init_params(pkey, vocab_size, embedding_dim, hidden_dim)
    tokens = jax.random.randint(tkey, (B, T), 0, vocab_size, dtype=jnp.int32)

    ref = reference_forward(tokens, params)

    # default (bf16 weights / bf16 gates_in, f32 accumulation)
    out_bf16 = jax.block_until_ready(text_generation_forward(tokens, params))
    assert out_bf16.shape == (B, vocab_size)
    assert jnp.allclose(out_bf16, ref, atol=2e-2, rtol=2e-2), "bf16 mismatch vs reference"

    # f32 path (near-exact numerics)
    out_f32 = jax.block_until_ready(
        text_generation_forward(tokens, params, mm_dtype=jnp.float32))
    assert jnp.allclose(out_f32, ref, atol=2e-3, rtol=2e-3), "f32 mismatch vs reference"

    print("KERNEL_OK")
</pallas_src>

<mosaic_0001>
module attributes {stable_mosaic.version = 11 : i64} {
  func.func @input_proj_kernel(%arg0: i32, %arg1: i32, %arg2: memref<8x16x128xbf16, #tpu.memory_space<vmem>>, %arg3: memref<128x512xbf16, #tpu.memory_space<vmem>>, %arg4: memref<1x512xf32, #tpu.memory_space<vmem>>, %arg5: memref<8x16x512xbf16, #tpu.memory_space<vmem>>) attributes {dimension_semantics = [#tpu.dimension_semantics<parallel>, #tpu.dimension_semantics<parallel>], iteration_bounds = array<i64: 1, 1>, scalar_prefetch = 0 : i64, scratch_operands = 0 : i64, tpu.core_type = #tpu.core_type<tc>, window_params = [{transform_indices = @transform_0, window_bounds = array<i64: 8, 16, 128>}, {pipeline_mode = #tpu.pipeline_mode<synchronous>, transform_indices = @transform_1, window_bounds = array<i64: 128, 512>}, {pipeline_mode = #tpu.pipeline_mode<synchronous>, transform_indices = @transform_2, window_bounds = array<i64: 1, 512>}, {transform_indices = @transform_3, window_bounds = array<i64: 8, 16, 512>}]} {
    %c0 = arith.constant 0 : index
    %c0_0 = arith.constant 0 : index
    %c0_1 = arith.constant 0 : index
    %0 = vector.load %arg2[%c0, %c0_0, %c0_1] : memref<8x16x128xbf16, #tpu.memory_space<vmem>>, vector<8x16x128xbf16>
    %1 = vector.shape_cast %0 : vector<8x16x128xbf16> to vector<128x128xbf16>
    %c0_2 = arith.constant 0 : index
    %c0_3 = arith.constant 0 : index
    %2 = vector.load %arg3[%c0_2, %c0_3] : memref<128x512xbf16, #tpu.memory_space<vmem>>, vector<128x512xbf16>
    %cst = arith.constant dense<0.000000e+00> : vector<128x512xf32>
    %3 = tpu.matmul %1, %2, %cst {dimension_numbers = #tpu.dot_dimension_numbers<[1], [0], [0], [1], [0, 0, 1, 1], [], []>} : vector<128x128xbf16>, vector<128x512xbf16>, vector<128x512xf32> -> vector<128x512xf32>
    %c0_4 = arith.constant 0 : index
    %c0_5 = arith.constant 0 : index
    %4 = vector.load %arg4[%c0_4, %c0_5] : memref<1x512xf32, #tpu.memory_space<vmem>>, vector<1x512xf32>
    %5 = vector.broadcast %4 : vector<1x512xf32> to vector<128x512xf32>
    %6 = arith.addf %3, %5 : vector<128x512xf32>
    %7 = vector.shape_cast %6 : vector<128x512xf32> to vector<8x16x512xf32>
    %8 = arith.truncf %7 : vector<8x16x512xf32> to vector<8x16x512xbf16>
    %c0_6 = arith.constant 0 : index
    %c0_7 = arith.constant 0 : index
    %c0_8 = arith.constant 0 : index
    %9 = vector.load %arg5[%c0_6, %c0_7, %c0_8] : memref<8x16x512xbf16, #tpu.memory_space<vmem>>, vector<8x16x512xbf16>
    tpu.vector_store %arg5[%c0_6, %c0_7, %c0_8], %8 {strides = array<i32>} : memref<8x16x512xbf16, #tpu.memory_space<vmem>>, vector<8x16x512xbf16>,
    return
  }
  func.func @transform_0(%arg0: i32, %arg1: i32) -> (i32, i32, i32) {
    %c0_i32 = arith.constant 0 : i32
    %c0_i32_0 = arith.constant 0 : i32
    return %arg0, %arg1, %c0_i32 : i32, i32, i32
  }
  func.func @transform_1(%arg0: i32, %arg1: i32) -> (i32, i32) {
    %c0_i32 = arith.constant 0 : i32
    %c0_i32_0 = arith.constant 0 : i32
    %c0_i32_1 = arith.constant 0 : i32
    return %c0_i32, %c0_i32_0 : i32, i32
  }
  func.func @transform_2(%arg0: i32, %arg1: i32) -> (i32, i32) {
    %c0_i32 = arith.constant 0 : i32
    %c0_i32_0 = arith.constant 0 : i32
    %c0_i32_1 = arith.constant 0 : i32
    return %c0_i32, %c0_i32_0 : i32, i32
  }
  func.func @transform_3(%arg0: i32, %arg1: i32) -> (i32, i32, i32) {
    %c0_i32 = arith.constant 0 : i32
    %c0_i32_0 = arith.constant 0 : i32
    return %arg0, %arg1, %c0_i32 : i32, i32, i32
  }
}

module attributes {stable_mosaic.version = 11 : i64} {
  func.func @lstm_recurrence_kernel(%arg0: i32, %arg1: i32, %arg2: memref<8x16x512xbf16, #tpu.memory_space<vmem>>, %arg3: memref<128x512xbf16, #tpu.memory_space<vmem>>, %arg4: memref<16x128xf32, #tpu.memory_space<vmem>>, %arg5: memref<16x128xf32, #tpu.memory_space<vmem>>, %arg6: memref<16x128xf32, #tpu.memory_space<vmem>>) attributes {dimension_semantics = [#tpu.dimension_semantics<parallel>, #tpu.dimension_semantics<arbitrary>], iteration_bounds = array<i64: 1, 1>, scalar_prefetch = 0 : i64, scratch_operands = 2 : i64, tpu.core_type = #tpu.core_type<tc>, window_params = [{transform_indices = @transform_0, window_bounds = array<i64: 8, 16, 512>}, {pipeline_mode = #tpu.pipeline_mode<synchronous>, transform_indices = @transform_1, window_bounds = array<i64: 128, 512>}, {transform_indices = @transform_2, window_bounds = array<i64: 16, 128>}]} {
    %c0_i32 = arith.constant 0 : i32
    %0 = arith.cmpi eq, %arg1, %c0_i32 : i32
    %1 = arith.extui %0 : i1 to i32
    %c0_i32_0 = arith.constant 0 : i32
    %2 = arith.cmpi ne, %1, %c0_i32_0 : i32
    scf.if %2 {
      %cst_178 = arith.constant 0.000000e+00 : f32
      %342 = vector.broadcast %cst_178 : f32 to vector<16x128xf32>
      %c0_179 = arith.constant 0 : index
      %c0_180 = arith.constant 0 : index
      %343 = vector.load %arg5[%c0_179, %c0_180] : memref<16x128xf32, #tpu.memory_space<vmem>>, vector<16x128xf32>
      tpu.vector_store %arg5[%c0_179, %c0_180], %342 {strides = array<i32>} : memref<16x128xf32, #tpu.memory_space<vmem>>, vector<16x128xf32>,
      %cst_181 = arith.constant 0.000000e+00 : f32
      %344 = vector.broadcast %cst_181 : f32 to vector<16x128xf32>
      %c0_182 = arith.constant 0 : index
      %c0_183 = arith.constant 0 : index
      %345 = vector.load %arg6[%c0_182, %c0_183] : memref<16x128xf32, #tpu.memory_space<vmem>>, vector<16x128xf32>
      tpu.vector_store %arg6[%c0_182, %c0_183], %344 {strides = array<i32>} : memref<16x128xf32, #tpu.memory_space<vmem>>, vector<16x128xf32>,
    } else {
    }
    %c0 = arith.constant 0 : index
    %c0_1 = arith.constant 0 : index
    %3 = vector.load %arg5[%c0, %c0_1] : memref<16x128xf32, #tpu.memory_space<vmem>>, vector<16x128xf32>
    %4 = arith.truncf %3 : vector<16x128xf32> to vector<16x128xbf16>
    %c0_2 = arith.constant 0 : index
    %c0_3 = arith.constant 0 : index
    %5 = vector.load %arg3[%c0_2, %c0_3] : memref<128x512xbf16, #tpu.memory_space<vmem>>, vector<128x512xbf16>
    %cst = arith.constant dense<0.000000e+00> : vector<16x512xf32>
    %6 = tpu.matmul %4, %5, %cst {dimension_numbers = #tpu.dot_dimension_numbers<[1], [0], [0], [1], [0, 0, 1, 1], [], []>} : vector<16x128xbf16>, vector<128x512xbf16>, vector<16x512xf32> -> vector<16x512xf32>
    %c0_4 = arith.constant 0 : index
    %c0_5 = arith.constant 0 : index
    %c0_6 = arith.constant 0 : index
    %7 = vector.load %arg2[%c0_4, %c0_5, %c0_6] : memref<8x16x512xbf16, #tpu.memory_space<vmem>>, vector<1x16x512xbf16>
    %8 = vector.shape_cast %7 : vector<1x16x512xbf16> to vector<16x512xbf16>
    %9 = arith.extf %8 : vector<16x512xbf16> to vector<16x512xf32>
    %10 = arith.addf %9, %6 : vector<16x512xf32>
    %11 = vector.extract_strided_slice %10 {offsets = [0, 0], sizes = [16, 128], strides = [1, 1]} : vector<16x512xf32> to vector<16x128xf32>
    %cst_7 = arith.constant 5.000000e-01 : f32
    %12 = vector.broadcast %cst_7 : f32 to vector<16x128xf32>
    %13 = arith.mulf %12, %11 : vector<16x128xf32>
    %14 = math.tanh %13 : vector<16x128xf32>
    %cst_8 = arith.constant 5.000000e-01 : f32
    %15 = vector.broadcast %cst_8 : f32 to vector<16x128xf32>
    %16 = arith.mulf %15, %14 : vector<16x128xf32>
    %cst_9 = arith.constant 5.000000e-01 : f32
    %17 = vector.broadcast %cst_9 : f32 to vector<16x128xf32>
    %18 = arith.addf %16, %17 : vector<16x128xf32>
    %19 = vector.extract_strided_slice %10 {offsets = [0, 128], sizes = [16, 128], strides = [1, 1]} : vector<16x512xf32> to vector<16x128xf32>
    %cst_10 = arith.constant 5.000000e-01 : f32
    %20 = vector.broadcast %cst_10 : f32 to vector<16x128xf32>
    %21 = arith.mulf %20, %19 : vector<16x128xf32>
    %22 = math.tanh %21 : vector<16x128xf32>
    %cst_11 = arith.constant 5.000000e-01 : f32
    %23 = vector.broadcast %cst_11 : f32 to vector<16x128xf32>
    %24 = arith.mulf %23, %22 : vector<16x128xf32>
    %cst_12 = arith.constant 5.000000e-01 : f32
    %25 = vector.broadcast %cst_12 : f32 to vector<16x128xf32>
    %26 = arith.addf %24, %25 : vector<16x128xf32>
    %27 = vector.extract_strided_slice %10 {offsets = [0, 256], sizes = [16, 128], strides = [1, 1]} : vector<16x512xf32> to vector<16x128xf32>
    %28 = math.tanh %27 : vector<16x128xf32>
    %29 = vector.extract_strided_slice %10 {offsets = [0, 384], sizes = [16, 128], strides = [1, 1]} : vector<16x512xf32> to vector<16x128xf32>
    %cst_13 = arith.constant 5.000000e-01 : f32
    %30 = vector.broadcast %cst_13 : f32 to vector<16x128xf32>
    %31 = arith.mulf %30, %29 : vector<16x128xf32>
    %32 = math.tanh %31 : vector<16x128xf32>
    %cst_14 = arith.constant 5.000000e-01 : f32
    %33 = vector.broadcast %cst_14 : f32 to vector<16x128xf32>
    %34 = arith.mulf %33, %32 : vector<16x128xf32>
    %cst_15 = arith.constant 5.000000e-01 : f32
    %35 = vector.broadcast %cst_15 : f32 to vector<16x128xf32>
    %36 = arith.addf %34, %35 : vector<16x128xf32>
    %c0_16 = arith.constant 0 : index
    %c0_17 = arith.constant 0 : index
    %37 = vector.load %arg6[%c0_16, %c0_17] : memref<16x128xf32, #tpu.memory_space<vmem>>, vector<16x128xf32>
    %38 = arith.mulf %26, %37 : vector<16x128xf32>
    %39 = arith.mulf %18, %28 : vector<16x128xf32>
    %40 = arith.addf %38, %39 : vector<16x128xf32>
    %c0_18 = arith.constant 0 : index
    %c0_19 = arith.constant 0 : index
    %41 = vector.load %arg6[%c0_18, %c0_19] : memref<16x128xf32, #tpu.memory_space<vmem>>, vector<16x128xf32>
    tpu.vector_store %arg6[%c0_18, %c0_19], %40 {strides = array<i32>} : memref<16x128xf32, #tpu.memory_space<vmem>>, vector<16x128xf32>,
    %42 = math.tanh %40 : vector<16x128xf32>
    %43 = arith.mulf %36, %42 : vector<16x128xf32>
    %c0_20 = arith.constant 0 : index
    %c0_21 = arith.constant 0 : index
    %44 = vector.load %arg5[%c0_20, %c0_21] : memref<16x128xf32, #tpu.memory_space<vmem>>, vector<16x128xf32>
    tpu.vector_store %arg5[%c0_20, %c0_21], %43 {strides = array<i32>} : memref<16x128xf32, #tpu.memory_space<vmem>>, vector<16x128xf32>,
    %c0_22 = arith.constant 0 : index
    %c0_23 = arith.constant 0 : index
    %45 = vector.load %arg5[%c0_22, %c0_23] : memref<16x128xf32, #tpu.memory_space<vmem>>, vector<16x128xf32>
    %46 = arith.truncf %45 : vector<16x128xf32> to vector<16x128xbf16>
    %c0_24 = arith.constant 0 : index
    %c0_25 = arith.constant 0 : index
    %47 = vector.load %arg3[%c0_24, %c0_25] : memref<128x512xbf16, #tpu.memory_space<vmem>>, vector<128x512xbf16>
    %cst_26 = arith.constant dense<0.000000e+00> : vector<16x512xf32>
    %48 = tpu.matmul %46, %47, %cst_26 {dimension_numbers = #tpu.dot_dimension_numbers<[1], [0], [0], [1], [0, 0, 1, 1], [], []>} : vector<16x128xbf16>, vector<128x512xbf16>, vector<16x512xf32> -> vector<16x512xf32>
    %c1 = arith.constant 1 : index
    %c0_27 = arith.constant 0 : index
    %c0_28 = arith.constant 0 : index
    %49 = vector.load %arg2[%c1, %c0_27, %c0_28] : memref<8x16x512xbf16, #tpu.memory_space<vmem>>, vector<1x16x512xbf16>
    %50 = vector.shape_cast %49 : vector<1x16x512xbf16> to vector<16x512xbf16>
    %51 = arith.extf %50 : vector<16x512xbf16> to vector<16x512xf32>
    %52 = arith.addf %51, %48 : vector<16x512xf32>
    %53 = vector.extract_strided_slice %52 {offsets = [0, 0], sizes = [16, 128], strides = [1, 1]} : vector<16x512xf32> to vector<16x128xf32>
    %cst_29 = arith.constant 5.000000e-01 : f32
    %54 = vector.broadcast %cst_29 : f32 to vector<16x128xf32>
    %55 = arith.mulf %54, %53 : vector<16x128xf32>
    %56 = math.tanh %55 : vector<16x128xf32>
    %cst_30 = arith.constant 5.000000e-01 : f32
    %57 = vector.broadcast %cst_30 : f32 to vector<16x128xf32>
    %58 = arith.mulf %57, %56 : vector<16x128xf32>
    %cst_31 = arith.constant 5.000000e-01 : f32
    %59 = vector.broadcast %cst_31 : f32 to vector<16x128xf32>
    %60 = arith.addf %58, %59 : vector<16x128xf32>
    %61 = vector.extract_strided_slice %52 {offsets = [0, 128], sizes = [16, 128], strides = [1, 1]} : vector<16x512xf32> to vector<16x128xf32>
    %cst_32 = arith.constant 5.000000e-01 : f32
    %62 = vector.broadcast %cst_32 : f32 to vector<16x128xf32>
    %63 = arith.mulf %62, %61 : vector<16x128xf32>
    %64 = math.tanh %63 : vector<16x128xf32>
    %cst_33 = arith.constant 5.000000e-01 : f32
    %65 = vector.broadcast %cst_33 : f32 to vector<16x128xf32>
    %66 = arith.mulf %65, %64 : vector<16x128xf32>
    %cst_34 = arith.constant 5.000000e-01 : f32
    %67 = vector.broadcast %cst_34 : f32 to vector<16x128xf32>
    %68 = arith.addf %66, %67 : vector<16x128xf32>
    %69 = vector.extract_strided_slice %52 {offsets = [0, 256], sizes = [16, 128], strides = [1, 1]} : vector<16x512xf32> to vector<16x128xf32>
    %70 = math.tanh %69 : vector<16x128xf32>
    %71 = vector.extract_strided_slice %52 {offsets = [0, 384], sizes = [16, 128], strides = [1, 1]} : vector<16x512xf32> to vector<16x128xf32>
    %cst_35 = arith.constant 5.000000e-01 : f32
    %72 = vector.broadcast %cst_35 : f32 to vector<16x128xf32>
    %73 = arith.mulf %72, %71 : vector<16x128xf32>
    %74 = math.tanh %73 : vector<16x128xf32>
    %cst_36 = arith.constant 5.000000e-01 : f32
    %75 = vector.broadcast %cst_36 : f32 to vector<16x128xf32>
    %76 = arith.mulf %75, %74 : vector<16x128xf32>
    %cst_37 = arith.constant 5.000000e-01 : f32
    %77 = vector.broadcast %cst_37 : f32 to vector<16x128xf32>
    %78 = arith.addf %76, %77 : vector<16x128xf32>
    %c0_38 = arith.constant 0 : index
    %c0_39 = arith.constant 0 : index
    %79 = vector.load %arg6[%c0_38, %c0_39] : memref<16x128xf32, #tpu.memory_space<vmem>>, vector<16x128xf32>
    %80 = arith.mulf %68, %79 : vector<16x128xf32>
    %81 = arith.mulf %60, %70 : vector<16x128xf32>
    %82 = arith.addf %80, %81 : vector<16x128xf32>
    %c0_40 = arith.constant 0 : index
    %c0_41 = arith.constant 0 : index
    %83 = vector.load %arg6[%c0_40, %c0_41] : memref<16x128xf32, #tpu.memory_space<vmem>>, vector<16x128xf32>
    tpu.vector_store %arg6[%c0_40, %c0_41], %82 {strides = array<i32>} : memref<16x128xf32, #tpu.memory_space<vmem>>, vector<16x128xf32>,
    %84 = math.tanh %82 : vector<16x128xf32>
    %85 = arith.mulf %78, %84 : vector<16x128xf32>
    %c0_42 = arith.constant 0 : index
    %c0_43 = arith.constant 0 : index
    %86 = vector.load %arg5[%c0_42, %c0_43] : memref<16x128xf32, #tpu.memory_space<vmem>>, vector<16x128xf32>
    tpu.vector_store %arg5[%c0_42, %c0_43], %85 {strides = array<i32>} : memref<16x128xf32, #tpu.memory_space<vmem>>, vector<16x128xf32>,
    %c0_44 = arith.constant 0 : index
    %c0_45 = arith.constant 0 : index
    %87 = vector.load %arg5[%c0_44, %c0_45] : memref<16x128xf32, #tpu.memory_space<vmem>>, vector<16x128xf32>
    %88 = arith.truncf %87 : vector<16x128xf32> to vector<16x128xbf16>
    %c0_46 = arith.constant 0 : index
    %c0_47 = arith.constant 0 : index
    %89 = vector.load %arg3[%c0_46, %c0_47] : memref<128x512xbf16, #tpu.memory_space<vmem>>, vector<128x512xbf16>
    %cst_48 = arith.constant dense<0.000000e+00> : vector<16x512xf32>
    %90 = tpu.matmul %88, %89, %cst_48 {dimension_numbers = #tpu.dot_dimension_numbers<[1], [0], [0], [1], [0, 0, 1, 1], [], []>} : vector<16x128xbf16>, vector<128x512xbf16>, vector<16x512xf32> -> vector<16x512xf32>
    %c2 = arith.constant 2 : index
    %c0_49 = arith.constant 0 : index
    %c0_50 = arith.constant 0 : index
    %91 = vector.load %arg2[%c2, %c0_49, %c0_50] : memref<8x16x512xbf16, #tpu.memory_space<vmem>>, vector<1x16x512xbf16>
    %92 = vector.shape_cast %91 : vector<1x16x512xbf16> to vector<16x512xbf16>
    %93 = arith.extf %92 : vector<16x512xbf16> to vector<16x512xf32>
    %94 = arith.addf %93, %90 : vector<16x512xf32>
    %95 = vector.extract_strided_slice %94 {offsets = [0, 0], sizes = [16, 128], strides = [1, 1]} : vector<16x512xf32> to vector<16x128xf32>
    %cst_51 = arith.constant 5.000000e-01 : f32
    %96 = vector.broadcast %cst_51 : f32 to vector<16x128xf32>
    %97 = arith.mulf %96, %95 : vector<16x128xf32>
    %98 = math.tanh %97 : vector<16x128xf32>
    %cst_52 = arith.constant 5.000000e-01 : f32
    %99 = vector.broadcast %cst_52 : f32 to vector<16x128xf32>
    %100 = arith.mulf %99, %98 : vector<16x128xf32>
    %cst_53 = arith.constant 5.000000e-01 : f32
    %101 = vector.broadcast %cst_53 : f32 to vector<16x128xf32>
    %102 = arith.addf %100, %101 : vector<16x128xf32>
    %103 = vector.extract_strided_slice %94 {offsets = [0, 128], sizes = [16, 128], strides = [1, 1]} : vector<16x512xf32> to vector<16x128xf32>
    %cst_54 = arith.constant 5.000000e-01 : f32
    %104 = vector.broadcast %cst_54 : f32 to vector<16x128xf32>
    %105 = arith.mulf %104, %103 : vector<16x128xf32>
    %106 = math.tanh %105 : vector<16x128xf32>
    %cst_55 = arith.constant 5.000000e-01 : f32
    %107 = vector.broadcast %cst_55 : f32 to vector<16x128xf32>
    %108 = arith.mulf %107, %106 : vector<16x128xf32>
    %cst_56 = arith.constant 5.000000e-01 : f32
    %109 = vector.broadcast %cst_56 : f32 to vector<16x128xf32>
    %110 = arith.addf %108, %109 : vector<16x128xf32>
    %111 = vector.extract_strided_slice %94 {offsets = [0, 256], sizes = [16, 128], strides = [1, 1]} : vector<16x512xf32> to vector<16x128xf32>
    %112 = math.tanh %111 : vector<16x128xf32>
    %113 = vector.extract_strided_slice %94 {offsets = [0, 384], sizes = [16, 128], strides = [1, 1]} : vector<16x512xf32> to vector<16x128xf32>
    %cst_57 = arith.constant 5.000000e-01 : f32
    %114 = vector.broadcast %cst_57 : f32 to vector<16x128xf32>
    %115 = arith.mulf %114, %113 : vector<16x128xf32>
    %116 = math.tanh %115 : vector<16x128xf32>
    %cst_58 = arith.constant 5.000000e-01 : f32
    %117 = vector.broadcast %cst_58 : f32 to vector<16x128xf32>
    %118 = arith.mulf %117, %116 : vector<16x128xf32>
    %cst_59 = arith.constant 5.000000e-01 : f32
    %119 = vector.broadcast %cst_59 : f32 to vector<16x128xf32>
    %120 = arith.addf %118, %119 : vector<16x128xf32>
    %c0_60 = arith.constant 0 : index
    %c0_61 = arith.constant 0 : index
    %121 = vector.load %arg6[%c0_60, %c0_61] : memref<16x128xf32, #tpu.memory_space<vmem>>, vector<16x128xf32>
    %122 = arith.mulf %110, %121 : vector<16x128xf32>
    %123 = arith.mulf %102, %112 : vector<16x128xf32>
    %124 = arith.addf %122, %123 : vector<16x128xf32>
    %c0_62 = arith.constant 0 : index
    %c0_63 = arith.constant 0 : index
    %125 = vector.load %arg6[%c0_62, %c0_63] : memref<16x128xf32, #tpu.memory_space<vmem>>, vector<16x128xf32>
    tpu.vector_store %arg6[%c0_62, %c0_63], %124 {strides = array<i32>} : memref<16x128xf32, #tpu.memory_space<vmem>>, vector<16x128xf32>,
    %126 = math.tanh %124 : vector<16x128xf32>
    %127 = arith.mulf %120, %126 : vector<16x128xf32>
    %c0_64 = arith.constant 0 : index
    %c0_65 = arith.constant 0 : index
    %128 = vector.load %arg5[%c0_64, %c0_65] : memref<16x128xf32, #tpu.memory_space<vmem>>, vector<16x128xf32>
    tpu.vector_store %arg5[%c0_64, %c0_65], %127 {strides = array<i32>} : memref<16x128xf32, #tpu.memory_space<vmem>>, vector<16x128xf32>,
    %c0_66 = arith.constant 0 : index
    %c0_67 = arith.constant 0 : index
    %129 = vector.load %arg5[%c0_66, %c0_67] : memref<16x128xf32, #tpu.memory_space<vmem>>, vector<16x128xf32>
    %130 = arith.truncf %129 : vector<16x128xf32> to vector<16x128xbf16>
    %c0_68 = arith.constant 0 : index
    %c0_69 = arith.constant 0 : index
    %131 = vector.load %arg3[%c0_68, %c0_69] : memref<128x512xbf16, #tpu.memory_space<vmem>>, vector<128x512xbf16>
    %cst_70 = arith.constant dense<0.000000e+00> : vector<16x512xf32>
    %132 = tpu.matmul %130, %131, %cst_70 {dimension_numbers = #tpu.dot_dimension_numbers<[1], [0], [0], [1], [0, 0, 1, 1], [], []>} : vector<16x128xbf16>, vector<128x512xbf16>, vector<16x512xf32> -> vector<16x512xf32>
    %c3 = arith.constant 3 : index
    %c0_71 = arith.constant 0 : index
    %c0_72 = arith.constant 0 : index
    %133 = vector.load %arg2[%c3, %c0_71, %c0_72] : memref<8x16x512xbf16, #tpu.memory_space<vmem>>, vector<1x16x512xbf16>
    %134 = vector.shape_cast %133 : vector<1x16x512xbf16> to vector<16x512xbf16>
    %135 = arith.extf %134 : vector<16x512xbf16> to vector<16x512xf32>
    %136 = arith.addf %135, %132 : vector<16x512xf32>
    %137 = vector.extract_strided_slice %136 {offsets = [0, 0], sizes = [16, 128], strides = [1, 1]} : vector<16x512xf32> to vector<16x128xf32>
    %cst_73 = arith.constant 5.000000e-01 : f32
    %138 = vector.broadcast %cst_73 : f32 to vector<16x128xf32>
    %139 = arith.mulf %138, %137 : vector<16x128xf32>
    %140 = math.tanh %139 : vector<16x128xf32>
    %cst_74 = arith.constant 5.000000e-01 : f32
    %141 = vector.broadcast %cst_74 : f32 to vector<16x128xf32>
    %142 = arith.mulf %141, %140 : vector<16x128xf32>
    %cst_75 = arith.constant 5.000000e-01 : f32
    %143 = vector.broadcast %cst_75 : f32 to vector<16x128xf32>
    %144 = arith.addf %142, %143 : vector<16x128xf32>
    %145 = vector.extract_strided_slice %136 {offsets = [0, 128], sizes = [16, 128], strides = [1, 1]} : vector<16x512xf32> to vector<16x128xf32>
    %cst_76 = arith.constant 5.000000e-01 : f32
    %146 = vector.broadcast %cst_76 : f32 to vector<16x128xf32>
    %147 = arith.mulf %146, %145 : vector<16x128xf32>
    %148 = math.tanh %147 : vector<16x128xf32>
    %cst_77 = arith.constant 5.000000e-01 : f32
    %149 = vector.broadcast %cst_77 : f32 to vector<16x128xf32>
    %150 = arith.mulf %149, %148 : vector<16x128xf32>
    %cst_78 = arith.constant 5.000000e-01 : f32
    %151 = vector.broadcast %cst_78 : f32 to vector<16x128xf32>
    %152 = arith.addf %150, %151 : vector<16x128xf32>
    %153 = vector.extract_strided_slice %136 {offsets = [0, 256], sizes = [16, 128], strides = [1, 1]} : vector<16x512xf32> to vector<16x128xf32>
    %154 = math.tanh %153 : vector<16x128xf32>
    %155 = vector.extract_strided_slice %136 {offsets = [0, 384], sizes = [16, 128], strides = [1, 1]} : vector<16x512xf32> to vector<16x128xf32>
    %cst_79 = arith.constant 5.000000e-01 : f32
    %156 = vector.broadcast %cst_79 : f32 to vector<16x128xf32>
    %157 = arith.mulf %156, %155 : vector<16x128xf32>
    %158 = math.tanh %157 : vector<16x128xf32>
    %cst_80 = arith.constant 5.000000e-01 : f32
    %159 = vector.broadcast %cst_80 : f32 to vector<16x128xf32>
    %160 = arith.mulf %159, %158 : vector<16x128xf32>
    %cst_81 = arith.constant 5.000000e-01 : f32
    %161 = vector.broadcast %cst_81 : f32 to vector<16x128xf32>
    %162 = arith.addf %160, %161 : vector<16x128xf32>
    %c0_82 = arith.constant 0 : index
    %c0_83 = arith.constant 0 : index
    %163 = vector.load %arg6[%c0_82, %c0_83] : memref<16x128xf32, #tpu.memory_space<vmem>>, vector<16x128xf32>
    %164 = arith.mulf %152, %163 : vector<16x128xf32>
    %165 = arith.mulf %144, %154 : vector<16x128xf32>
    %166 = arith.addf %164, %165 : vector<16x128xf32>
    %c0_84 = arith.constant 0 : index
    %c0_85 = arith.constant 0 : index
    %167 = vector.load %arg6[%c0_84, %c0_85] : memref<16x128xf32, #tpu.memory_space<vmem>>, vector<16x128xf32>
    tpu.vector_store %arg6[%c0_84, %c0_85], %166 {strides = array<i32>} : memref<16x128xf32, #tpu.memory_space<vmem>>, vector<16x128xf32>,
    %168 = math.tanh %166 : vector<16x128xf32>
    %169 = arith.mulf %162, %168 : vector<16x128xf32>
    %c0_86 = arith.constant 0 : index
    %c0_87 = arith.constant 0 : index
    %170 = vector.load %arg5[%c0_86, %c0_87] : memref<16x128xf32, #tpu.memory_space<vmem>>, vector<16x128xf32>
    tpu.vector_store %arg5[%c0_86, %c0_87], %169 {strides = array<i32>} : memref<16x128xf32, #tpu.memory_space<vmem>>, vector<16x128xf32>,
    %c0_88 = arith.constant 0 : index
    %c0_89 = arith.constant 0 : index
    %171 = vector.load %arg5[%c0_88, %c0_89] : memref<16x128xf32, #tpu.memory_space<vmem>>, vector<16x128xf32>
    %172 = arith.truncf %171 : vector<16x128xf32> to vector<16x128xbf16>
    %c0_90 = arith.constant 0 : index
    %c0_91 = arith.constant 0 : index
    %173 = vector.load %arg3[%c0_90, %c0_91] : memref<128x512xbf16, #tpu.memory_space<vmem>>, vector<128x512xbf16>
    %cst_92 = arith.constant dense<0.000000e+00> : vector<16x512xf32>
    %174 = tpu.matmul %172, %173, %cst_92 {dimension_numbers = #tpu.dot_dimension_numbers<[1], [0], [0], [1], [0, 0, 1, 1], [], []>} : vector<16x128xbf16>, vector<128x512xbf16>, vector<16x512xf32> -> vector<16x512xf32>
    %c4 = arith.constant 4 : index
    %c0_93 = arith.constant 0 : index
    %c0_94 = arith.constant 0 : index
    %175 = vector.load %arg2[%c4, %c0_93, %c0_94] : memref<8x16x512xbf16, #tpu.memory_space<vmem>>, vector<1x16x512xbf16>
    %176 = vector.shape_cast %175 : vector<1x16x512xbf16> to vector<16x512xbf16>
    %177 = arith.extf %176 : vector<16x512xbf16> to vector<16x512xf32>
    %178 = arith.addf %177, %174 : vector<16x512xf32>
    %179 = vector.extract_strided_slice %178 {offsets = [0, 0], sizes = [16, 128], strides = [1, 1]} : vector<16x512xf32> to vector<16x128xf32>
    %cst_95 = arith.constant 5.000000e-01 : f32
    %180 = vector.broadcast %cst_95 : f32 to vector<16x128xf32>
    %181 = arith.mulf %180, %179 : vector<16x128xf32>
    %182 = math.tanh %181 : vector<16x128xf32>
    %cst_96 = arith.constant 5.000000e-01 : f32
    %183 = vector.broadcast %cst_96 : f32 to vector<16x128xf32>
    %184 = arith.mulf %183, %182 : vector<16x128xf32>
    %cst_97 = arith.constant 5.000000e-01 : f32
    %185 = vector.broadcast %cst_97 : f32 to vector<16x128xf32>
    %186 = arith.addf %184, %185 : vector<16x128xf32>
    %187 = vector.extract_strided_slice %178 {offsets = [0, 128], sizes = [16, 128], strides = [1, 1]} : vector<16x512xf32> to vector<16x128xf32>
    %cst_98 = arith.constant 5.000000e-01 : f32
    %188 = vector.broadcast %cst_98 : f32 to vector<16x128xf32>
    %189 = arith.mulf %188, %187 : vector<16x128xf32>
    %190 = math.tanh %189 : vector<16x128xf32>
    %cst_99 = arith.constant 5.000000e-01 : f32
    %191 = vector.broadcast %cst_99 : f32 to vector<16x128xf32>
    %192 = arith.mulf %191, %190 : vector<16x128xf32>
    %cst_100 = arith.constant 5.000000e-01 : f32
    %193 = vector.broadcast %cst_100 : f32 to vector<16x128xf32>
    %194 = arith.addf %192, %193 : vector<16x128xf32>
    %195 = vector.extract_strided_slice %178 {offsets = [0, 256], sizes = [16, 128], strides = [1, 1]} : vector<16x512xf32> to vector<16x128xf32>
    %196 = math.tanh %195 : vector<16x128xf32>
    %197 = vector.extract_strided_slice %178 {offsets = [0, 384], sizes = [16, 128], strides = [1, 1]} : vector<16x512xf32> to vector<16x128xf32>
    %cst_101 = arith.constant 5.000000e-01 : f32
    %198 = vector.broadcast %cst_101 : f32 to vector<16x128xf32>
    %199 = arith.mulf %198, %197 : vector<16x128xf32>
    %200 = math.tanh %199 : vector<16x128xf32>
    %cst_102 = arith.constant 5.000000e-01 : f32
    %201 = vector.broadcast %cst_102 : f32 to vector<16x128xf32>
    %202 = arith.mulf %201, %200 : vector<16x128xf32>
    %cst_103 = arith.constant 5.000000e-01 : f32
    %203 = vector.broadcast %cst_103 : f32 to vector<16x128xf32>
    %204 = arith.addf %202, %203 : vector<16x128xf32>
    %c0_104 = arith.constant 0 : index
    %c0_105 = arith.constant 0 : index
    %205 = vector.load %arg6[%c0_104, %c0_105] : memref<16x128xf32, #tpu.memory_space<vmem>>, vector<16x128xf32>
    %206 = arith.mulf %194, %205 : vector<16x128xf32>
    %207 = arith.mulf %186, %196 : vector<16x128xf32>
    %208 = arith.addf %206, %207 : vector<16x128xf32>
    %c0_106 = arith.constant 0 : index
    %c0_107 = arith.constant 0 : index
    %209 = vector.load %arg6[%c0_106, %c0_107] : memref<16x128xf32, #tpu.memory_space<vmem>>, vector<16x128xf32>
    tpu.vector_store %arg6[%c0_106, %c0_107], %208 {strides = array<i32>} : memref<16x128xf32, #tpu.memory_space<vmem>>, vector<16x128xf32>,
    %210 = math.tanh %208 : vector<16x128xf32>
    %211 = arith.mulf %204, %210 : vector<16x128xf32>
    %c0_108 = arith.constant 0 : index
    %c0_109 = arith.constant 0 : index
    %212 = vector.load %arg5[%c0_108, %c0_109] : memref<16x128xf32, #tpu.memory_space<vmem>>, vector<16x128xf32>
    tpu.vector_store %arg5[%c0_108, %c0_109], %211 {strides = array<i32>} : memref<16x128xf32, #tpu.memory_space<vmem>>, vector<16x128xf32>,
    %c0_110 = arith.constant 0 : index
    %c0_111 = arith.constant 0 : index
    %213 = vector.load %arg5[%c0_110, %c0_111] : memref<16x128xf32, #tpu.memory_space<vmem>>, vector<16x128xf32>
    %214 = arith.truncf %213 : vector<16x128xf32> to vector<16x128xbf16>
    %c0_112 = arith.constant 0 : index
    %c0_113 = arith.constant 0 : index
    %215 = vector.load %arg3[%c0_112, %c0_113] : memref<128x512xbf16, #tpu.memory_space<vmem>>, vector<128x512xbf16>
    %cst_114 = arith.constant dense<0.000000e+00> : vector<16x512xf32>
    %216 = tpu.matmul %214, %215, %cst_114 {dimension_numbers = #tpu.dot_dimension_numbers<[1], [0], [0], [1], [0, 0, 1, 1], [], []>} : vector<16x128xbf16>, vector<128x512xbf16>, vector<16x512xf32> -> vector<16x512xf32>
    %c5 = arith.constant 5 : index
    %c0_115 = arith.constant 0 : index
    %c0_116 = arith.constant 0 : index
    %217 = vector.load %arg2[%c5, %c0_115, %c0_116] : memref<8x16x512xbf16, #tpu.memory_space<vmem>>, vector<1x16x512xbf16>
    %218 = vector.shape_cast %217 : vector<1x16x512xbf16> to vector<16x512xbf16>
    %219 = arith.extf %218 : vector<16x512xbf16> to vector<16x512xf32>
    %220 = arith.addf %219, %216 : vector<16x512xf32>
    %221 = vector.extract_strided_slice %220 {offsets = [0, 0], sizes = [16, 128], strides = [1, 1]} : vector<16x512xf32> to vector<16x128xf32>
    %cst_117 = arith.constant 5.000000e-01 : f32
    %222 = vector.broadcast %cst_117 : f32 to vector<16x128xf32>
    %223 = arith.mulf %222, %221 : vector<16x128xf32>
    %224 = math.tanh %223 : vector<16x128xf32>
    %cst_118 = arith.constant 5.000000e-01 : f32
    %225 = vector.broadcast %cst_118 : f32 to vector<16x128xf32>
    %226 = arith.mulf %225, %224 : vector<16x128xf32>
    %cst_119 = arith.constant 5.000000e-01 : f32
    %227 = vector.broadcast %cst_119 : f32 to vector<16x128xf32>
    %228 = arith.addf %226, %227 : vector<16x128xf32>
    %229 = vector.extract_strided_slice %220 {offsets = [0, 128], sizes = [16, 128], strides = [1, 1]} : vector<16x512xf32> to vector<16x128xf32>
    %cst_120 = arith.constant 5.000000e-01 : f32
    %230 = vector.broadcast %cst_120 : f32 to vector<16x128xf32>
    %231 = arith.mulf %230, %229 : vector<16x128xf32>
    %232 = math.tanh %231 : vector<16x128xf32>
    %cst_121 = arith.constant 5.000000e-01 : f32
    %233 = vector.broadcast %cst_121 : f32 to vector<16x128xf32>
    %234 = arith.mulf %233, %232 : vector<16x128xf32>
    %cst_122 = arith.constant 5.000000e-01 : f32
    %235 = vector.broadcast %cst_122 : f32 to vector<16x128xf32>
    %236 = arith.addf %234, %235 : vector<16x128xf32>
    %237 = vector.extract_strided_slice %220 {offsets = [0, 256], sizes = [16, 128], strides = [1, 1]} : vector<16x512xf32> to vector<16x128xf32>
    %238 = math.tanh %237 : vector<16x128xf32>
    %239 = vector.extract_strided_slice %220 {offsets = [0, 384], sizes = [16, 128], strides = [1, 1]} : vector<16x512xf32> to vector<16x128xf32>
    %cst_123 = arith.constant 5.000000e-01 : f32
    %240 = vector.broadcast %cst_123 : f32 to vector<16x128xf32>
    %241 = arith.mulf %240, %239 : vector<16x128xf32>
    %242 = math.tanh %241 : vector<16x128xf32>
    %cst_124 = arith.constant 5.000000e-01 : f32
    %243 = vector.broadcast %cst_124 : f32 to vector<16x128xf32>
    %244 = arith.mulf %243, %242 : vector<16x128xf32>
    %cst_125 = arith.constant 5.000000e-01 : f32
    %245 = vector.broadcast %cst_125 : f32 to vector<16x128xf32>
    %246 = arith.addf %244, %245 : vector<16x128xf32>
    %c0_126 = arith.constant 0 : index
    %c0_127 = arith.constant 0 : index
    %247 = vector.load %arg6[%c0_126, %c0_127] : memref<16x128xf32, #tpu.memory_space<vmem>>, vector<16x128xf32>
    %248 = arith.mulf %236, %247 : vector<16x128xf32>
    %249 = arith.mulf %228, %238 : vector<16x128xf32>
    %250 = arith.addf %248, %249 : vector<16x128xf32>
    %c0_128 = arith.constant 0 : index
    %c0_129 = arith.constant 0 : index
    %251 = vector.load %arg6[%c0_128, %c0_129] : memref<16x128xf32, #tpu.memory_space<vmem>>, vector<16x128xf32>
    tpu.vector_store %arg6[%c0_128, %c0_129], %250 {strides = array<i32>} : memref<16x128xf32, #tpu.memory_space<vmem>>, vector<16x128xf32>,
    %252 = math.tanh %250 : vector<16x128xf32>
    %253 = arith.mulf %246, %252 : vector<16x128xf32>
    %c0_130 = arith.constant 0 : index
    %c0_131 = arith.constant 0 : index
    %254 = vector.load %arg5[%c0_130, %c0_131] : memref<16x128xf32, #tpu.memory_space<vmem>>, vector<16x128xf32>
    tpu.vector_store %arg5[%c0_130, %c0_131], %253 {strides = array<i32>} : memref<16x128xf32, #tpu.memory_space<vmem>>, vector<16x128xf32>,
    %c0_132 = arith.constant 0 : index
    %c0_133 = arith.constant 0 : index
    %255 = vector.load %arg5[%c0_132, %c0_133] : memref<16x128xf32, #tpu.memory_space<vmem>>, vector<16x128xf32>
    %256 = arith.truncf %255 : vector<16x128xf32> to vector<16x128xbf16>
    %c0_134 = arith.constant 0 : index
    %c0_135 = arith.constant 0 : index
    %257 = vector.load %arg3[%c0_134, %c0_135] : memref<128x512xbf16, #tpu.memory_space<vmem>>, vector<128x512xbf16>
    %cst_136 = arith.constant dense<0.000000e+00> : vector<16x512xf32>
    %258 = tpu.matmul %256, %257, %cst_136 {dimension_numbers = #tpu.dot_dimension_numbers<[1], [0], [0], [1], [0, 0, 1, 1], [], []>} : vector<16x128xbf16>, vector<128x512xbf16>, vector<16x512xf32> -> vector<16x512xf32>
    %c6 = arith.constant 6 : index
    %c0_137 = arith.constant 0 : index
    %c0_138 = arith.constant 0 : index
    %259 = vector.load %arg2[%c6, %c0_137, %c0_138] : memref<8x16x512xbf16, #tpu.memory_space<vmem>>, vector<1x16x512xbf16>
    %260 = vector.shape_cast %259 : vector<1x16x512xbf16> to vector<16x512xbf16>
    %261 = arith.extf %260 : vector<16x512xbf16> to vector<16x512xf32>
    %262 = arith.addf %261, %258 : vector<16x512xf32>
    %263 = vector.extract_strided_slice %262 {offsets = [0, 0], sizes = [16, 128], strides = [1, 1]} : vector<16x512xf32> to vector<16x128xf32>
    %cst_139 = arith.constant 5.000000e-01 : f32
    %264 = vector.broadcast %cst_139 : f32 to vector<16x128xf32>
    %265 = arith.mulf %264, %263 : vector<16x128xf32>
    %266 = math.tanh %265 : vector<16x128xf32>
    %cst_140 = arith.constant 5.000000e-01 : f32
    %267 = vector.broadcast %cst_140 : f32 to vector<16x128xf32>
    %268 = arith.mulf %267, %266 : vector<16x128xf32>
    %cst_141 = arith.constant 5.000000e-01 : f32
    %269 = vector.broadcast %cst_141 : f32 to vector<16x128xf32>
    %270 = arith.addf %268, %269 : vector<16x128xf32>
    %271 = vector.extract_strided_slice %262 {offsets = [0, 128], sizes = [16, 128], strides = [1, 1]} : vector<16x512xf32> to vector<16x128xf32>
    %cst_142 = arith.constant 5.000000e-01 : f32
    %272 = vector.broadcast %cst_142 : f32 to vector<16x128xf32>
    %273 = arith.mulf %272, %271 : vector<16x128xf32>
    %274 = math.tanh %273 : vector<16x128xf32>
    %cst_143 = arith.constant 5.000000e-01 : f32
    %275 = vector.broadcast %cst_143 : f32 to vector<16x128xf32>
    %276 = arith.mulf %275, %274 : vector<16x128xf32>
    %cst_144 = arith.constant 5.000000e-01 : f32
    %277 = vector.broadcast %cst_144 : f32 to vector<16x128xf32>
    %278 = arith.addf %276, %277 : vector<16x128xf32>
    %279 = vector.extract_strided_slice %262 {offsets = [0, 256], sizes = [16, 128], strides = [1, 1]} : vector<16x512xf32> to vector<16x128xf32>
    %280 = math.tanh %279 : vector<16x128xf32>
    %281 = vector.extract_strided_slice %262 {offsets = [0, 384], sizes = [16, 128], strides = [1, 1]} : vector<16x512xf32> to vector<16x128xf32>
    %cst_145 = arith.constant 5.000000e-01 : f32
    %282 = vector.broadcast %cst_145 : f32 to vector<16x128xf32>
    %283 = arith.mulf %282, %281 : vector<16x128xf32>
    %284 = math.tanh %283 : vector<16x128xf32>
    %cst_146 = arith.constant 5.000000e-01 : f32
    %285 = vector.broadcast %cst_146 : f32 to vector<16x128xf32>
    %286 = arith.mulf %285, %284 : vector<16x128xf32>
    %cst_147 = arith.constant 5.000000e-01 : f32
    %287 = vector.broadcast %cst_147 : f32 to vector<16x128xf32>
    %288 = arith.addf %286, %287 : vector<16x128xf32>
    %c0_148 = arith.constant 0 : index
    %c0_149 = arith.constant 0 : index
    %289 = vector.load %arg6[%c0_148, %c0_149] : memref<16x128xf32, #tpu.memory_space<vmem>>, vector<16x128xf32>
    %290 = arith.mulf %278, %289 : vector<16x128xf32>
    %291 = arith.mulf %270, %280 : vector<16x128xf32>
    %292 = arith.addf %290, %291 : vector<16x128xf32>
    %c0_150 = arith.constant 0 : index
    %c0_151 = arith.constant 0 : index
    %293 = vector.load %arg6[%c0_150, %c0_151] : memref<16x128xf32, #tpu.memory_space<vmem>>, vector<16x128xf32>
    tpu.vector_store %arg6[%c0_150, %c0_151], %292 {strides = array<i32>} : memref<16x128xf32, #tpu.memory_space<vmem>>, vector<16x128xf32>,
    %294 = math.tanh %292 : vector<16x128xf32>
    %295 = arith.mulf %288, %294 : vector<16x128xf32>
    %c0_152 = arith.constant 0 : index
    %c0_153 = arith.constant 0 : index
    %296 = vector.load %arg5[%c0_152, %c0_153] : memref<16x128xf32, #tpu.memory_space<vmem>>, vector<16x128xf32>
    tpu.vector_store %arg5[%c0_152, %c0_153], %295 {strides = array<i32>} : memref<16x128xf32, #tpu.memory_space<vmem>>, vector<16x128xf32>,
    %c0_154 = arith.constant 0 : index
    %c0_155 = arith.constant 0 : index
    %297 = vector.load %arg5[%c0_154, %c0_155] : memref<16x128xf32, #tpu.memory_space<vmem>>, vector<16x128xf32>
    %298 = arith.truncf %297 : vector<16x128xf32> to vector<16x128xbf16>
    %c0_156 = arith.constant 0 : index
    %c0_157 = arith.constant 0 : index
    %299 = vector.load %arg3[%c0_156, %c0_157] : memref<128x512xbf16, #tpu.memory_space<vmem>>, vector<128x512xbf16>
    %cst_158 = arith.constant dense<0.000000e+00> : vector<16x512xf32>
    %300 = tpu.matmul %298, %299, %cst_158 {dimension_numbers = #tpu.dot_dimension_numbers<[1], [0], [0], [1], [0, 0, 1, 1], [], []>} : vector<16x128xbf16>, vector<128x512xbf16>, vector<16x512xf32> -> vector<16x512xf32>
    %c7 = arith.constant 7 : index
    %c0_159 = arith.constant 0 : index
    %c0_160 = arith.constant 0 : index
    %301 = vector.load %arg2[%c7, %c0_159, %c0_160] : memref<8x16x512xbf16, #tpu.memory_space<vmem>>, vector<1x16x512xbf16>
    %302 = vector.shape_cast %301 : vector<1x16x512xbf16> to vector<16x512xbf16>
    %303 = arith.extf %302 : vector<16x512xbf16> to vector<16x512xf32>
    %304 = arith.addf %303, %300 : vector<16x512xf32>
    %305 = vector.extract_strided_slice %304 {offsets = [0, 0], sizes = [16, 128], strides = [1, 1]} : vector<16x512xf32> to vector<16x128xf32>
    %cst_161 = arith.constant 5.000000e-01 : f32
    %306 = vector.broadcast %cst_161 : f32 to vector<16x128xf32>
    %307 = arith.mulf %306, %305 : vector<16x128xf32>
    %308 = math.tanh %307 : vector<16x128xf32>
    %cst_162 = arith.constant 5.000000e-01 : f32
    %309 = vector.broadcast %cst_162 : f32 to vector<16x128xf32>
    %310 = arith.mulf %309, %308 : vector<16x128xf32>
    %cst_163 = arith.constant 5.000000e-01 : f32
    %311 = vector.broadcast %cst_163 : f32 to vector<16x128xf32>
    %312 = arith.addf %310, %311 : vector<16x128xf32>
    %313 = vector.extract_strided_slice %304 {offsets = [0, 128], sizes = [16, 128], strides = [1, 1]} : vector<16x512xf32> to vector<16x128xf32>
    %cst_164 = arith.constant 5.000000e-01 : f32
    %314 = vector.broadcast %cst_164 : f32 to vector<16x128xf32>
    %315 = arith.mulf %314, %313 : vector<16x128xf32>
    %316 = math.tanh %315 : vector<16x128xf32>
    %cst_165 = arith.constant 5.000000e-01 : f32
    %317 = vector.broadcast %cst_165 : f32 to vector<16x128xf32>
    %318 = arith.mulf %317, %316 : vector<16x128xf32>
    %cst_166 = arith.constant 5.000000e-01 : f32
    %319 = vector.broadcast %cst_166 : f32 to vector<16x128xf32>
    %320 = arith.addf %318, %319 : vector<16x128xf32>
    %321 = vector.extract_strided_slice %304 {offsets = [0, 256], sizes = [16, 128], strides = [1, 1]} : vector<16x512xf32> to vector<16x128xf32>
    %322 = math.tanh %321 : vector<16x128xf32>
    %323 = vector.extract_strided_slice %304 {offsets = [0, 384], sizes = [16, 128], strides = [1, 1]} : vector<16x512xf32> to vector<16x128xf32>
    %cst_167 = arith.constant 5.000000e-01 : f32
    %324 = vector.broadcast %cst_167 : f32 to vector<16x128xf32>
    %325 = arith.mulf %324, %323 : vector<16x128xf32>
    %326 = math.tanh %325 : vector<16x128xf32>
    %cst_168 = arith.constant 5.000000e-01 : f32
    %327 = vector.broadcast %cst_168 : f32 to vector<16x128xf32>
    %328 = arith.mulf %327, %326 : vector<16x128xf32>
    %cst_169 = arith.constant 5.000000e-01 : f32
    %329 = vector.broadcast %cst_169 : f32 to vector<16x128xf32>
    %330 = arith.addf %328, %329 : vector<16x128xf32>
    %c0_170 = arith.constant 0 : index
    %c0_171 = arith.constant 0 : index
    %331 = vector.load %arg6[%c0_170, %c0_171] : memref<16x128xf32, #tpu.memory_space<vmem>>, vector<16x128xf32>
    %332 = arith.mulf %320, %331 : vector<16x128xf32>
    %333 = arith.mulf %312, %322 : vector<16x128xf32>
    %334 = arith.addf %332, %333 : vector<16x128xf32>
    %c0_172 = arith.constant 0 : index
    %c0_173 = arith.constant 0 : index
    %335 = vector.load %arg6[%c0_172, %c0_173] : memref<16x128xf32, #tpu.memory_space<vmem>>, vector<16x128xf32>
    tpu.vector_store %arg6[%c0_172, %c0_173], %334 {strides = array<i32>} : memref<16x128xf32, #tpu.memory_space<vmem>>, vector<16x128xf32>,
    %336 = math.tanh %334 : vector<16x128xf32>
    %337 = arith.mulf %330, %336 : vector<16x128xf32>
    %c0_174 = arith.constant 0 : index
    %c0_175 = arith.constant 0 : index
    %338 = vector.load %arg5[%c0_174, %c0_175] : memref<16x128xf32, #tpu.memory_space<vmem>>, vector<16x128xf32>
    tpu.vector_store %arg5[%c0_174, %c0_175], %337 {strides = array<i32>} : memref<16x128xf32, #tpu.memory_space<vmem>>, vector<16x128xf32>,
    %c0_i32_176 = arith.constant 0 : i32
    %339 = arith.cmpi eq, %arg1, %c0_i32_176 : i32
    %340 = arith.extui %339 : i1 to i32
    %c0_i32_177 = arith.constant 0 : i32
    %341 = arith.cmpi ne, %340, %c0_i32_177 : i32
    scf.if %341 {
      %c0_178 = arith.constant 0 : index
      %c0_179 = arith.constant 0 : index
      %342 = vector.load %arg5[%c0_178, %c0_179] : memref<16x128xf32, #tpu.memory_space<vmem>>, vector<16x128xf32>
      %c0_180 = arith.constant 0 : index
      %c0_181 = arith.constant 0 : index
      %343 = vector.load %arg4[%c0_180, %c0_181] : memref<16x128xf32, #tpu.memory_space<vmem>>, vector<16x128xf32>
      tpu.vector_store %arg4[%c0_180, %c0_181], %342 {strides = array<i32>} : memref<16x128xf32, #tpu.memory_space<vmem>>, vector<16x128xf32>,
    } else {
    }
    return
  }
  func.func @transform_0(%arg0: i32, %arg1: i32) -> (i32, i32, i32) {
    %c0_i32 = arith.constant 0 : i32
    %c0_i32_0 = arith.constant 0 : i32
    return %arg1, %arg0, %c0_i32 : i32, i32, i32
  }
  func.func @transform_1(%arg0: i32, %arg1: i32) -> (i32, i32) {
    %c0_i32 = arith.constant 0 : i32
    %c0_i32_0 = arith.constant 0 : i32
    %c0_i32_1 = arith.constant 0 : i32
    return %c0_i32, %c0_i32_0 : i32, i32
  }
  func.func @transform_2(%arg0: i32, %arg1: i32) -> (i32, i32) {
    %c0_i32 = arith.constant 0 : i32
    %c0_i32_0 = arith.constant 0 : i32
    return %arg0, %c0_i32 : i32, i32
  }
}

module attributes {stable_mosaic.version = 11 : i64} {
  func.func @fc_kernel(%arg0: i32, %arg1: i32, %arg2: memref<16x128xf32, #tpu.memory_space<vmem>>, %arg3: memref<128x512xbf16, #tpu.memory_space<vmem>>, %arg4: memref<1x512xf32, #tpu.memory_space<vmem>>, %arg5: memref<16x512xf32, #tpu.memory_space<vmem>>) attributes {dimension_semantics = [#tpu.dimension_semantics<parallel>, #tpu.dimension_semantics<parallel>], iteration_bounds = array<i64: 1, 1>, scalar_prefetch = 0 : i64, scratch_operands = 0 : i64, tpu.core_type = #tpu.core_type<tc>, window_params = [{transform_indices = @transform_0, window_bounds = array<i64: 16, 128>}, {transform_indices = @transform_1, window_bounds = array<i64: 128, 512>}, {transform_indices = @transform_2, window_bounds = array<i64: 1, 512>}, {transform_indices = @transform_3, window_bounds = array<i64: 16, 512>}]} {
    %c0 = arith.constant 0 : index
    %c0_0 = arith.constant 0 : index
    %0 = vector.load %arg2[%c0, %c0_0] : memref<16x128xf32, #tpu.memory_space<vmem>>, vector<16x128xf32>
    %1 = arith.truncf %0 : vector<16x128xf32> to vector<16x128xbf16>
    %c0_1 = arith.constant 0 : index
    %c0_2 = arith.constant 0 : index
    %2 = vector.load %arg3[%c0_1, %c0_2] : memref<128x512xbf16, #tpu.memory_space<vmem>>, vector<128x512xbf16>
    %cst = arith.constant dense<0.000000e+00> : vector<16x512xf32>
    %3 = tpu.matmul %1, %2, %cst {dimension_numbers = #tpu.dot_dimension_numbers<[1], [0], [0], [1], [0, 0, 1, 1], [], []>} : vector<16x128xbf16>, vector<128x512xbf16>, vector<16x512xf32> -> vector<16x512xf32>
    %c0_3 = arith.constant 0 : index
    %c0_4 = arith.constant 0 : index
    %4 = vector.load %arg4[%c0_3, %c0_4] : memref<1x512xf32, #tpu.memory_space<vmem>>, vector<1x512xf32>
    %5 = vector.broadcast %4 : vector<1x512xf32> to vector<16x512xf32>
    %6 = arith.addf %3, %5 : vector<16x512xf32>
    %c0_5 = arith.constant 0 : index
    %c0_6 = arith.constant 0 : index
    %7 = vector.load %arg5[%c0_5, %c0_6] : memref<16x512xf32, #tpu.memory_space<vmem>>, vector<16x512xf32>
    tpu.vector_store %arg5[%c0_5, %c0_6], %6 {strides = array<i32>} : memref<16x512xf32, #tpu.memory_space<vmem>>, vector<16x512xf32>,
    return
  }
  func.func @transform_0(%arg0: i32, %arg1: i32) -> (i32, i32) {
    %c0_i32 = arith.constant 0 : i32
    %c0_i32_0 = arith.constant 0 : i32
    return %arg0, %c0_i32 : i32, i32
  }
  func.func @transform_1(%arg0: i32, %arg1: i32) -> (i32, i32) {
    %c0_i32 = arith.constant 0 : i32
    %c0_i32_0 = arith.constant 0 : i32
    return %c0_i32, %arg1 : i32, i32
  }
  func.func @transform_2(%arg0: i32, %arg1: i32) -> (i32, i32) {
    %c0_i32 = arith.constant 0 : i32
    %c0_i32_0 = arith.constant 0 : i32
    return %c0_i32, %arg1 : i32, i32
  }
  func.func @transform_3(%arg0: i32, %arg1: i32) -> (i32, i32) {
    %c0_i32 = arith.constant 0 : i32
    return %arg0, %arg1 : i32, i32
  }
}

</mosaic_0001>

<bundles_post_ra>
// kernel: text_generation_forward.5
= control target key start
LH: loop header
LB: loop body
LE: loop exit
PB: predicated region body
PF: predicated region fallthrough
CT: control target
= control target key end

     0   :  { %v411_v1 = vmov 0   ;;  %v52_v36 = vlaneseq  ;;  %s561_s1 = inlined_call_operand.vmem [shape: bf16[128,512], index: 1, kind: input, shape index: {}]   ;;  %s562_s0 = inlined_call_operand.vmem [shape: f32[16,128], index: 0, kind: input, shape index: {}]   ;;  %s563_s2 = inlined_call_operand.vmem [shape: f32[1,512], index: 2, kind: input, shape index: {}]   ;;  %s564_s3 = inlined_call_operand.vmem [shape: f32[16,512], index: 3, kind: output, shape index: {}]  }
   0x1   :  { %v363_v0 = vld [vmem:[%s561_s1 + $0x4] ss:$16 sps:$4 sm:$0xff]   ;;  %264 = vmatprep.mubr.bf16.mxu0 %v411_v1  ;;  %307 = vmatprep.mubr.bf16.mxu1 %v411_v1  ;;  %v365_v2 = vld [vmem:[%s561_s1 + $0xc] ss:$16 sps:$4 sm:$0xff]   ;;  %v367_v3 = vld [vmem:[%s561_s1] ss:$16 sps:$4 sm:$0xff]  }
   0x2   :  { %232 = vmatprep.subr.bf16.mxu0 %v363_v0  ;;  %v368_v4 = vld [vmem:[%s561_s1 + $0x8] ss:$16 sps:$4 sm:$0xff]   ;;  %275 = vmatprep.subr.bf16.mxu1 %v365_v2  ;;  %v369_v5 = vld [vmem:[%s561_s1 + $0x24] ss:$16 sps:$4 sm:$0xff]   ;;  %v371_v6 = vld [vmem:[%s561_s1 + $0x2c] ss:$16 sps:$4 sm:$0xff]  }
   0x3   :  { %233 = vmatpush1.bf16.msra.mxu0 %v367_v3  ;;  %276 = vmatpush1.bf16.msra.mxu1 %v368_v4  ;;  %v373_v7 = vld [vmem:[%s561_s1 + $0x20] ss:$16 sps:$4 sm:$0xff]   ;;  %v374_v8 = vld [vmem:[%s561_s1 + $0x28] ss:$16 sps:$4 sm:$0xff]   ;;  %v375_v9 = vld [vmem:[%s561_s1 + $0x44] ss:$16 sps:$4 sm:$0xff]  }
   0x4   :  { %234 = vmatprep.subr.bf16.mxu0 %v369_v5  ;;  %277 = vmatprep.subr.bf16.mxu1 %v371_v6  ;;  %v377_v10 = vld [vmem:[%s561_s1 + $0x4c] ss:$16 sps:$4 sm:$0xff]   ;;  %v379_v11 = vld [vmem:[%s561_s1 + $0x40] ss:$16 sps:$4 sm:$0xff]   ;;  %v380_v12 = vld [vmem:[%s561_s1 + $0x48] ss:$16 sps:$4 sm:$0xff]  }
   0x5   :  { %v381_v13 = vld [vmem:[%s561_s1 + $0x64] ss:$16 sps:$4 sm:$0xff]   ;;  %v383_v14 = vld [vmem:[%s561_s1 + $0x6c] ss:$16 sps:$4 sm:$0xff]   ;;  %v385_v15 = vld [vmem:[%s561_s1 + $0x60] ss:$16 sps:$4 sm:$0xff]  }
   0x6   :  { %v386_v16 = vld [vmem:[%s561_s1 + $0x68] ss:$16 sps:$4 sm:$0xff]   ;;  %v387_v17 = vld [vmem:[%s561_s1 + $0x84] ss:$16 sps:$4 sm:$0xff]   ;;  %v389_v18 = vld [vmem:[%s561_s1 + $0x8c] ss:$16 sps:$4 sm:$0xff]  }
   0x7   :  { %235 = vmatpush1.bf16.msra.mxu0 %v373_v7  ;;  %278 = vmatpush1.bf16.msra.mxu1 %v374_v8  ;;  %v391_v19 = vld [vmem:[%s561_s1 + $0x80] ss:$16 sps:$4 sm:$0xff]   ;;  %v392_v20 = vld [vmem:[%s561_s1 + $0x88] ss:$16 sps:$4 sm:$0xff]   ;;  %v393_v21 = vld [vmem:[%s561_s1 + $0xa4] ss:$16 sps:$4 sm:$0xff]  }
   0x8   :  { %236 = vmatprep.subr.bf16.mxu0 %v375_v9  ;;  %279 = vmatprep.subr.bf16.mxu1 %v377_v10  ;;  %v395_v22 = vld [vmem:[%s561_s1 + $0xac] ss:$16 sps:$4 sm:$0xff]   ;;  %v397_v23 = vld [vmem:[%s561_s1 + $0xa0] ss:$16 sps:$4 sm:$0xff]   ;;  %v398_v24 = vld [vmem:[%s561_s1 + $0xa8] ss:$16 sps:$4 sm:$0xff]  }
   0x9   :  { %v399_v25 = vld [vmem:[%s561_s1 + $0xc4] ss:$16 sps:$4 sm:$0xff]   ;;  %v401_v26 = vld [vmem:[%s561_s1 + $0xcc] ss:$16 sps:$4 sm:$0xff]   ;;  %v403_v27 = vld [vmem:[%s561_s1 + $0xc0] ss:$16 sps:$4 sm:$0xff]  }
   0xa   :  { %v404_v28 = vld [vmem:[%s561_s1 + $0xc8] ss:$16 sps:$4 sm:$0xff]   ;;  %v405_v29 = vld [vmem:[%s561_s1 + $0xe4] ss:$16 sps:$4 sm:$0xff]   ;;  %v407_v30 = vld [vmem:[%s561_s1 + $0xec] ss:$16 sps:$4 sm:$0xff]  }
   0xb   :  { %237 = vmatpush1.bf16.msra.mxu0 %v379_v11  ;;  %280 = vmatpush1.bf16.msra.mxu1 %v380_v12  ;;  %v409_v31 = vld [vmem:[%s561_s1 + $0xe0] ss:$16 sps:$4 sm:$0xff]   ;;  %v410_v32 = vld [vmem:[%s561_s1 + $0xe8] ss:$16 sps:$4 sm:$0xff]   ;;  %v53_v37 = vshrl.u32 %v52_v36, 7 }
   0xc   :  { %238 = vmatprep.subr.bf16.mxu0 %v381_v13  ;;  %281 = vmatprep.subr.bf16.mxu1 %v383_v14  ;;  %v15_v33 = vld [vmem:[%s562_s0] sm:$0xff]  ;;  %v16_v34 = vld [vmem:[%s562_s0 + $0x8] sm:$0xff] }
   0xd   :  { %v17_v35 = vpack.c.bf16 %v16_v34, %v15_v33  ;;  %v54_v38 = vsub.s32 0, %v53_v37  ;;  %v62_v39 = vsub.s32 2, %v53_v37  ;;  %v50_v40 = vld [vmem:[%s563_s2] sm:$0xf]  ;;  %v58_v41 = vsub.s32 1, %v53_v37 }
   0xe   :  { %v66_v42 = vsub.s32 3, %v53_v37 }
   0xf   :  { %239 = vmatpush1.bf16.msra.mxu0 %v385_v15  ;;  %282 = vmatpush1.bf16.msra.mxu1 %v386_v16  ;;  %v55_v43 = vrot.slane %v50_v40, %v54_v38  ;;  %v63_v44 = vrot.slane %v50_v40, %v62_v39  ;;  %v59_v45 = vrot.slane %v50_v40, %v58_v41 }
  0x10   :  { %240 = vmatprep.subr.bf16.mxu0 %v387_v17  ;;  %283 = vmatprep.subr.bf16.mxu1 %v389_v18  ;;  %v67_v46 = vrot.slane %v50_v40, %v66_v42 }
  0x13   :  { %241 = vmatpush1.bf16.msra.mxu0 %v391_v19  ;;  %284 = vmatpush1.bf16.msra.mxu1 %v392_v20 }
  0x14   :  { %242 = vmatprep.subr.bf16.mxu0 %v393_v21  ;;  %285 = vmatprep.subr.bf16.mxu1 %v395_v22 }
  0x17   :  { %243 = vmatpush1.bf16.msra.mxu0 %v397_v23  ;;  %286 = vmatpush1.bf16.msra.mxu1 %v398_v24 }
  0x18   :  { %244 = vmatprep.subr.bf16.mxu0 %v399_v25  ;;  %287 = vmatprep.subr.bf16.mxu1 %v401_v26 }
  0x1b   :  { %245 = vmatpush1.bf16.msra.mxu0 %v403_v27  ;;  %288 = vmatpush1.bf16.msra.mxu1 %v404_v28 }
  0x1c   :  { %246 = vmatprep.subr.bf16.mxu0 %v405_v29  ;;  %289 = vmatprep.subr.bf16.mxu1 %v407_v30 }
  0x1f   :  { %247 = vmatpush1.bf16.msra.mxu0 %v409_v31  ;;  %290 = vmatpush1.bf16.msra.mxu1 %v410_v32 }
  0x22   :  { %265 = vmatmul.mubr.bf16.vlgmr.msra.gmra.mrb[0].mxu0 %v17_v35  ;;  %308 = vmatmul.mubr.bf16.vlgmr.msra.gmra.mrb[0].mxu1 %v17_v35 }
  0xf5   :  { %v266_v47 = vpop.f32.mrb[0].mxu0  ;;  %v309_v48 = vpop.f32.mrb[0].mxu1 }
  0xf6   :  { %v267_v49 = vadd.f32 %v266_v47, %v55_v43  ;;  %v310_v50 = vadd.f32 %v309_v48, %v63_v44  ;;  %v268_v51 = vpop.f32.mrb[1].mxu0  ;;  %v311_v52 = vpop.f32.mrb[1].mxu1 }
  0xf7   :  { %v269_v53 = vadd.f32 %v268_v51, %v59_v45  ;;  %v312_v54 = vadd.f32 %v311_v52, %v67_v46  ;;  %v270_v55 = vpop.f32.mrb[2].mxu0  ;;  %v313_v56 = vpop.f32.mrb[2].mxu1 }
  0xf8   :  { %318 = vst [vmem:[%s564_s3] sm:$0xff] %v267_v49  ;;  %320 = vst [vmem:[%s564_s3 + $0x10] sm:$0xff] %v310_v50  ;;  %v271_v57 = vadd.f32 %v270_v55, %v55_v43  ;;  %v314_v58 = vadd.f32 %v313_v56, %v63_v44  ;;  %v272_v59 = vpop.f32.mrb[3].mxu0  ;;  %v315_v60 = vpop.f32.mrb[3].mxu1 }
  0xf9   :  { %319 = vst [vmem:[%s564_s3 + $0x8] sm:$0xff] %v269_v53  ;;  %321 = vst [vmem:[%s564_s3 + $0x18] sm:$0xff] %v312_v54  ;;  %v273_v61 = vadd.f32 %v272_v59, %v59_v45  ;;  %v316_v62 = vadd.f32 %v315_v60, %v67_v46 }
  0xfa   :  { %322 = vst [vmem:[%s564_s3 + $0x20] sm:$0xff] %v271_v57  ;;  %324 = vst [vmem:[%s564_s3 + $0x30] sm:$0xff] %v314_v58 }
  0xfb   :  { %323 = vst [vmem:[%s564_s3 + $0x28] sm:$0xff] %v273_v61  ;;  %325 = vst [vmem:[%s564_s3 + $0x38] sm:$0xff] %v316_v62 }

// kernel: text_generation_forward.3
= control target key start
LH: loop header
LB: loop body
LE: loop exit
PB: predicated region body
PF: predicated region fallthrough
CT: control target
= control target key end

     0   :  { %v908_v1 = vmov 0   ;;  %v65_v41 = vlaneseq  ;;  %s1236_s1 = inlined_call_operand.vmem [shape: bf16[128,512], index: 1, kind: input, shape index: {}]   ;;  %s1237_s0 = inlined_call_operand.vmem [shape: bf16[8,16,128], index: 0, kind: input, shape index: {}]   ;;  %s1238_s2 = inlined_call_operand.vmem [shape: f32[1,512], index: 2, kind: input, shape index: {}]   ;;  %s1239_s3 = inlined_call_operand.vmem [shape: bf16[8,16,512], index: 3, kind: output, shape index: {}]  }
   0x1   :  { %v852_v0 = vld [vmem:[%s1236_s1 + $0x4] ss:$16 sps:$4 sm:$0xff]   ;;  %325 = vmatprep.mubr.bf16.mxu0 %v908_v1  ;;  %438 = vmatprep.mubr.bf16.mxu1 %v908_v1  ;;  %v854_v2 = vld [vmem:[%s1236_s1 + $0xc] ss:$16 sps:$4 sm:$0xff]   ;;  %v856_v3 = vld [vmem:[%s1236_s1] ss:$16 sps:$4 sm:$0xff]  }
   0x2   :  { %293 = vmatprep.subr.bf16.mxu0 %v852_v0  ;;  %v857_v4 = vld [vmem:[%s1236_s1 + $0x8] ss:$16 sps:$4 sm:$0xff]   ;;  %406 = vmatprep.subr.bf16.mxu1 %v854_v2  ;;  %v858_v5 = vld [vmem:[%s1236_s1 + $0x24] ss:$16 sps:$4 sm:$0xff]   ;;  %v860_v6 = vld [vmem:[%s1236_s1 + $0x2c] ss:$16 sps:$4 sm:$0xff]  }
   0x3   :  { %294 = vmatpush1.bf16.msra.mxu0 %v856_v3  ;;  %407 = vmatpush1.bf16.msra.mxu1 %v857_v4  ;;  %v862_v7 = vld [vmem:[%s1236_s1 + $0x20] ss:$16 sps:$4 sm:$0xff]   ;;  %v863_v8 = vld [vmem:[%s1236_s1 + $0x28] ss:$16 sps:$4 sm:$0xff]   ;;  %v864_v9 = vld [vmem:[%s1236_s1 + $0x44] ss:$16 sps:$4 sm:$0xff]  }
   0x4   :  { %295 = vmatprep.subr.bf16.mxu0 %v858_v5  ;;  %408 = vmatprep.subr.bf16.mxu1 %v860_v6  ;;  %v866_v10 = vld [vmem:[%s1236_s1 + $0x4c] ss:$16 sps:$4 sm:$0xff]   ;;  %v868_v11 = vld [vmem:[%s1236_s1 + $0x40] ss:$16 sps:$4 sm:$0xff]   ;;  %v869_v12 = vld [vmem:[%s1236_s1 + $0x48] ss:$16 sps:$4 sm:$0xff]  }
   0x5   :  { %v870_v13 = vld [vmem:[%s1236_s1 + $0x64] ss:$16 sps:$4 sm:$0xff]   ;;  %v872_v14 = vld [vmem:[%s1236_s1 + $0x6c] ss:$16 sps:$4 sm:$0xff]   ;;  %v874_v15 = vld [vmem:[%s1236_s1 + $0x60] ss:$16 sps:$4 sm:$0xff]  }
   0x6   :  { %v875_v16 = vld [vmem:[%s1236_s1 + $0x68] ss:$16 sps:$4 sm:$0xff]   ;;  %v876_v17 = vld [vmem:[%s1236_s1 + $0x84] ss:$16 sps:$4 sm:$0xff]   ;;  %v878_v18 = vld [vmem:[%s1236_s1 + $0x8c] ss:$16 sps:$4 sm:$0xff]  }
   0x7   :  { %296 = vmatpush1.bf16.msra.mxu0 %v862_v7  ;;  %409 = vmatpush1.bf16.msra.mxu1 %v863_v8  ;;  %v880_v19 = vld [vmem:[%s1236_s1 + $0x80] ss:$16 sps:$4 sm:$0xff]   ;;  %v881_v20 = vld [vmem:[%s1236_s1 + $0x88] ss:$16 sps:$4 sm:$0xff]   ;;  %v882_v21 = vld [vmem:[%s1236_s1 + $0xa4] ss:$16 sps:$4 sm:$0xff]  }
   0x8   :  { %297 = vmatprep.subr.bf16.mxu0 %v864_v9  ;;  %410 = vmatprep.subr.bf16.mxu1 %v866_v10  ;;  %v884_v22 = vld [vmem:[%s1236_s1 + $0xac] ss:$16 sps:$4 sm:$0xff]   ;;  %v886_v23 = vld [vmem:[%s1236_s1 + $0xa0] ss:$16 sps:$4 sm:$0xff]   ;;  %v887_v24 = vld [vmem:[%s1236_s1 + $0xa8] ss:$16 sps:$4 sm:$0xff]  }
   0x9   :  { %v888_v25 = vld [vmem:[%s1236_s1 + $0xc4] ss:$16 sps:$4 sm:$0xff]   ;;  %v890_v26 = vld [vmem:[%s1236_s1 + $0xcc] ss:$16 sps:$4 sm:$0xff]   ;;  %v892_v27 = vld [vmem:[%s1236_s1 + $0xc0] ss:$16 sps:$4 sm:$0xff]  }
   0xa   :  { %v893_v28 = vld [vmem:[%s1236_s1 + $0xc8] ss:$16 sps:$4 sm:$0xff]   ;;  %v894_v29 = vld [vmem:[%s1236_s1 + $0xe4] ss:$16 sps:$4 sm:$0xff]   ;;  %v896_v30 = vld [vmem:[%s1236_s1 + $0xec] ss:$16 sps:$4 sm:$0xff]  }
   0xb   :  { %298 = vmatpush1.bf16.msra.mxu0 %v868_v11  ;;  %411 = vmatpush1.bf16.msra.mxu1 %v869_v12  ;;  %v898_v31 = vld [vmem:[%s1236_s1 + $0xe0] ss:$16 sps:$4 sm:$0xff]   ;;  %v899_v32 = vld [vmem:[%s1236_s1 + $0xe8] ss:$16 sps:$4 sm:$0xff]   ;;  %v66_v42 = vshrl.u32 %v65_v41, 7 }
   0xc   :  { %299 = vmatprep.subr.bf16.mxu0 %v870_v13  ;;  %412 = vmatprep.subr.bf16.mxu1 %v872_v14  ;;  %v900_v33 = vld [vmem:[%s1237_s0] sm:$0xff]   ;;  %v901_v34 = vld [vmem:[%s1237_s0 + $0x8] sm:$0xff]   ;;  %v902_v35 = vld [vmem:[%s1237_s0 + $0x10] sm:$0xff]  }
   0xd   :  { %v903_v36 = vld [vmem:[%s1237_s0 + $0x18] sm:$0xff]   ;;  %v904_v37 = vld [vmem:[%s1237_s0 + $0x20] sm:$0xff]   ;;  %v905_v38 = vld [vmem:[%s1237_s0 + $0x28] sm:$0xff]   ;;  %v67_v43 = vsub.s32 0, %v66_v42  ;;  %v75_v44 = vsub.s32 2, %v66_v42  ;;  %v71_v46 = vsub.s32 1, %v66_v42 }
   0xe   :  { %v906_v39 = vld [vmem:[%s1237_s0 + $0x30] sm:$0xff]   ;;  %v907_v40 = vld [vmem:[%s1237_s0 + $0x38] sm:$0xff]   ;;  %v63_v45 = vld [vmem:[%s1238_s2] sm:$0xf]  ;;  %v79_v47 = vsub.s32 3, %v66_v42 }
   0xf   :  { %300 = vmatpush1.bf16.msra.mxu0 %v874_v15  ;;  %413 = vmatpush1.bf16.msra.mxu1 %v875_v16  ;;  %v1068_v48 = vrot.slane %v63_v45, %v67_v43  ;;  %v1070_v49 = vrot.slane %v63_v45, %v75_v44  ;;  %v1072_v50 = vrot.slane %v63_v45, %v71_v46 }
  0x10   :  { %301 = vmatprep.subr.bf16.mxu0 %v876_v17  ;;  %414 = vmatprep.subr.bf16.mxu1 %v878_v18  ;;  %v1074_v51 = vrot.slane %v63_v45, %v79_v47 }
  0x13   :  { %302 = vmatpush1.bf16.msra.mxu0 %v880_v19  ;;  %415 = vmatpush1.bf16.msra.mxu1 %v881_v20 }
  0x14   :  { %303 = vmatprep.subr.bf16.mxu0 %v882_v21  ;;  %416 = vmatprep.subr.bf16.mxu1 %v884_v22 }
  0x17   :  { %304 = vmatpush1.bf16.msra.mxu0 %v886_v23  ;;  %417 = vmatpush1.bf16.msra.mxu1 %v887_v24 }
  0x18   :  { %305 = vmatprep.subr.bf16.mxu0 %v888_v25  ;;  %418 = vmatprep.subr.bf16.mxu1 %v890_v26 }
  0x1b   :  { %306 = vmatpush1.bf16.msra.mxu0 %v892_v27  ;;  %419 = vmatpush1.bf16.msra.mxu1 %v893_v28 }
  0x1c   :  { %307 = vmatprep.subr.bf16.mxu0 %v894_v29  ;;  %420 = vmatprep.subr.bf16.mxu1 %v896_v30 }
  0x1f   :  { %308 = vmatpush1.bf16.msra.mxu0 %v898_v31  ;;  %421 = vmatpush1.bf16.msra.mxu1 %v899_v32 }
  0x22   :  { %326 = vmatmul.mubr.bf16.vlgmr.msra.gmra.mrb[0].mxu0 %v900_v33  ;;  %439 = vmatmul.mubr.bf16.vlgmr.msra.gmra.mrb[0].mxu1 %v900_v33 }
  0x23   :  { %335 = vmatprep.mubr.bf16.mxu0 %v908_v1  ;;  %448 = vmatprep.mubr.bf16.mxu1 %v908_v1 }
  0x2a   :  { %336 = vmatmul.mubr.bf16.gmra.mrb[4].mxu0 %v901_v34  ;;  %449 = vmatmul.mubr.bf16.gmra.mrb[4].mxu1 %v901_v34 }
  0x2b   :  { %345 = vmatprep.mubr.bf16.mxu0 %v908_v1  ;;  %458 = vmatprep.mubr.bf16.mxu1 %v908_v1 }
  0x32   :  { %346 = vmatmul.mubr.bf16.gmra.mrb[8].mxu0 %v902_v35  ;;  %459 = vmatmul.mubr.bf16.gmra.mrb[8].mxu1 %v902_v35 }
  0x33   :  { %355 = vmatprep.mubr.bf16.mxu0 %v908_v1  ;;  %468 = vmatprep.mubr.bf16.mxu1 %v908_v1 }
  0x3a   :  { %356 = vmatmul.mubr.bf16.gmra.mrb[12].mxu0 %v903_v36  ;;  %469 = vmatmul.mubr.bf16.gmra.mrb[12].mxu1 %v903_v36 }
  0x3b   :  { %365 = vmatprep.mubr.bf16.mxu0 %v908_v1  ;;  %478 = vmatprep.mubr.bf16.mxu1 %v908_v1 }
  0x42   :  { %366 = vmatmul.mubr.bf16.gmra.mrb[16].mxu0 %v904_v37  ;;  %479 = vmatmul.mubr.bf16.gmra.mrb[16].mxu1 %v904_v37 }
  0x43   :  { %375 = vmatprep.mubr.bf16.mxu0 %v908_v1  ;;  %488 = vmatprep.mubr.bf16.mxu1 %v908_v1 }
  0x4a   :  { %376 = vmatmul.mubr.bf16.gmra.mrb[20].mxu0 %v905_v38  ;;  %489 = vmatmul.mubr.bf16.gmra.mrb[20].mxu1 %v905_v38 }
  0x4b   :  { %385 = vmatprep.mubr.bf16.mxu0 %v908_v1  ;;  %498 = vmatprep.mubr.bf16.mxu1 %v908_v1 }
  0x52   :  { %386 = vmatmul.mubr.bf16.gmra.mrb[24].mxu0 %v906_v39  ;;  %499 = vmatmul.mubr.bf16.gmra.mrb[24].mxu1 %v906_v39 }
  0x53   :  { %395 = vmatprep.mubr.bf16.mxu0 %v908_v1  ;;  %508 = vmatprep.mubr.bf16.mxu1 %v908_v1 }
  0x5a   :  { %396 = vmatmul.mubr.bf16.gmra.mrb[28].mxu0 %v907_v40  ;;  %509 = vmatmul.mubr.bf16.gmra.mrb[28].mxu1 %v907_v40 }
  0xf5   :  { %v327_v52 = vpop.f32.mrb[0].mxu0  ;;  %v440_v53 = vpop.f32.mrb[0].mxu1 }
  0xf6   :  { %v328_v54 = vadd.f32 %v327_v52, %v1068_v48  ;;  %v441_v55 = vadd.f32 %v440_v53, %v1070_v49  ;;  %v329_v56 = vpop.f32.mrb[1].mxu0  ;;  %v442_v57 = vpop.f32.mrb[1].mxu1 }
  0xf7   :  { %v330_v58 = vadd.f32 %v329_v56, %v1072_v50  ;;  %v443_v59 = vadd.f32 %v442_v57, %v1074_v51  ;;  %v331_v60 = vpop.f32.mrb[2].mxu0  ;;  %v444_v61 = vpop.f32.mrb[2].mxu1 }
  0xf8   :  { %v332_v62 = vadd.f32 %v331_v60, %v1068_v48  ;;  %v445_v63 = vadd.f32 %v444_v61, %v1070_v49  ;;  %v333_v0 = vpop.f32.mrb[3].mxu0  ;;  %v446_v1 = vpop.f32.mrb[3].mxu1 }
  0xf9   :  { %v819_v2 = vpack.c.bf16 %v330_v58, %v328_v54  ;;  %v820_v3 = vpack.c.bf16 %v443_v59, %v441_v55  ;;  %v334_v4 = vadd.f32 %v333_v0, %v1072_v50  ;;  %v447_v5 = vadd.f32 %v446_v1, %v1074_v51 }
  0xfb   :  { %711 = vst [vmem:[%s1239_s3] sm:$0xff] %v819_v2  ;;  %712 = vst [vmem:[%s1239_s3 + $0x8] sm:$0xff] %v820_v3  ;;  %v821_v6 = vpack.c.bf16 %v334_v4, %v332_v62  ;;  %v822_v7 = vpack.c.bf16 %v447_v5, %v445_v63 }
  0xfd   :  { %713 = vst [vmem:[%s1239_s3 + $0x10] sm:$0xff] %v821_v6  ;;  %714 = vst [vmem:[%s1239_s3 + $0x18] sm:$0xff] %v822_v7  ;;  %v337_v8 = vpop.f32.mrb[4].mxu0  ;;  %v450_v9 = vpop.f32.mrb[4].mxu1 }
  0xfe   :  { %v338_v10 = vadd.f32 %v337_v8, %v1068_v48  ;;  %v451_v11 = vadd.f32 %v450_v9, %v1070_v49  ;;  %v339_v12 = vpop.f32.mrb[5].mxu0  ;;  %v452_v13 = vpop.f32.mrb[5].mxu1 }
  0xff   :  { %v340_v14 = vadd.f32 %v339_v12, %v1072_v50  ;;  %v453_v15 = vadd.f32 %v452_v13, %v1074_v51  ;;  %v341_v16 = vpop.f32.mrb[6].mxu0  ;;  %v454_v17 = vpop.f32.mrb[6].mxu1 }
 0x100   :  { %v342_v18 = vadd.f32 %v341_v16, %v1068_v48  ;;  %v455_v19 = vadd.f32 %v454_v17, %v1070_v49  ;;  %v343_v20 = vpop.f32.mrb[7].mxu0  ;;  %v456_v21 = vpop.f32.mrb[7].mxu1 }
 0x101   :  { %v823_v22 = vpack.c.bf16 %v340_v14, %v338_v10  ;;  %v824_v23 = vpack.c.bf16 %v453_v15, %v451_v11  ;;  %v344_v24 = vadd.f32 %v343_v20, %v1072_v50  ;;  %v457_v25 = vadd.f32 %v456_v21, %v1074_v51 }
 0x103   :  { %715 = vst [vmem:[%s1239_s3 + $0x20] sm:$0xff] %v823_v22  ;;  %716 = vst [vmem:[%s1239_s3 + $0x28] sm:$0xff] %v824_v23  ;;  %v825_v26 = vpack.c.bf16 %v344_v24, %v342_v18  ;;  %v826_v27 = vpack.c.bf16 %v457_v25, %v455_v19 }
 0x105   :  { %717 = vst [vmem:[%s1239_s3 + $0x30] sm:$0xff] %v825_v26  ;;  %718 = vst [vmem:[%s1239_s3 + $0x38] sm:$0xff] %v826_v27  ;;  %v347_v28 = vpop.f32.mrb[8].mxu0  ;;  %v460_v29 = vpop.f32.mrb[8].mxu1 }
 0x106   :  { %v348_v30 = vadd.f32 %v347_v28, %v1068_v48  ;;  %v461_v31 = vadd.f32 %v460_v29, %v1070_v49  ;;  %v349_v32 = vpop.f32.mrb[9].mxu0  ;;  %v462_v33 = vpop.f32.mrb[9].mxu1 }
 0x107   :  { %v350_v34 = vadd.f32 %v349_v32, %v1072_v50  ;;  %v463_v35 = vadd.f32 %v462_v33, %v1074_v51  ;;  %v351_v36 = vpop.f32.mrb[10].mxu0  ;;  %v464_v37 = vpop.f32.mrb[10].mxu1 }
 0x108   :  { %v352_v38 = vadd.f32 %v351_v36, %v1068_v48  ;;  %v465_v39 = vadd.f32 %v464_v37, %v1070_v49  ;;  %v353_v40 = vpop.f32.mrb[11].mxu0  ;;  %v466_v41 = vpop.f32.mrb[11].mxu1 }
 0x109   :  { %v827_v42 = vpack.c.bf16 %v350_v34, %v348_v30  ;;  %v828_v43 = vpack.c.bf16 %v463_v35, %v461_v31  ;;  %v354_v44 = vadd.f32 %v353_v40, %v1072_v50  ;;  %v467_v45 = vadd.f32 %v466_v41, %v1074_v51 }
 0x10b   :  { %719 = vst [vmem:[%s1239_s3 + $0x40] sm:$0xff] %v827_v42  ;;  %720 = vst [vmem:[%s1239_s3 + $0x48] sm:$0xff] %v828_v43  ;;  %v829_v46 = vpack.c.bf16 %v354_v44, %v352_v38  ;;  %v830_v47 = vpack.c.bf16 %v467_v45, %v465_v39 }
 0x10d   :  { %721 = vst [vmem:[%s1239_s3 + $0x50] sm:$0xff] %v829_v46  ;;  %722 = vst [vmem:[%s1239_s3 + $0x58] sm:$0xff] %v830_v47  ;;  %v357_v52 = vpop.f32.mrb[12].mxu0  ;;  %v470_v53 = vpop.f32.mrb[12].mxu1 }
 0x10e   :  { %v358_v54 = vadd.f32 %v357_v52, %v1068_v48  ;;  %v471_v55 = vadd.f32 %v470_v53, %v1070_v49  ;;  %v359_v56 = vpop.f32.mrb[13].mxu0  ;;  %v472_v57 = vpop.f32.mrb[13].mxu1 }
 0x10f   :  { %v360_v58 = vadd.f32 %v359_v56, %v1072_v50  ;;  %v473_v59 = vadd.f32 %v472_v57, %v1074_v51  ;;  %v361_v60 = vpop.f32.mrb[14].mxu0  ;;  %v474_v61 = vpop.f32.mrb[14].mxu1 }
 0x110   :  { %v362_v62 = vadd.f32 %v361_v60, %v1068_v48  ;;  %v475_v63 = vadd.f32 %v474_v61, %v1070_v49  ;;  %v363_v0 = vpop.f32.mrb[15].mxu0  ;;  %v476_v1 = vpop.f32.mrb[15].mxu1 }
 0x111   :  { %v831_v2 = vpack.c.bf16 %v360_v58, %v358_v54  ;;  %v832_v3 = vpack.c.bf16 %v473_v59, %v471_v55  ;;  %v364_v4 = vadd.f32 %v363_v0, %v1072_v50  ;;  %v477_v5 = vadd.f32 %v476_v1, %v1074_v51 }
 0x113   :  { %723 = vst [vmem:[%s1239_s3 + $0x60] sm:$0xff] %v831_v2  ;;  %724 = vst [vmem:[%s1239_s3 + $0x68] sm:$0xff] %v832_v3  ;;  %v833_v6 = vpack.c.bf16 %v364_v4, %v362_v62  ;;  %v834_v7 = vpack.c.bf16 %v477_v5, %v475_v63 }
 0x115   :  { %725 = vst [vmem:[%s1239_s3 + $0x70] sm:$0xff] %v833_v6  ;;  %726 = vst [vmem:[%s1239_s3 + $0x78] sm:$0xff] %v834_v7  ;;  %v367_v8 = vpop.f32.mrb[16].mxu0  ;;  %v480_v9 = vpop.f32.mrb[16].mxu1 }
 0x116   :  { %v368_v10 = vadd.f32 %v367_v8, %v1068_v48  ;;  %v481_v11 = vadd.f32 %v480_v9, %v1070_v49  ;;  %v369_v12 = vpop.f32.mrb[17].mxu0  ;;  %v482_v13 = vpop.f32.mrb[17].mxu1 }
 0x117   :  { %v370_v14 = vadd.f32 %v369_v12, %v1072_v50  ;;  %v483_v15 = vadd.f32 %v482_v13, %v1074_v51  ;;  %v371_v16 = vpop.f32.mrb[18].mxu0  ;;  %v484_v17 = vpop.f32.mrb[18].mxu1 }
 0x118   :  { %v372_v18 = vadd.f32 %v371_v16, %v1068_v48  ;;  %v485_v19 = vadd.f32 %v484_v17, %v1070_v49  ;;  %v373_v20 = vpop.f32.mrb[19].mxu0  ;;  %v486_v21 = vpop.f32.mrb[19].mxu1 }
 0x119   :  { %v835_v22 = vpack.c.bf16 %v370_v14, %v368_v10  ;;  %v836_v23 = vpack.c.bf16 %v483_v15, %v481_v11  ;;  %v374_v24 = vadd.f32 %v373_v20, %v1072_v50  ;;  %v487_v25 = vadd.f32 %v486_v21, %v1074_v51 }
 0x11b   :  { %727 = vst [vmem:[%s1239_s3 + $0x80] sm:$0xff] %v835_v22  ;;  %728 = vst [vmem:[%s1239_s3 + $0x88] sm:$0xff] %v836_v23  ;;  %v837_v26 = vpack.c.bf16 %v374_v24, %v372_v18  ;;  %v838_v27 = vpack.c.bf16 %v487_v25, %v485_v19 }
 0x11d   :  { %729 = vst [vmem:[%s1239_s3 + $0x90] sm:$0xff] %v837_v26  ;;  %730 = vst [vmem:[%s1239_s3 + $0x98] sm:$0xff] %v838_v27  ;;  %v377_v28 = vpop.f32.mrb[20].mxu0  ;;  %v490_v29 = vpop.f32.mrb[20].mxu1 }
 0x11e   :  { %v378_v30 = vadd.f32 %v377_v28, %v1068_v48  ;;  %v491_v31 = vadd.f32 %v490_v29, %v1070_v49  ;;  %v379_v32 = vpop.f32.mrb[21].mxu0  ;;  %v492_v33 = vpop.f32.mrb[21].mxu1 }
 0x11f   :  { %v380_v34 = vadd.f32 %v379_v32, %v1072_v50  ;;  %v493_v35 = vadd.f32 %v492_v33, %v1074_v51  ;;  %v381_v36 = vpop.f32.mrb[22].mxu0  ;;  %v494_v37 = vpop.f32.mrb[22].mxu1 }
 0x120   :  { %v382_v38 = vadd.f32 %v381_v36, %v1068_v48  ;;  %v495_v39 = vadd.f32 %v494_v37, %v1070_v49  ;;  %v383_v40 = vpop.f32.mrb[23].mxu0  ;;  %v496_v41 = vpop.f32.mrb[23].mxu1 }
 0x121   :  { %v839_v42 = vpack.c.bf16 %v380_v34, %v378_v30  ;;  %v840_v43 = vpack.c.bf16 %v493_v35, %v491_v31  ;;  %v384_v44 = vadd.f32 %v383_v40, %v1072_v50  ;;  %v497_v45 = vadd.f32 %v496_v41, %v1074_v51 }
 0x123   :  { %731 = vst [vmem:[%s1239_s3 + $0xa0] sm:$0xff] %v839_v42  ;;  %732 = vst [vmem:[%s1239_s3 + $0xa8] sm:$0xff] %v840_v43  ;;  %v841_v46 = vpack.c.bf16 %v384_v44, %v382_v38  ;;  %v842_v47 = vpack.c.bf16 %v497_v45, %v495_v39 }
 0x125   :  { %733 = vst [vmem:[%s1239_s3 + $0xb0] sm:$0xff] %v841_v46  ;;  %734 = vst [vmem:[%s1239_s3 + $0xb8] sm:$0xff] %v842_v47  ;;  %v387_v52 = vpop.f32.mrb[24].mxu0  ;;  %v500_v53 = vpop.f32.mrb[24].mxu1 }
 0x126   :  { %v388_v54 = vadd.f32 %v387_v52, %v1068_v48  ;;  %v501_v55 = vadd.f32 %v500_v53, %v1070_v49  ;;  %v389_v56 = vpop.f32.mrb[25].mxu0  ;;  %v502_v57 = vpop.f32.mrb[25].mxu1 }
 0x127   :  { %v390_v58 = vadd.f32 %v389_v56, %v1072_v50  ;;  %v503_v59 = vadd.f32 %v502_v57, %v1074_v51  ;;  %v391_v60 = vpop.f32.mrb[26].mxu0  ;;  %v504_v61 = vpop.f32.mrb[26].mxu1 }
 0x128   :  { %v392_v62 = vadd.f32 %v391_v60, %v1068_v48  ;;  %v505_v63 = vadd.f32 %v504_v61, %v1070_v49  ;;  %v393_v0 = vpop.f32.mrb[27].mxu0  ;;  %v506_v1 = vpop.f32.mrb[27].mxu1 }
 0x129   :  { %v843_v2 = vpack.c.bf16 %v390_v58, %v388_v54  ;;  %v844_v3 = vpack.c.bf16 %v503_v59, %v501_v55  ;;  %v394_v4 = vadd.f32 %v393_v0, %v1072_v50  ;;  %v507_v5 = vadd.f32 %v506_v1, %v1074_v51 }
 0x12b   :  { %735 = vst [vmem:[%s1239_s3 + $0xc0] sm:$0xff] %v843_v2  ;;  %736 = vst [vmem:[%s1239_s3 + $0xc8] sm:$0xff] %v844_v3  ;;  %v845_v6 = vpack.c.bf16 %v394_v4, %v392_v62  ;;  %v846_v7 = vpack.c.bf16 %v507_v5, %v505_v63 }
 0x12d   :  { %737 = vst [vmem:[%s1239_s3 + $0xd0] sm:$0xff] %v845_v6  ;;  %738 = vst [vmem:[%s1239_s3 + $0xd8] sm:$0xff] %v846_v7  ;;  %v397_v8 = vpop.f32.mrb[28].mxu0  ;;  %v510_v9 = vpop.f32.mrb[28].mxu1 }
 0x12e   :  { %v398_v10 = vadd.f32 %v397_v8, %v1068_v48  ;;  %v511_v11 = vadd.f32 %v510_v9, %v1070_v49  ;;  %v399_v12 = vpop.f32.mrb[29].mxu0  ;;  %v512_v13 = vpop.f32.mrb[29].mxu1 }
 0x12f   :  { %v400_v14 = vadd.f32 %v399_v12, %v1072_v50  ;;  %v513_v15 = vadd.f32 %v512_v13, %v1074_v51  ;;  %v401_v16 = vpop.f32.mrb[30].mxu0  ;;  %v514_v17 = vpop.f32.mrb[30].mxu1 }
 0x130   :  { %v402_v18 = vadd.f32 %v401_v16, %v1068_v48  ;;  %v515_v19 = vadd.f32 %v514_v17, %v1070_v49  ;;  %v403_v20 = vpop.f32.mrb[31].mxu0  ;;  %v516_v21 = vpop.f32.mrb[31].mxu1 }
 0x131   :  { %v847_v22 = vpack.c.bf16 %v400_v14, %v398_v10  ;;  %v848_v23 = vpack.c.bf16 %v513_v15, %v511_v11  ;;  %v404_v24 = vadd.f32 %v403_v20, %v1072_v50  ;;  %v517_v25 = vadd.f32 %v516_v21, %v1074_v51 }
 0x133   :  { %739 = vst [vmem:[%s1239_s3 + $0xe0] sm:$0xff] %v847_v22  ;;  %740 = vst [vmem:[%s1239_s3 + $0xe8] sm:$0xff] %v848_v23  ;;  %v849_v26 = vpack.c.bf16 %v404_v24, %v402_v18  ;;  %v850_v48 = vpack.c.bf16 %v517_v25, %v515_v19 }
 0x135   :  { %741 = vst [vmem:[%s1239_s3 + $0xf0] sm:$0xff] %v849_v26  ;;  %742 = vst [vmem:[%s1239_s3 + $0xf8] sm:$0xff] %v850_v48 }

// kernel: text_generation_forward.4
= control target key start
LH: loop header
LB: loop body
LE: loop exit
PB: predicated region body
PF: predicated region fallthrough
CT: control target
= control target key end

     0   :  { %v3324_v1 = vmov 0   ;;  %v3325_v33 = vmov 0.0|0.0   ;;  %s4091_s1 = inlined_call_operand.vmem [shape: bf16[128,512], index: 1, kind: input, shape index: {}]   ;;  %s4092_s0 = inlined_call_operand.vmem [shape: bf16[8,16,512], index: 0, kind: input, shape index: {}]   ;;  %s4093_s2 = inlined_call_operand.vmem [shape: f32[16,128], index: 2, kind: output, shape index: {}]  }
   0x1   :  { %v3344_v0 = vld [vmem:[%s4091_s1 + $0x4] ss:$16 sps:$4 sm:$0xff]   ;;  %247 = vmatprep.mubr.bf16.mxu0 %v3324_v1  ;;  %290 = vmatprep.mubr.bf16.mxu1 %v3324_v1  ;;  %v3351_v2 = vld [vmem:[%s4091_s1] ss:$16 sps:$4 sm:$0xff]   ;;  %v3363_v4 = vld [vmem:[%s4091_s1 + $0xc] ss:$16 sps:$4 sm:$0xff]  }
   0x2   :  { %215 = vmatprep.subr.bf16.mxu0 %v3344_v0  ;;  %v3357_v3 = vld [vmem:[%s4091_s1 + $0x24] ss:$16 sps:$4 sm:$0xff]   ;;  %v3368_v5 = vld [vmem:[%s4091_s1 + $0x20] ss:$16 sps:$4 sm:$0xff]   ;;  %v3373_v6 = vld [vmem:[%s4091_s1 + $0x8] ss:$16 sps:$4 sm:$0xff]   ;;  %258 = vmatprep.subr.bf16.mxu1 %v3363_v4 }
   0x3   :  { %216 = vmatpush1.bf16.msra.mxu0 %v3351_v2  ;;  %v3379_v7 = vld [vmem:[%s4091_s1 + $0x44] ss:$16 sps:$4 sm:$0xff]   ;;  %v3385_v8 = vld [vmem:[%s4091_s1 + $0x2c] ss:$16 sps:$4 sm:$0xff]   ;;  %259 = vmatpush1.bf16.msra.mxu1 %v3373_v6  ;;  %v3391_v9 = vld [vmem:[%s4091_s1 + $0x28] ss:$16 sps:$4 sm:$0xff]  }
   0x4   :  { %217 = vmatprep.subr.bf16.mxu0 %v3357_v3  ;;  %260 = vmatprep.subr.bf16.mxu1 %v3385_v8  ;;  %v3398_v10 = vld [vmem:[%s4091_s1 + $0x40] ss:$16 sps:$4 sm:$0xff]   ;;  %v3404_v11 = vld [vmem:[%s4091_s1 + $0x64] ss:$16 sps:$4 sm:$0xff]   ;;  %v3409_v12 = vld [vmem:[%s4091_s1 + $0x4c] ss:$16 sps:$4 sm:$0xff]  }
   0x5   :  { %v3415_v13 = vld [vmem:[%s4091_s1 + $0x48] ss:$16 sps:$4 sm:$0xff]   ;;  %v3422_v14 = vld [vmem:[%s4091_s1 + $0x60] ss:$16 sps:$4 sm:$0xff]   ;;  %v3427_v15 = vld [vmem:[%s4091_s1 + $0x6c] ss:$16 sps:$4 sm:$0xff]  }
   0x6   :  { %v3433_v16 = vld [vmem:[%s4091_s1 + $0x84] ss:$16 sps:$4 sm:$0xff]   ;;  %v3439_v17 = vld [vmem:[%s4091_s1 + $0x80] ss:$16 sps:$4 sm:$0xff]   ;;  %v3444_v18 = vld [vmem:[%s4091_s1 + $0x68] ss:$16 sps:$4 sm:$0xff]  }
   0x7   :  { %218 = vmatpush1.bf16.msra.mxu0 %v3368_v5  ;;  %261 = vmatpush1.bf16.msra.mxu1 %v3391_v9  ;;  %v3451_v19 = vld [vmem:[%s4091_s1 + $0x8c] ss:$16 sps:$4 sm:$0xff]   ;;  %v3457_v20 = vld [vmem:[%s4091_s1 + $0xa4] ss:$16 sps:$4 sm:$0xff]   ;;  %v3463_v21 = vld [vmem:[%s4091_s1 + $0x88] ss:$16 sps:$4 sm:$0xff]  }
   0x8   :  { %219 = vmatprep.subr.bf16.mxu0 %v3379_v7  ;;  %262 = vmatprep.subr.bf16.mxu1 %v3409_v12  ;;  %v3470_v22 = vld [vmem:[%s4091_s1 + $0xa0] ss:$16 sps:$4 sm:$0xff]   ;;  %v3475_v23 = vld [vmem:[%s4091_s1 + $0xc4] ss:$16 sps:$4 sm:$0xff]   ;;  %v3480_v24 = vld [vmem:[%s4091_s1 + $0xac] ss:$16 sps:$4 sm:$0xff]  }
   0x9   :  { %v3486_v25 = vld [vmem:[%s4091_s1 + $0xa8] ss:$16 sps:$4 sm:$0xff]   ;;  %v3491_v26 = vld [vmem:[%s4091_s1 + $0xc0] ss:$16 sps:$4 sm:$0xff]   ;;  %v3496_v27 = vld [vmem:[%s4091_s1 + $0xcc] ss:$16 sps:$4 sm:$0xff]  }
   0xa   :  { %v3502_v28 = vld [vmem:[%s4091_s1 + $0xe4] ss:$16 sps:$4 sm:$0xff]   ;;  %v3510_v29 = vld [vmem:[%s4091_s1 + $0xc8] ss:$16 sps:$4 sm:$0xff]   ;;  %v3515_v30 = vld [vmem:[%s4091_s1 + $0xe0] ss:$16 sps:$4 sm:$0xff]  }
   0xb   :  { %220 = vmatpush1.bf16.msra.mxu0 %v3398_v10  ;;  %263 = vmatpush1.bf16.msra.mxu1 %v3415_v13  ;;  %v3520_v31 = vld [vmem:[%s4091_s1 + $0xec] ss:$16 sps:$4 sm:$0xff]   ;;  %v3529_v32 = vld [vmem:[%s4091_s1 + $0xe8] ss:$16 sps:$4 sm:$0xff]   ;;  %v301_v34 = vld [vmem:[%s4092_s0] sm:$0xff] }
   0xc   :  { %221 = vmatprep.subr.bf16.mxu0 %v3404_v11  ;;  %264 = vmatprep.subr.bf16.mxu1 %v3427_v15  ;;  %v303_v35 = vld [vmem:[%s4092_s0 + $0x10] sm:$0xff]  ;;  %v305_v36 = vunpack.c.l.bf16 %v301_v34  ;;  %v306_v37 = vunpack.c.h.bf16 %v301_v34  ;;  %v302_v38 = vld [vmem:[%s4092_s0 + $0x8] sm:$0xff]  ;;  %v304_v42 = vld [vmem:[%s4092_s0 + $0x18] sm:$0xff] }
   0xd   :  { %v309_v39 = vunpack.c.l.bf16 %v303_v35  ;;  %v310_v41 = vunpack.c.h.bf16 %v303_v35  ;;  %v307_v45 = vunpack.c.l.bf16 %v302_v38  ;;  %v311_v52 = vunpack.c.l.bf16 %v304_v42 }
   0xe   :  { %v308_v60 = vunpack.c.h.bf16 %v302_v38  ;;  %v312_v63 = vunpack.c.h.bf16 %v304_v42 }
   0xf   :  { %222 = vmatpush1.bf16.msra.mxu0 %v3422_v14  ;;  %265 = vmatpush1.bf16.msra.mxu1 %v3444_v18 }
  0x10   :  { %223 = vmatprep.subr.bf16.mxu0 %v3433_v16  ;;  %266 = vmatprep.subr.bf16.mxu1 %v3451_v19 }
  0x13   :  { %224 = vmatpush1.bf16.msra.mxu0 %v3439_v17  ;;  %267 = vmatpush1.bf16.msra.mxu1 %v3463_v21 }
  0x14   :  { %225 = vmatprep.subr.bf16.mxu0 %v3457_v20  ;;  %268 = vmatprep.subr.bf16.mxu1 %v3480_v24 }
  0x17   :  { %226 = vmatpush1.bf16.msra.mxu0 %v3470_v22  ;;  %269 = vmatpush1.bf16.msra.mxu1 %v3486_v25 }
  0x18   :  { %227 = vmatprep.subr.bf16.mxu0 %v3475_v23  ;;  %270 = vmatprep.subr.bf16.mxu1 %v3496_v27 }
  0x1b   :  { %228 = vmatpush1.bf16.msra.mxu0 %v3491_v26  ;;  %271 = vmatpush1.bf16.msra.mxu1 %v3510_v29 }
  0x1c   :  { %229 = vmatprep.subr.bf16.mxu0 %v3502_v28  ;;  %272 = vmatprep.subr.bf16.mxu1 %v3520_v31 }
  0x1f   :  { %230 = vmatpush1.bf16.msra.mxu0 %v3515_v30  ;;  %273 = vmatpush1.bf16.msra.mxu1 %v3529_v32 }
  0x20   :  { %558 = vmatprep.subr.bf16.mxu0 %v3344_v0  ;;  %601 = vmatprep.subr.bf16.mxu1 %v3363_v4 }
  0x22   :  { %248 = vmatmul.mubr.bf16.vlgmr.msra.gmra.mrb[0].mxu0 %v3325_v33  ;;  %291 = vmatmul.mubr.bf16.vlgmr.msra.gmra.mrb[0].mxu1 %v3325_v33 }
  0x23   :  { %559 = vmatpush1.bf16.msra.mxu0 %v3351_v2  ;;  %590 = vmatprep.mubr.bf16.mxu0 %v3324_v1 }
  0x24   :  { %560 = vmatprep.subr.bf16.mxu0 %v3357_v3  ;;  %602 = vmatpush1.bf16.msra.mxu1 %v3373_v6 }
  0x25   :  { %633 = vmatprep.mubr.bf16.mxu1 %v3324_v1  ;;  %603 = vmatprep.subr.bf16.mxu1 %v3385_v8 }
  0x27   :  { %561 = vmatpush1.bf16.msra.mxu0 %v3368_v5 }
  0x28   :  { %562 = vmatprep.subr.bf16.mxu0 %v3379_v7  ;;  %604 = vmatpush1.bf16.msra.mxu1 %v3391_v9 }
  0x29   :  { %605 = vmatprep.subr.bf16.mxu1 %v3409_v12 }
  0x2b   :  { %563 = vmatpush1.bf16.msra.mxu0 %v3398_v10 }
  0x2c   :  { %564 = vmatprep.subr.bf16.mxu0 %v3404_v11  ;;  %606 = vmatpush1.bf16.msra.mxu1 %v3415_v13 }
  0x2d   :  { %607 = vmatprep.subr.bf16.mxu1 %v3427_v15 }
  0x2f   :  { %565 = vmatpush1.bf16.msra.mxu0 %v3422_v14 }
  0x30   :  { %566 = vmatprep.subr.bf16.mxu0 %v3433_v16  ;;  %608 = vmatpush1.bf16.msra.mxu1 %v3444_v18 }
  0x31   :  { %609 = vmatprep.subr.bf16.mxu1 %v3451_v19 }
  0x33   :  { %567 = vmatpush1.bf16.msra.mxu0 %v3439_v17 }
  0x34   :  { %568 = vmatprep.subr.bf16.mxu0 %v3457_v20  ;;  %610 = vmatpush1.bf16.msra.mxu1 %v3463_v21 }
  0x35   :  { %611 = vmatprep.subr.bf16.mxu1 %v3480_v24 }
  0x37   :  { %569 = vmatpush1.bf16.msra.mxu0 %v3470_v22 }
  0x38   :  { %570 = vmatprep.subr.bf16.mxu0 %v3475_v23  ;;  %612 = vmatpush1.bf16.msra.mxu1 %v3486_v25 }
  0x39   :  { %613 = vmatprep.subr.bf16.mxu1 %v3496_v27 }
  0x3b   :  { %571 = vmatpush1.bf16.msra.mxu0 %v3491_v26 }
  0x3c   :  { %572 = vmatprep.subr.bf16.mxu0 %v3502_v28  ;;  %614 = vmatpush1.bf16.msra.mxu1 %v3510_v29 }
  0x3d   :  { %615 = vmatprep.subr.bf16.mxu1 %v3520_v31 }
  0x3f   :  { %573 = vmatpush1.bf16.msra.mxu0 %v3515_v30 }
  0x40   :  { %902 = vmatprep.subr.bf16.mxu0 %v3344_v0  ;;  %616 = vmatpush1.bf16.msra.mxu1 %v3529_v32 }
  0x41   :  { %945 = vmatprep.subr.bf16.mxu1 %v3363_v4 }
  0xf5   :  { %v249_v40 = vpop.f32.mrb[0].mxu0  ;;  %v292_v51 = vpop.f32.mrb[0].mxu1 }
  0xf6   :  { %v313_v43 = vadd.f32 %v305_v36, %v249_v40  ;;  %v251_v44 = vpop.f32.mrb[1].mxu0  ;;  %v294_v55 = vpop.f32.mrb[1].mxu1  ;;  %v315_v57 = vadd.f32 %v307_v45, %v292_v51 }
  0xf7   :  { %v314_v46 = vadd.f32 %v306_v37, %v251_v44  ;;  %v253_v47 = vpop.f32.mrb[2].mxu0  ;;  %v296_v58 = vpop.f32.mrb[2].mxu1  ;;  %v316_v33 = vadd.f32 %v308_v60, %v294_v55 }
  0xf8   :  { %v321_v48 = vmul.f32 0.5, %v313_v43  ;;  %v317_v49 = vadd.f32 %v309_v39, %v253_v47  ;;  %v255_v50 = vpop.f32.mrb[3].mxu0  ;;  %v298_v61 = vpop.f32.mrb[3].mxu1  ;;  %v319_v62 = vadd.f32 %v311_v52, %v296_v58 }
  0xf9   :  { %v329_v53 = vmul.f32 0.5, %v314_v46  ;;  %v318_v54 = vadd.f32 %v310_v41, %v255_v50  ;;  %v320_v34 = vadd.f32 %v312_v63, %v298_v61  ;;  %v339_v35 = vmul.f32 0.5, %v316_v33 }
  0xfa   :  { %3164 = vtanh.f32 %v321_v48  ;;  %v322_v56 = vmul.f32 0.5, %v317_v49 }
  0xfb   :  { %3166 = vtanh.f32 %v329_v53  ;;  %v330_v59 = vmul.f32 0.5, %v318_v54  ;;  %v340_v37 = vmul.f32 0.5, %v320_v34 }
  0xfc   :  { %3168 = vtanh.f32 %v322_v56 }
  0xfd   :  { %3170 = vtanh.f32 %v330_v59 }
  0xfe   :  { %3172 = vtanh.f32 %v315_v57 }
  0xff   :  { %3174 = vtanh.f32 %v319_v62 }
 0x100   :  { %3176 = vtanh.f32 %v339_v35 }
 0x101   :  { %3178 = vtanh.f32 %v340_v37  ;;  %v2846_v37 = vld [vmem:[%s4092_s0 + $0x20] sm:$0xff] }
 0x104   :  { %v3165_v36 = vpop.eup %3164 }
 0x105   :  { %v3167_v39 = vpop.eup %3166  ;;  %v325_v40 = vmul.f32 0.5, %v3165_v36 }
 0x106   :  { %v3169_v41 = vpop.eup %3168  ;;  %v333_v43 = vmul.f32 0.5, %v3167_v39  ;;  %v2848_v39 = vld [vmem:[%s4092_s0 + $0x30] sm:$0xff] }
 0x107   :  { %v3171_v44 = vpop.eup %3170  ;;  %v327_v45 = vadd.f32 0.5, %v325_v40  ;;  %v326_v46 = vmul.f32 0.5, %v3169_v41  ;;  %v649_v40 = vunpack.c.l.bf16 %v2846_v37  ;;  %v2847_v41 = vld [vmem:[%s4092_s0 + $0x28] sm:$0xff] }
 0x108   :  { %v3173_v38 = vpop.eup %3172  ;;  %v335_v47 = vadd.f32 0.5, %v333_v43  ;;  %v334_v48 = vmul.f32 0.5, %v3171_v44  ;;  %v650_v43 = vunpack.c.h.bf16 %v2846_v37  ;;  %v653_v44 = vunpack.c.l.bf16 %v2848_v39 }
 0x109   :  { %v328_v42 = vadd.f32 0.5, %v326_v46  ;;  %v351_v49 = vmul.f32 %v3173_v38, %v327_v45  ;;  %v3175_v50 = vpop.eup %3174 }
 0x10a   :  { %v349_v51 = vmul.f32 0.0, %v335_v47  ;;  %v336_v52 = vadd.f32 0.5, %v334_v48  ;;  %v3177_v57 = vpop.eup %3176 }
 0x10b   :  { %v352_v53 = vmul.f32 %v3175_v50, %v328_v42  ;;  %v3179_v58 = vpop.eup %3178  ;;  %v343_v59 = vmul.f32 0.5, %v3177_v57  ;;  %v2849_v42 = vld [vmem:[%s4092_s0 + $0x38] sm:$0xff] }
 0x10c   :  { %v350_v54 = vmul.f32 0.0, %v336_v52  ;;  %v3583_v55 = vadd.f32 %v351_v49, %v349_v51  ;;  %v344_v60 = vmul.f32 0.5, %v3179_v58 }
 0x10d   :  { %v345_v62 = vadd.f32 0.5, %v343_v59  ;;  %v655_v59 = vunpack.c.l.bf16 %v2849_v42 }
 0x10e   :  { %3180 = vtanh.f32 %v3583_v55  ;;  %v3586_v56 = vadd.f32 %v352_v53, %v350_v54  ;;  %v346_v63 = vadd.f32 0.5, %v344_v60 }
 0x110   :  { %3182 = vtanh.f32 %v3586_v56 }
 0x118   :  { %v3181_v61 = vpop.eup %3180 }
 0x119   :  { %v359_v34 = vmul.f32 %v3181_v61, %v345_v62 }
 0x11a   :  { %v3183_v33 = vpop.eup %3182 }
 0x11b   :  { %v360_v35 = vmul.f32 %v3183_v33, %v346_v63  ;;  %v652_v33 = vunpack.c.h.bf16 %v2847_v41 }
 0x11d   :  { %v365_v36 = vpack.c.bf16 %v360_v35, %v359_v34  ;;  %v656_v35 = vunpack.c.h.bf16 %v2849_v42 }
 0x11f   :  { %591 = vmatmul.mubr.bf16.vlgmr.msra.gmra.mrb[4].mxu0 %v365_v36  ;;  %634 = vmatmul.mubr.bf16.vlgmr.msra.gmra.mrb[4].mxu1 %v365_v36 }
 0x120   :  { %903 = vmatpush1.bf16.msra.mxu0 %v3351_v2  ;;  %946 = vmatpush1.bf16.msra.mxu1 %v3373_v6 }
 0x121   :  { %904 = vmatprep.subr.bf16.mxu0 %v3357_v3  ;;  %947 = vmatprep.subr.bf16.mxu1 %v3385_v8 }
 0x122   :  { %934 = vmatprep.mubr.bf16.mxu0 %v3324_v1  ;;  %977 = vmatprep.mubr.bf16.mxu1 %v3324_v1 }
 0x124   :  { %905 = vmatpush1.bf16.msra.mxu0 %v3368_v5  ;;  %948 = vmatpush1.bf16.msra.mxu1 %v3391_v9 }
 0x125   :  { %906 = vmatprep.subr.bf16.mxu0 %v3379_v7  ;;  %949 = vmatprep.subr.bf16.mxu1 %v3409_v12 }
 0x128   :  { %907 = vmatpush1.bf16.msra.mxu0 %v3398_v10  ;;  %950 = vmatpush1.bf16.msra.mxu1 %v3415_v13 }
 0x129   :  { %908 = vmatprep.subr.bf16.mxu0 %v3404_v11  ;;  %951 = vmatprep.subr.bf16.mxu1 %v3427_v15 }
 0x12c   :  { %909 = vmatpush1.bf16.msra.mxu0 %v3422_v14  ;;  %952 = vmatpush1.bf16.msra.mxu1 %v3444_v18 }
 0x12d   :  { %910 = vmatprep.subr.bf16.mxu0 %v3433_v16  ;;  %953 = vmatprep.subr.bf16.mxu1 %v3451_v19 }
 0x130   :  { %911 = vmatpush1.bf16.msra.mxu0 %v3439_v17  ;;  %954 = vmatpush1.bf16.msra.mxu1 %v3463_v21 }
 0x131   :  { %912 = vmatprep.subr.bf16.mxu0 %v3457_v20  ;;  %955 = vmatprep.subr.bf16.mxu1 %v3480_v24 }
 0x134   :  { %913 = vmatpush1.bf16.msra.mxu0 %v3470_v22  ;;  %956 = vmatpush1.bf16.msra.mxu1 %v3486_v25 }
 0x135   :  { %914 = vmatprep.subr.bf16.mxu0 %v3475_v23  ;;  %957 = vmatprep.subr.bf16.mxu1 %v3496_v27 }
 0x138   :  { %915 = vmatpush1.bf16.msra.mxu0 %v3491_v26  ;;  %958 = vmatpush1.bf16.msra.mxu1 %v3510_v29 }
 0x139   :  { %916 = vmatprep.subr.bf16.mxu0 %v3502_v28  ;;  %959 = vmatprep.subr.bf16.mxu1 %v3520_v31 }
 0x13c   :  { %917 = vmatpush1.bf16.msra.mxu0 %v3515_v30  ;;  %960 = vmatpush1.bf16.msra.mxu1 %v3529_v32 }
 0x13d   :  { %1246 = vmatprep.subr.bf16.mxu0 %v3344_v0  ;;  %1289 = vmatprep.subr.bf16.mxu1 %v3363_v4  ;;  %v654_v0 = vunpack.c.h.bf16 %v2848_v39  ;;  %v651_v4 = vunpack.c.l.bf16 %v2847_v41 }
 0x1f2   :  { %v592_v45 = vpop.f32.mrb[4].mxu0  ;;  %v635_v46 = vpop.f32.mrb[4].mxu1 }
 0x1f3   :  { %v657_v38 = vadd.f32 %v649_v40, %v592_v45  ;;  %v594_v47 = vpop.f32.mrb[5].mxu0  ;;  %v637_v48 = vpop.f32.mrb[5].mxu1  ;;  %v659_v61 = vadd.f32 %v651_v4, %v635_v46 }
 0x1f4   :  { %v658_v49 = vadd.f32 %v650_v43, %v594_v47  ;;  %v596_v50 = vpop.f32.mrb[6].mxu0  ;;  %v639_v51 = vpop.f32.mrb[6].mxu1  ;;  %v660_v36 = vadd.f32 %v652_v33, %v637_v48 }
 0x1f5   :  { %v665_v52 = vmul.f32 0.5, %v657_v38  ;;  %v661_v53 = vadd.f32 %v653_v44, %v596_v50  ;;  %v598_v54 = vpop.f32.mrb[7].mxu0  ;;  %v641_v57 = vpop.f32.mrb[7].mxu1  ;;  %v663_v34 = vadd.f32 %v655_v59, %v639_v51 }
 0x1f6   :  { %v673_v58 = vmul.f32 0.5, %v658_v49  ;;  %v662_v60 = vadd.f32 %v654_v0, %v598_v54  ;;  %v664_v37 = vadd.f32 %v656_v35, %v641_v57  ;;  %v683_v44 = vmul.f32 0.5, %v660_v36 }
 0x1f7   :  { %3184 = vtanh.f32 %v665_v52  ;;  %v666_v62 = vmul.f32 0.5, %v661_v53 }
 0x1f8   :  { %3186 = vtanh.f32 %v673_v58  ;;  %v674_v63 = vmul.f32 0.5, %v662_v60  ;;  %v684_v0 = vmul.f32 0.5, %v664_v37 }
 0x1f9   :  { %3188 = vtanh.f32 %v666_v62 }
 0x1fa   :  { %3190 = vtanh.f32 %v659_v61 }
 0x1fb   :  { %3192 = vtanh.f32 %v674_v63 }
 0x1fc   :  { %3194 = vtanh.f32 %v663_v34 }
 0x1fd   :  { %3196 = vtanh.f32 %v683_v44 }
 0x1fe   :  { %3198 = vtanh.f32 %v684_v0 }
 0x201   :  { %v3185_v39 = vpop.eup %3184 }
 0x202   :  { %v3187_v40 = vpop.eup %3186  ;;  %v669_v43 = vmul.f32 0.5, %v3185_v39 }
 0x203   :  { %v677_v45 = vmul.f32 0.5, %v3187_v40  ;;  %v3189_v38 = vpop.eup %3188 }
 0x204   :  { %v671_v46 = vadd.f32 0.5, %v669_v43  ;;  %v3191_v4 = vpop.eup %3190  ;;  %v670_v49 = vmul.f32 0.5, %v3189_v38 }
 0x205   :  { %v679_v47 = vadd.f32 0.5, %v677_v45  ;;  %v3193_v41 = vpop.eup %3192 }
 0x206   :  { %v695_v50 = vmul.f32 %v3191_v4, %v671_v46  ;;  %v672_v51 = vadd.f32 0.5, %v670_v49  ;;  %v678_v48 = vmul.f32 0.5, %v3193_v41  ;;  %v3195_v52 = vpop.eup %3194 }
 0x207   :  { %v693_v42 = vmul.f32 %v679_v47, %v3583_v55  ;;  %v3197_v60 = vpop.eup %3196 }
 0x208   :  { %v680_v54 = vadd.f32 0.5, %v678_v48  ;;  %v696_v57 = vmul.f32 %v3195_v52, %v672_v51  ;;  %v3199_v61 = vpop.eup %3198  ;;  %v687_v62 = vmul.f32 0.5, %v3197_v60 }
 0x209   :  { %v3636_v53 = vadd.f32 %v695_v50, %v693_v42  ;;  %v688_v55 = vmul.f32 0.5, %v3199_v61 }
 0x20a   :  { %v694_v58 = vmul.f32 %v680_v54, %v3586_v56  ;;  %v689_v33 = vadd.f32 0.5, %v687_v62 }
 0x20b   :  { %3200 = vtanh.f32 %v3636_v53  ;;  %v690_v34 = vadd.f32 0.5, %v688_v55 }
 0x20c   :  { %v3640_v59 = vadd.f32 %v696_v57, %v694_v58 }
 0x20e   :  { %3202 = vtanh.f32 %v3640_v59 }
 0x215   :  { %v3201_v63 = vpop.eup %3200 }
 0x216   :  { %v703_v36 = vmul.f32 %v3201_v63, %v689_v33 }
 0x218   :  { %v3203_v35 = vpop.eup %3202 }
 0x219   :  { %v704_v37 = vmul.f32 %v3203_v35, %v690_v34 }
 0x21b   :  { %v709_v39 = vpack.c.bf16 %v704_v37, %v703_v36 }
 0x21d   :  { %935 = vmatmul.mubr.bf16.vlgmr.msra.gmra.mrb[8].mxu0 %v709_v39  ;;  %978 = vmatmul.mubr.bf16.vlgmr.msra.gmra.mrb[8].mxu1 %v709_v39 }
 0x21e   :  { %1247 = vmatpush1.bf16.msra.mxu0 %v3351_v2  ;;  %1290 = vmatpush1.bf16.msra.mxu1 %v3373_v6  ;;  %v2882_v2 = vld [vmem:[%s4092_s0 + $0x40] sm:$0xff]  ;;  %v2883_v6 = vld [vmem:[%s4092_s0 + $0x48] sm:$0xff] }
 0x21f   :  { %1248 = vmatprep.subr.bf16.mxu0 %v3357_v3  ;;  %1291 = vmatprep.subr.bf16.mxu1 %v3385_v8  ;;  %v2884_v3 = vld [vmem:[%s4092_s0 + $0x50] sm:$0xff] }
 0x220   :  { %1278 = vmatprep.mubr.bf16.mxu0 %v3324_v1  ;;  %1321 = vmatprep.mubr.bf16.mxu1 %v3324_v1  ;;  %v997_v8 = vunpack.c.l.bf16 %v2884_v3 }
 0x222   :  { %1249 = vmatpush1.bf16.msra.mxu0 %v3368_v5  ;;  %1292 = vmatpush1.bf16.msra.mxu1 %v3391_v9  ;;  %v993_v5 = vunpack.c.l.bf16 %v2882_v2 }
 0x223   :  { %1250 = vmatprep.subr.bf16.mxu0 %v3379_v7  ;;  %1293 = vmatprep.subr.bf16.mxu1 %v3409_v12  ;;  %v994_v7 = vunpack.c.h.bf16 %v2882_v2 }
 0x226   :  { %1251 = vmatpush1.bf16.msra.mxu0 %v3398_v10  ;;  %1294 = vmatpush1.bf16.msra.mxu1 %v3415_v13  ;;  %v995_v13 = vunpack.c.l.bf16 %v2883_v6 }
 0x227   :  { %1252 = vmatprep.subr.bf16.mxu0 %v3404_v11  ;;  %1295 = vmatprep.subr.bf16.mxu1 %v3427_v15  ;;  %v998_v11 = vunpack.c.h.bf16 %v2884_v3 }
 0x22a   :  { %1253 = vmatpush1.bf16.msra.mxu0 %v3422_v14  ;;  %1296 = vmatpush1.bf16.msra.mxu1 %v3444_v18 }
 0x22b   :  { %1254 = vmatprep.subr.bf16.mxu0 %v3433_v16  ;;  %1297 = vmatprep.subr.bf16.mxu1 %v3451_v19  ;;  %v2885_v16 = vld [vmem:[%s4092_s0 + $0x58] sm:$0xff] }
 0x22e   :  { %1255 = vmatpush1.bf16.msra.mxu0 %v3439_v17  ;;  %1298 = vmatpush1.bf16.msra.mxu1 %v3463_v21 }
 0x22f   :  { %1256 = vmatprep.subr.bf16.mxu0 %v3457_v20  ;;  %1299 = vmatprep.subr.bf16.mxu1 %v3480_v24 }
 0x232   :  { %1257 = vmatpush1.bf16.msra.mxu0 %v3470_v22  ;;  %1300 = vmatpush1.bf16.msra.mxu1 %v3486_v25  ;;  %v999_v25 = vunpack.c.l.bf16 %v2885_v16 }
 0x233   :  { %1258 = vmatprep.subr.bf16.mxu0 %v3475_v23  ;;  %1301 = vmatprep.subr.bf16.mxu1 %v3496_v27 }
 0x236   :  { %1259 = vmatpush1.bf16.msra.mxu0 %v3491_v26  ;;  %1302 = vmatpush1.bf16.msra.mxu1 %v3510_v29 }
 0x237   :  { %1260 = vmatprep.subr.bf16.mxu0 %v3502_v28  ;;  %1303 = vmatprep.subr.bf16.mxu1 %v3520_v31 }
 0x23a   :  { %1261 = vmatpush1.bf16.msra.mxu0 %v3515_v30  ;;  %1304 = vmatpush1.bf16.msra.mxu1 %v3529_v32  ;;  %v996_v30 = vunpack.c.h.bf16 %v2883_v6  ;;  %v1000_v32 = vunpack.c.h.bf16 %v2885_v16  ;;  %v3705_v6 = vld [vmem:[%s4091_s1 + $0xc] ss:$16 sps:$4 sm:$0xff]   ;;  %v3763_v16 = vld [vmem:[%s4091_s1 + $0x48] ss:$16 sps:$4 sm:$0xff]  }
 0x23b   :  { %1633 = vmatprep.subr.bf16.mxu1 %v3705_v6 }
 0x2f0   :  { %v936_v9 = vpop.f32.mrb[8].mxu0  ;;  %v979_v10 = vpop.f32.mrb[8].mxu1 }
 0x2f1   :  { %v1001_v12 = vadd.f32 %v993_v5, %v936_v9  ;;  %v938_v14 = vpop.f32.mrb[9].mxu0  ;;  %v981_v15 = vpop.f32.mrb[9].mxu1  ;;  %v1003_v27 = vadd.f32 %v995_v13, %v979_v10  ;;  %v3724_v9 = vld [vmem:[%s4091_s1 + $0x24] ss:$16 sps:$4 sm:$0xff]   ;;  %v3729_v10 = vld [vmem:[%s4091_s1 + $0x2c] ss:$16 sps:$4 sm:$0xff]  }
 0x2f2   :  { %v1002_v17 = vadd.f32 %v994_v7, %v938_v14  ;;  %v940_v18 = vpop.f32.mrb[10].mxu0  ;;  %v983_v19 = vpop.f32.mrb[10].mxu1  ;;  %v1004_v56 = vadd.f32 %v996_v30, %v981_v15  ;;  %v3710_v7 = vld [vmem:[%s4091_s1] ss:$16 sps:$4 sm:$0xff]   ;;  %v3748_v13 = vld [vmem:[%s4091_s1 + $0x44] ss:$16 sps:$4 sm:$0xff]  }
 0x2f3   :  { %v1009_v20 = vmul.f32 0.5, %v1001_v12  ;;  %v1005_v21 = vadd.f32 %v997_v8, %v940_v18  ;;  %v942_v22 = vpop.f32.mrb[11].mxu0  ;;  %v985_v23 = vpop.f32.mrb[11].mxu1  ;;  %v1007_v31 = vadd.f32 %v999_v25, %v983_v19  ;;  %v3715_v8 = vld [vmem:[%s4091_s1 + $0x8] ss:$16 sps:$4 sm:$0xff]  }
 0x2f4   :  { %v1017_v24 = vmul.f32 0.5, %v1002_v17  ;;  %v1006_v26 = vadd.f32 %v998_v11, %v942_v22  ;;  %v1008_v40 = vadd.f32 %v1000_v32, %v985_v23  ;;  %v1027_v0 = vmul.f32 0.5, %v1004_v56  ;;  %v3734_v11 = vld [vmem:[%s4091_s1 + $0x20] ss:$16 sps:$4 sm:$0xff]   ;;  %v3739_v12 = vld [vmem:[%s4091_s1 + $0x28] ss:$16 sps:$4 sm:$0xff]  }
 0x2f5   :  { %3204 = vtanh.f32 %v1009_v20  ;;  %v1010_v28 = vmul.f32 0.5, %v1005_v21  ;;  %v3753_v14 = vld [vmem:[%s4091_s1 + $0x4c] ss:$16 sps:$4 sm:$0xff]   ;;  %v3758_v15 = vld [vmem:[%s4091_s1 + $0x40] ss:$16 sps:$4 sm:$0xff]  }
 0x2f6   :  { %3206 = vtanh.f32 %v1017_v24  ;;  %v1018_v29 = vmul.f32 0.5, %v1006_v26  ;;  %v1028_v46 = vmul.f32 0.5, %v1008_v40  ;;  %v3772_v17 = vld [vmem:[%s4091_s1 + $0x64] ss:$16 sps:$4 sm:$0xff]   ;;  %v3777_v18 = vld [vmem:[%s4091_s1 + $0x6c] ss:$16 sps:$4 sm:$0xff]  }
 0x2f7   :  { %3208 = vtanh.f32 %v1010_v28  ;;  %v3782_v19 = vld [vmem:[%s4091_s1 + $0x60] ss:$16 sps:$4 sm:$0xff]   ;;  %v3787_v20 = vld [vmem:[%s4091_s1 + $0x68] ss:$16 sps:$4 sm:$0xff]   ;;  %v3796_v21 = vld [vmem:[%s4091_s1 + $0x84] ss:$16 sps:$4 sm:$0xff]  }
 0x2f8   :  { %3210 = vtanh.f32 %v1003_v27  ;;  %v3801_v22 = vld [vmem:[%s4091_s1 + $0x8c] ss:$16 sps:$4 sm:$0xff]   ;;  %v3806_v23 = vld [vmem:[%s4091_s1 + $0x80] ss:$16 sps:$4 sm:$0xff]   ;;  %v3811_v24 = vld [vmem:[%s4091_s1 + $0x88] ss:$16 sps:$4 sm:$0xff]  }
 0x2f9   :  { %3212 = vtanh.f32 %v1018_v29  ;;  %v3820_v25 = vld [vmem:[%s4091_s1 + $0xa4] ss:$16 sps:$4 sm:$0xff]   ;;  %v3825_v26 = vld [vmem:[%s4091_s1 + $0xac] ss:$16 sps:$4 sm:$0xff]   ;;  %v3830_v27 = vld [vmem:[%s4091_s1 + $0xa0] ss:$16 sps:$4 sm:$0xff]  }
 0x2fa   :  { %3214 = vtanh.f32 %v1007_v31  ;;  %v3835_v28 = vld [vmem:[%s4091_s1 + $0xa8] ss:$16 sps:$4 sm:$0xff]   ;;  %v3844_v29 = vld [vmem:[%s4091_s1 + $0xc4] ss:$16 sps:$4 sm:$0xff]   ;;  %v3849_v30 = vld [vmem:[%s4091_s1 + $0xcc] ss:$16 sps:$4 sm:$0xff]  }
 0x2fb   :  { %3216 = vtanh.f32 %v1027_v0  ;;  %v3854_v31 = vld [vmem:[%s4091_s1 + $0xc0] ss:$16 sps:$4 sm:$0xff]   ;;  %v3859_v32 = vld [vmem:[%s4091_s1 + $0xc8] ss:$16 sps:$4 sm:$0xff]   ;;  %v3873_v40 = vld [vmem:[%s4091_s1 + $0xe4] ss:$16 sps:$4 sm:$0xff]  }
 0x2fc   :  { %3218 = vtanh.f32 %v1028_v46  ;;  %v3868_v56 = vld [vmem:[%s4091_s1 + $0xe0] ss:$16 sps:$4 sm:$0xff]   ;;  %v2919_v46 = vld [vmem:[%s4092_s0 + $0x68] sm:$0xff] }
 0x2fd   :  { %v2920_v0 = vld [vmem:[%s4092_s0 + $0x70] sm:$0xff] }
 0x2ff   :  { %v3205_v43 = vpop.eup %3204 }
 0x300   :  { %v3207_v44 = vpop.eup %3206  ;;  %v1013_v45 = vmul.f32 0.5, %v3205_v43  ;;  %v3878_v43 = vld [vmem:[%s4091_s1 + $0xe8] ss:$16 sps:$4 sm:$0xff]  }
 0x301   :  { %v1021_v38 = vmul.f32 0.5, %v3207_v44  ;;  %v3209_v4 = vpop.eup %3208  ;;  %v3883_v44 = vld [vmem:[%s4091_s1 + $0xec] ss:$16 sps:$4 sm:$0xff]  }
 0x302   :  { %v1015_v47 = vadd.f32 0.5, %v1013_v45  ;;  %v3211_v49 = vpop.eup %3210  ;;  %v1014_v50 = vmul.f32 0.5, %v3209_v4  ;;  %v2918_v45 = vld [vmem:[%s4092_s0 + $0x60] sm:$0xff] }
 0x303   :  { %v1023_v41 = vadd.f32 0.5, %v1021_v38  ;;  %v3213_v42 = vpop.eup %3212  ;;  %v1337_v38 = vunpack.c.l.bf16 %v2918_v45  ;;  %v1338_v4 = vunpack.c.h.bf16 %v2918_v45 }
 0x304   :  { %v1039_v51 = vmul.f32 %v3211_v49, %v1015_v47  ;;  %v1016_v52 = vadd.f32 0.5, %v1014_v50  ;;  %v1022_v54 = vmul.f32 0.5, %v3213_v42  ;;  %v3215_v57 = vpop.eup %3214  ;;  %v1341_v47 = vunpack.c.l.bf16 %v2920_v0 }
 0x305   :  { %v1037_v48 = vmul.f32 %v1023_v41, %v3636_v53  ;;  %v3217_v63 = vpop.eup %3216  ;;  %v1342_v50 = vunpack.c.h.bf16 %v2920_v0 }
 0x306   :  { %v1024_v60 = vadd.f32 0.5, %v1022_v54  ;;  %v1040_v61 = vmul.f32 %v3215_v57, %v1016_v52  ;;  %v3219_v33 = vpop.eup %3218  ;;  %v1031_v34 = vmul.f32 0.5, %v3217_v63  ;;  %v2921_v54 = vld [vmem:[%s4092_s0 + $0x78] sm:$0xff] }
 0x307   :  { %v3688_v58 = vadd.f32 %v1039_v51, %v1037_v48  ;;  %v1032_v53 = vmul.f32 0.5, %v3219_v33  ;;  %v1339_v51 = vunpack.c.l.bf16 %v2919_v46  ;;  %v1344_v45 = vunpack.c.h.bf16 %v2921_v54 }
 0x308   :  { %v1038_v62 = vmul.f32 %v1024_v60, %v3640_v59  ;;  %v1033_v36 = vadd.f32 0.5, %v1031_v34  ;;  %v3700_v59 = vld [vmem:[%s4091_s1 + $0x4] ss:$16 sps:$4 sm:$0xff]  }
 0x309   :  { %3220 = vtanh.f32 %v3688_v58  ;;  %v1034_v37 = vadd.f32 0.5, %v1032_v53  ;;  %1590 = vmatprep.subr.bf16.mxu0 %v3700_v59 }
 0x30a   :  { %v3692_v55 = vadd.f32 %v1040_v61, %v1038_v62 }
 0x30c   :  { %3222 = vtanh.f32 %v3692_v55 }
 0x313   :  { %v3221_v35 = vpop.eup %3220 }
 0x314   :  { %v1047_v2 = vmul.f32 %v3221_v35, %v1033_v36  ;;  %v1343_v35 = vunpack.c.l.bf16 %v2921_v54 }
 0x316   :  { %v3223_v39 = vpop.eup %3222 }
 0x317   :  { %v1048_v3 = vmul.f32 %v3223_v39, %v1034_v37 }
 0x319   :  { %v1053_v5 = vpack.c.bf16 %v1048_v3, %v1047_v2  ;;  %v1340_v3 = vunpack.c.h.bf16 %v2919_v46 }
 0x31b   :  { %1279 = vmatmul.mubr.bf16.vlgmr.msra.gmra.mrb[12].mxu0 %v1053_v5  ;;  %1322 = vmatmul.mubr.bf16.vlgmr.msra.gmra.mrb[12].mxu1 %v1053_v5 }
 0x31c   :  { %1622 = vmatprep.mubr.bf16.mxu0 %v3324_v1  ;;  %1665 = vmatprep.mubr.bf16.mxu1 %v3324_v1 }
 0x31d   :  { %1591 = vmatpush1.bf16.msra.mxu0 %v3710_v7  ;;  %1634 = vmatpush1.bf16.msra.mxu1 %v3715_v8 }
 0x31e   :  { %1592 = vmatprep.subr.bf16.mxu0 %v3724_v9  ;;  %1635 = vmatprep.subr.bf16.mxu1 %v3729_v10 }
 0x321   :  { %1593 = vmatpush1.bf16.msra.mxu0 %v3734_v11  ;;  %1636 = vmatpush1.bf16.msra.mxu1 %v3739_v12 }
 0x322   :  { %1594 = vmatprep.subr.bf16.mxu0 %v3748_v13  ;;  %1637 = vmatprep.subr.bf16.mxu1 %v3753_v14 }
 0x325   :  { %1595 = vmatpush1.bf16.msra.mxu0 %v3758_v15  ;;  %1638 = vmatpush1.bf16.msra.mxu1 %v3763_v16 }
 0x326   :  { %1596 = vmatprep.subr.bf16.mxu0 %v3772_v17  ;;  %1639 = vmatprep.subr.bf16.mxu1 %v3777_v18 }
 0x329   :  { %1597 = vmatpush1.bf16.msra.mxu0 %v3782_v19  ;;  %1640 = vmatpush1.bf16.msra.mxu1 %v3787_v20 }
 0x32a   :  { %1598 = vmatprep.subr.bf16.mxu0 %v3796_v21  ;;  %1641 = vmatprep.subr.bf16.mxu1 %v3801_v22 }
 0x32d   :  { %1599 = vmatpush1.bf16.msra.mxu0 %v3806_v23  ;;  %1642 = vmatpush1.bf16.msra.mxu1 %v3811_v24 }
 0x32e   :  { %1600 = vmatprep.subr.bf16.mxu0 %v3820_v25  ;;  %1643 = vmatprep.subr.bf16.mxu1 %v3825_v26 }
 0x331   :  { %1601 = vmatpush1.bf16.msra.mxu0 %v3830_v27  ;;  %1644 = vmatpush1.bf16.msra.mxu1 %v3835_v28 }
 0x332   :  { %1602 = vmatprep.subr.bf16.mxu0 %v3844_v29  ;;  %1645 = vmatprep.subr.bf16.mxu1 %v3849_v30 }
 0x335   :  { %1603 = vmatpush1.bf16.msra.mxu0 %v3854_v31  ;;  %1646 = vmatpush1.bf16.msra.mxu1 %v3859_v32 }
 0x336   :  { %1604 = vmatprep.subr.bf16.mxu0 %v3873_v40  ;;  %1647 = vmatprep.subr.bf16.mxu1 %v3883_v44 }
 0x339   :  { %1605 = vmatpush1.bf16.msra.mxu0 %v3868_v56  ;;  %1648 = vmatpush1.bf16.msra.mxu1 %v3878_v43 }
 0x33a   :  { %1934 = vmatprep.subr.bf16.mxu0 %v3700_v59  ;;  %1977 = vmatprep.subr.bf16.mxu1 %v3705_v6 }
 0x3ee   :  { %v1280_v49 = vpop.f32.mrb[12].mxu0  ;;  %v1323_v41 = vpop.f32.mrb[12].mxu1 }
 0x3ef   :  { %v1345_v42 = vadd.f32 %v1337_v38, %v1280_v49  ;;  %v1282_v48 = vpop.f32.mrb[13].mxu0  ;;  %v1325_v52 = vpop.f32.mrb[13].mxu1  ;;  %v1347_v37 = vadd.f32 %v1339_v51, %v1323_v41 }
 0x3f0   :  { %v1346_v57 = vadd.f32 %v1338_v4, %v1282_v48  ;;  %v1284_v60 = vpop.f32.mrb[14].mxu0  ;;  %v1327_v61 = vpop.f32.mrb[14].mxu1  ;;  %v1348_v0 = vadd.f32 %v1340_v3, %v1325_v52 }
 0x3f1   :  { %v1353_v62 = vmul.f32 0.5, %v1345_v42  ;;  %v1349_v63 = vadd.f32 %v1341_v47, %v1284_v60  ;;  %v1286_v33 = vpop.f32.mrb[15].mxu0  ;;  %v1329_v34 = vpop.f32.mrb[15].mxu1  ;;  %v1351_v5 = vadd.f32 %v1343_v35, %v1327_v61 }
 0x3f2   :  { %v1361_v53 = vmul.f32 0.5, %v1346_v57  ;;  %v1350_v36 = vadd.f32 %v1342_v50, %v1286_v33  ;;  %v1352_v38 = vadd.f32 %v1344_v45, %v1329_v34  ;;  %v1371_v42 = vmul.f32 0.5, %v1348_v0 }
 0x3f3   :  { %3224 = vtanh.f32 %v1353_v62  ;;  %v1354_v39 = vmul.f32 0.5, %v1349_v63 }
 0x3f4   :  { %3226 = vtanh.f32 %v1361_v53  ;;  %v1362_v2 = vmul.f32 0.5, %v1350_v36  ;;  %v1372_v50 = vmul.f32 0.5, %v1352_v38 }
 0x3f5   :  { %3228 = vtanh.f32 %v1354_v39 }
 0x3f6   :  { %3230 = vtanh.f32 %v1347_v37 }
 0x3f7   :  { %3232 = vtanh.f32 %v1362_v2 }
 0x3f8   :  { %3234 = vtanh.f32 %v1351_v5 }
 0x3f9   :  { %3236 = vtanh.f32 %v1371_v42  ;;  %v2956_v42 = vld [vmem:[%s4092_s0 + $0x90] sm:$0xff] }
 0x3fa   :  { %3238 = vtanh.f32 %v1372_v50  ;;  %v2955_v50 = vld [vmem:[%s4092_s0 + $0x88] sm:$0xff] }
 0x3fd   :  { %v3225_v4 = vpop.eup %3224 }
 0x3fe   :  { %v3227_v47 = vpop.eup %3226  ;;  %v1357_v49 = vmul.f32 0.5, %v3225_v4 }
 0x3ff   :  { %v1365_v48 = vmul.f32 0.5, %v3227_v47  ;;  %v3229_v57 = vpop.eup %3228 }
 0x400   :  { %v1359_v41 = vadd.f32 0.5, %v1357_v49  ;;  %v3231_v51 = vpop.eup %3230  ;;  %v1358_v62 = vmul.f32 0.5, %v3229_v57 }
 0x401   :  { %v1367_v60 = vadd.f32 0.5, %v1365_v48  ;;  %v3233_v46 = vpop.eup %3232 }
 0x402   :  { %v1383_v63 = vmul.f32 %v3231_v51, %v1359_v41  ;;  %v1360_v61 = vadd.f32 0.5, %v1358_v62  ;;  %v1366_v52 = vmul.f32 0.5, %v3233_v46  ;;  %v3235_v33 = vpop.eup %3234  ;;  %v1685_v41 = vunpack.c.l.bf16 %v2956_v42 }
 0x403   :  { %v1381_v54 = vmul.f32 %v1367_v60, %v3688_v58  ;;  %v3237_v39 = vpop.eup %3236  ;;  %v1686_v62 = vunpack.c.h.bf16 %v2956_v42 }
 0x404   :  { %v1368_v53 = vadd.f32 0.5, %v1366_v52  ;;  %v1384_v35 = vmul.f32 %v3235_v33, %v1360_v61  ;;  %v3239_v2 = vpop.eup %3238  ;;  %v1375_v3 = vmul.f32 0.5, %v3237_v39  ;;  %v2957_v52 = vld [vmem:[%s4092_s0 + $0x98] sm:$0xff] }
 0x405   :  { %v3904_v34 = vadd.f32 %v1383_v63, %v1381_v54  ;;  %v1376_v58 = vmul.f32 0.5, %v3239_v2  ;;  %v1683_v63 = vunpack.c.l.bf16 %v2955_v50 }
 0x406   :  { %v1382_v36 = vmul.f32 %v1368_v53, %v3692_v55  ;;  %v1377_v45 = vadd.f32 0.5, %v1375_v3  ;;  %v2954_v55 = vld [vmem:[%s4092_s0 + $0x80] sm:$0xff] }
 0x407   :  { %3240 = vtanh.f32 %v3904_v34  ;;  %v1378_v0 = vadd.f32 0.5, %v1376_v58  ;;  %v1681_v48 = vunpack.c.l.bf16 %v2954_v55  ;;  %v1682_v57 = vunpack.c.h.bf16 %v2954_v55 }
 0x408   :  { %v3908_v37 = vadd.f32 %v1384_v35, %v1382_v36  ;;  %v1688_v55 = vunpack.c.h.bf16 %v2957_v52 }
 0x40a   :  { %3242 = vtanh.f32 %v3908_v37 }
 0x411   :  { %v3241_v5 = vpop.eup %3240 }
 0x412   :  { %v1391_v4 = vmul.f32 %v3241_v5, %v1377_v45  ;;  %v1687_v5 = vunpack.c.l.bf16 %v2957_v52 }
 0x414   :  { %v3243_v38 = vpop.eup %3242 }
 0x415   :  { %v1392_v47 = vmul.f32 %v3243_v38, %v1378_v0 }
 0x417   :  { %v1397_v49 = vpack.c.bf16 %v1392_v47, %v1391_v4  ;;  %v1684_v47 = vunpack.c.h.bf16 %v2955_v50 }
 0x419   :  { %1623 = vmatmul.mubr.bf16.vlgmr.msra.gmra.mrb[16].mxu0 %v1397_v49  ;;  %1666 = vmatmul.mubr.bf16.vlgmr.msra.gmra.mrb[16].mxu1 %v1397_v49 }
 0x41a   :  { %1935 = vmatpush1.bf16.msra.mxu0 %v3710_v7  ;;  %1978 = vmatpush1.bf16.msra.mxu1 %v3715_v8 }
 0x41b   :  { %1936 = vmatprep.subr.bf16.mxu0 %v3724_v9  ;;  %1979 = vmatprep.subr.bf16.mxu1 %v3729_v10 }
 0x41c   :  { %1966 = vmatprep.mubr.bf16.mxu0 %v3324_v1  ;;  %2009 = vmatprep.mubr.bf16.mxu1 %v3324_v1 }
 0x41e   :  { %1937 = vmatpush1.bf16.msra.mxu0 %v3734_v11  ;;  %1980 = vmatpush1.bf16.msra.mxu1 %v3739_v12 }
 0x41f   :  { %1938 = vmatprep.subr.bf16.mxu0 %v3748_v13  ;;  %1981 = vmatprep.subr.bf16.mxu1 %v3753_v14 }
 0x422   :  { %1939 = vmatpush1.bf16.msra.mxu0 %v3758_v15  ;;  %1982 = vmatpush1.bf16.msra.mxu1 %v3763_v16 }
 0x423   :  { %1940 = vmatprep.subr.bf16.mxu0 %v3772_v17  ;;  %1983 = vmatprep.subr.bf16.mxu1 %v3777_v18 }
 0x426   :  { %1941 = vmatpush1.bf16.msra.mxu0 %v3782_v19  ;;  %1984 = vmatpush1.bf16.msra.mxu1 %v3787_v20 }
 0x427   :  { %1942 = vmatprep.subr.bf16.mxu0 %v3796_v21  ;;  %1985 = vmatprep.subr.bf16.mxu1 %v3801_v22 }
 0x42a   :  { %1943 = vmatpush1.bf16.msra.mxu0 %v3806_v23  ;;  %1986 = vmatpush1.bf16.msra.mxu1 %v3811_v24 }
 0x42b   :  { %1944 = vmatprep.subr.bf16.mxu0 %v3820_v25  ;;  %1987 = vmatprep.subr.bf16.mxu1 %v3825_v26 }
 0x42e   :  { %1945 = vmatpush1.bf16.msra.mxu0 %v3830_v27  ;;  %1988 = vmatpush1.bf16.msra.mxu1 %v3835_v28 }
 0x42f   :  { %1946 = vmatprep.subr.bf16.mxu0 %v3844_v29  ;;  %1989 = vmatprep.subr.bf16.mxu1 %v3849_v30 }
 0x432   :  { %1947 = vmatpush1.bf16.msra.mxu0 %v3854_v31  ;;  %1990 = vmatpush1.bf16.msra.mxu1 %v3859_v32 }
 0x433   :  { %1948 = vmatprep.subr.bf16.mxu0 %v3873_v40  ;;  %1991 = vmatprep.subr.bf16.mxu1 %v3883_v44 }
 0x436   :  { %1949 = vmatpush1.bf16.msra.mxu0 %v3868_v56  ;;  %1992 = vmatpush1.bf16.msra.mxu1 %v3878_v43 }
 0x437   :  { %2278 = vmatprep.subr.bf16.mxu0 %v3700_v59  ;;  %2321 = vmatprep.subr.bf16.mxu1 %v3705_v6 }
 0x4ec   :  { %v1624_v51 = vpop.f32.mrb[16].mxu0  ;;  %v1667_v60 = vpop.f32.mrb[16].mxu1 }
 0x4ed   :  { %v1689_v46 = vadd.f32 %v1681_v48, %v1624_v51  ;;  %v1626_v54 = vpop.f32.mrb[17].mxu0  ;;  %v1669_v61 = vpop.f32.mrb[17].mxu1  ;;  %v1691_v0 = vadd.f32 %v1683_v63, %v1667_v60 }
 0x4ee   :  { %v1690_v33 = vadd.f32 %v1682_v57, %v1626_v54  ;;  %v1628_v53 = vpop.f32.mrb[18].mxu0  ;;  %v1671_v35 = vpop.f32.mrb[18].mxu1  ;;  %v1692_v42 = vadd.f32 %v1684_v47, %v1669_v61 }
 0x4ef   :  { %v1697_v36 = vmul.f32 0.5, %v1689_v46  ;;  %v1693_v39 = vadd.f32 %v1685_v41, %v1628_v53  ;;  %v1630_v2 = vpop.f32.mrb[19].mxu0  ;;  %v1673_v3 = vpop.f32.mrb[19].mxu1  ;;  %v1695_v49 = vadd.f32 %v1687_v5, %v1671_v35 }
 0x4f0   :  { %v1705_v58 = vmul.f32 0.5, %v1690_v33  ;;  %v1694_v45 = vadd.f32 %v1686_v62, %v1630_v2  ;;  %v1696_v48 = vadd.f32 %v1688_v55, %v1673_v3  ;;  %v1715_v46 = vmul.f32 0.5, %v1692_v42 }
 0x4f1   :  { %3244 = vtanh.f32 %v1697_v36  ;;  %v1698_v38 = vmul.f32 0.5, %v1693_v39 }
 0x4f2   :  { %3246 = vtanh.f32 %v1705_v58  ;;  %v1706_v4 = vmul.f32 0.5, %v1694_v45  ;;  %v1716_v62 = vmul.f32 0.5, %v1696_v48 }
 0x4f3   :  { %3248 = vtanh.f32 %v1698_v38 }
 0x4f4   :  { %3250 = vtanh.f32 %v1691_v0 }
 0x4f5   :  { %3252 = vtanh.f32 %v1706_v4 }
 0x4f6   :  { %3254 = vtanh.f32 %v1695_v49 }
 0x4f7   :  { %3256 = vtanh.f32 %v1715_v46  ;;  %v2992_v46 = vld [vmem:[%s4092_s0 + $0xb0] sm:$0xff] }
 0x4f8   :  { %3258 = vtanh.f32 %v1716_v62  ;;  %v2991_v62 = vld [vmem:[%s4092_s0 + $0xa8] sm:$0xff] }
 0x4fb   :  { %v3245_v57 = vpop.eup %3244 }
 0x4fc   :  { %v3247_v41 = vpop.eup %3246  ;;  %v1701_v51 = vmul.f32 0.5, %v3245_v57 }
 0x4fd   :  { %v1709_v54 = vmul.f32 0.5, %v3247_v41  ;;  %v3249_v33 = vpop.eup %3248 }
 0x4fe   :  { %v1703_v60 = vadd.f32 0.5, %v1701_v51  ;;  %v3251_v63 = vpop.eup %3250  ;;  %v1702_v36 = vmul.f32 0.5, %v3249_v33 }
 0x4ff   :  { %v1711_v53 = vadd.f32 0.5, %v1709_v54  ;;  %v3253_v50 = vpop.eup %3252 }
 0x500   :  { %v1727_v39 = vmul.f32 %v3251_v63, %v1703_v60  ;;  %v1704_v35 = vadd.f32 0.5, %v1702_v36  ;;  %v1710_v61 = vmul.f32 0.5, %v3253_v50  ;;  %v3255_v2 = vpop.eup %3254  ;;  %v2029_v60 = vunpack.c.l.bf16 %v2992_v46 }
 0x501   :  { %v1725_v52 = vmul.f32 %v1711_v53, %v3904_v34  ;;  %v3257_v38 = vpop.eup %3256 }
 0x502   :  { %v1712_v58 = vadd.f32 0.5, %v1710_v61  ;;  %v1728_v5 = vmul.f32 %v3255_v2, %v1704_v35  ;;  %v3259_v4 = vpop.eup %3258  ;;  %v1719_v47 = vmul.f32 0.5, %v3257_v38 }
 0x503   :  { %v3958_v3 = vadd.f32 %v1727_v39, %v1725_v52  ;;  %v1720_v34 = vmul.f32 0.5, %v3259_v4  ;;  %v2993_v52 = vld [vmem:[%s4092_s0 + $0xb8] sm:$0xff] }
 0x504   :  { %v1726_v45 = vmul.f32 %v1712_v58, %v3908_v37  ;;  %v1721_v55 = vadd.f32 0.5, %v1719_v47  ;;  %v2990_v37 = vld [vmem:[%s4092_s0 + $0xa0] sm:$0xff]  ;;  %v2031_v47 = vunpack.c.l.bf16 %v2993_v52 }
 0x505   :  { %3260 = vtanh.f32 %v3958_v3  ;;  %v1722_v42 = vadd.f32 0.5, %v1720_v34  ;;  %v2025_v54 = vunpack.c.l.bf16 %v2990_v37  ;;  %v2026_v33 = vunpack.c.h.bf16 %v2990_v37 }
 0x506   :  { %v3962_v0 = vadd.f32 %v1728_v5, %v1726_v45 }
 0x508   :  { %3262 = vtanh.f32 %v3962_v0 }
 0x50f   :  { %v3261_v49 = vpop.eup %3260 }
 0x510   :  { %v1735_v57 = vmul.f32 %v3261_v49, %v1721_v55 }
 0x512   :  { %v3263_v48 = vpop.eup %3262 }
 0x513   :  { %v1736_v41 = vmul.f32 %v3263_v48, %v1722_v42  ;;  %v2028_v48 = vunpack.c.h.bf16 %v2991_v62 }
 0x515   :  { %v1741_v51 = vpack.c.bf16 %v1736_v41, %v1735_v57  ;;  %v2032_v41 = vunpack.c.h.bf16 %v2993_v52 }
 0x517   :  { %1967 = vmatmul.mubr.bf16.vlgmr.msra.gmra.mrb[20].mxu0 %v1741_v51  ;;  %2010 = vmatmul.mubr.bf16.vlgmr.msra.gmra.mrb[20].mxu1 %v1741_v51 }
 0x518   :  { %2279 = vmatpush1.bf16.msra.mxu0 %v3710_v7  ;;  %2322 = vmatpush1.bf16.msra.mxu1 %v3715_v8 }
 0x519   :  { %2280 = vmatprep.subr.bf16.mxu0 %v3724_v9  ;;  %2323 = vmatprep.subr.bf16.mxu1 %v3729_v10 }
 0x51a   :  { %2310 = vmatprep.mubr.bf16.mxu0 %v3324_v1  ;;  %2353 = vmatprep.mubr.bf16.mxu1 %v3324_v1 }
 0x51c   :  { %2281 = vmatpush1.bf16.msra.mxu0 %v3734_v11  ;;  %2324 = vmatpush1.bf16.msra.mxu1 %v3739_v12 }
 0x51d   :  { %2282 = vmatprep.subr.bf16.mxu0 %v3748_v13  ;;  %2325 = vmatprep.subr.bf16.mxu1 %v3753_v14 }
 0x520   :  { %2283 = vmatpush1.bf16.msra.mxu0 %v3758_v15  ;;  %2326 = vmatpush1.bf16.msra.mxu1 %v3763_v16 }
 0x521   :  { %2284 = vmatprep.subr.bf16.mxu0 %v3772_v17  ;;  %2327 = vmatprep.subr.bf16.mxu1 %v3777_v18 }
 0x524   :  { %2285 = vmatpush1.bf16.msra.mxu0 %v3782_v19  ;;  %2328 = vmatpush1.bf16.msra.mxu1 %v3787_v20 }
 0x525   :  { %2286 = vmatprep.subr.bf16.mxu0 %v3796_v21  ;;  %2329 = vmatprep.subr.bf16.mxu1 %v3801_v22 }
 0x528   :  { %2287 = vmatpush1.bf16.msra.mxu0 %v3806_v23  ;;  %2330 = vmatpush1.bf16.msra.mxu1 %v3811_v24 }
 0x529   :  { %2288 = vmatprep.subr.bf16.mxu0 %v3820_v25  ;;  %2331 = vmatprep.subr.bf16.mxu1 %v3825_v26 }
 0x52c   :  { %2289 = vmatpush1.bf16.msra.mxu0 %v3830_v27  ;;  %2332 = vmatpush1.bf16.msra.mxu1 %v3835_v28 }
 0x52d   :  { %2290 = vmatprep.subr.bf16.mxu0 %v3844_v29  ;;  %2333 = vmatprep.subr.bf16.mxu1 %v3849_v30 }
 0x530   :  { %2291 = vmatpush1.bf16.msra.mxu0 %v3854_v31  ;;  %2334 = vmatpush1.bf16.msra.mxu1 %v3859_v32 }
 0x531   :  { %2292 = vmatprep.subr.bf16.mxu0 %v3873_v40  ;;  %2335 = vmatprep.subr.bf16.mxu1 %v3883_v44 }
 0x534   :  { %2293 = vmatpush1.bf16.msra.mxu0 %v3868_v56  ;;  %2336 = vmatpush1.bf16.msra.mxu1 %v3878_v43 }
 0x535   :  { %2622 = vmatprep.subr.bf16.mxu0 %v3700_v59  ;;  %2665 = vmatprep.subr.bf16.mxu1 %v3705_v6  ;;  %v2030_v59 = vunpack.c.h.bf16 %v2992_v46  ;;  %v2027_v6 = vunpack.c.l.bf16 %v2991_v62 }
 0x5ea   :  { %v1968_v63 = vpop.f32.mrb[20].mxu0  ;;  %v2011_v53 = vpop.f32.mrb[20].mxu1 }
 0x5eb   :  { %v2033_v36 = vadd.f32 %v2025_v54, %v1968_v63  ;;  %v1970_v50 = vpop.f32.mrb[21].mxu0  ;;  %v2013_v39 = vpop.f32.mrb[21].mxu1  ;;  %v2035_v49 = vadd.f32 %v2027_v6, %v2011_v53 }
 0x5ec   :  { %v2034_v35 = vadd.f32 %v2026_v33, %v1970_v50  ;;  %v1972_v61 = vpop.f32.mrb[22].mxu0  ;;  %v2015_v2 = vpop.f32.mrb[22].mxu1  ;;  %v2036_v51 = vadd.f32 %v2028_v48, %v2013_v39 }
 0x5ed   :  { %v2041_v58 = vmul.f32 0.5, %v2033_v36  ;;  %v2037_v5 = vadd.f32 %v2029_v60, %v1972_v61  ;;  %v1974_v45 = vpop.f32.mrb[23].mxu0  ;;  %v2017_v38 = vpop.f32.mrb[23].mxu1  ;;  %v2039_v57 = vadd.f32 %v2031_v47, %v2015_v2 }
 0x5ee   :  { %v2049_v4 = vmul.f32 0.5, %v2034_v35  ;;  %v2038_v34 = vadd.f32 %v2030_v59, %v1974_v45  ;;  %v2040_v37 = vadd.f32 %v2032_v41, %v2017_v38  ;;  %v2059_v60 = vmul.f32 0.5, %v2036_v51 }
 0x5ef   :  { %3264 = vtanh.f32 %v2041_v58  ;;  %v2042_v55 = vmul.f32 0.5, %v2037_v5 }
 0x5f0   :  { %3266 = vtanh.f32 %v2049_v4  ;;  %v2050_v42 = vmul.f32 0.5, %v2038_v34  ;;  %v2060_v59 = vmul.f32 0.5, %v2040_v37 }
 0x5f1   :  { %3268 = vtanh.f32 %v2042_v55 }
 0x5f2   :  { %3270 = vtanh.f32 %v2035_v49 }
 0x5f3   :  { %3272 = vtanh.f32 %v2050_v42 }
 0x5f4   :  { %3274 = vtanh.f32 %v2039_v57 }
 0x5f5   :  { %3276 = vtanh.f32 %v2059_v60 }
 0x5f6   :  { %3278 = vtanh.f32 %v2060_v59 }
 0x5f9   :  { %v3265_v46 = vpop.eup %3264 }
 0x5fa   :  { %v3267_v54 = vpop.eup %3266  ;;  %v2045_v33 = vmul.f32 0.5, %v3265_v46 }
 0x5fb   :  { %v2053_v63 = vmul.f32 0.5, %v3267_v54  ;;  %v3269_v36 = vpop.eup %3268 }
 0x5fc   :  { %v2047_v53 = vadd.f32 0.5, %v2045_v33  ;;  %v3271_v6 = vpop.eup %3270  ;;  %v2046_v35 = vmul.f32 0.5, %v3269_v36 }
 0x5fd   :  { %v2055_v50 = vadd.f32 0.5, %v2053_v63  ;;  %v3273_v62 = vpop.eup %3272 }
 0x5fe   :  { %v2071_v61 = vmul.f32 %v3271_v6, %v2047_v53  ;;  %v2048_v2 = vadd.f32 0.5, %v2046_v35  ;;  %v2054_v39 = vmul.f32 0.5, %v3273_v62  ;;  %v3275_v58 = vpop.eup %3274 }
 0x5ff   :  { %v2069_v52 = vmul.f32 %v2055_v50, %v3958_v3  ;;  %v3277_v34 = vpop.eup %3276 }
 0x600   :  { %v2056_v45 = vadd.f32 0.5, %v2054_v39  ;;  %v2072_v38 = vmul.f32 %v3275_v58, %v2048_v2  ;;  %v3279_v49 = vpop.eup %3278  ;;  %v2063_v55 = vmul.f32 0.5, %v3277_v34 }
 0x601   :  { %v4012_v5 = vadd.f32 %v2071_v61, %v2069_v52  ;;  %v2064_v3 = vmul.f32 0.5, %v3279_v49 }
 0x602   :  { %v2070_v4 = vmul.f32 %v2056_v45, %v3962_v0  ;;  %v2065_v48 = vadd.f32 0.5, %v2063_v55 }
 0x603   :  { %3280 = vtanh.f32 %v4012_v5  ;;  %v2066_v57 = vadd.f32 0.5, %v2064_v3 }
 0x604   :  { %v4016_v47 = vadd.f32 %v2072_v38, %v2070_v4 }
 0x606   :  { %3282 = vtanh.f32 %v4016_v47 }
 0x60d   :  { %v3281_v42 = vpop.eup %3280 }
 0x60e   :  { %v2079_v51 = vmul.f32 %v3281_v42, %v2065_v48 }
 0x610   :  { %v3283_v41 = vpop.eup %3282 }
 0x611   :  { %v2080_v37 = vmul.f32 %v3283_v41, %v2066_v57 }
 0x613   :  { %v2085_v46 = vpack.c.bf16 %v2080_v37, %v2079_v51 }
 0x615   :  { %2311 = vmatmul.mubr.bf16.vlgmr.msra.gmra.mrb[24].mxu0 %v2085_v46  ;;  %2354 = vmatmul.mubr.bf16.vlgmr.msra.gmra.mrb[24].mxu1 %v2085_v46 }
 0x616   :  { %2623 = vmatpush1.bf16.msra.mxu0 %v3710_v7  ;;  %2666 = vmatpush1.bf16.msra.mxu1 %v3715_v8  ;;  %v3028_v7 = vld [vmem:[%s4092_s0 + $0xd0] sm:$0xff] }
 0x617   :  { %2624 = vmatprep.subr.bf16.mxu0 %v3724_v9  ;;  %2667 = vmatprep.subr.bf16.mxu1 %v3729_v10  ;;  %v3027_v9 = vld [vmem:[%s4092_s0 + $0xc8] sm:$0xff] }
 0x618   :  { %2654 = vmatprep.mubr.bf16.mxu0 %v3324_v1  ;;  %2697 = vmatprep.mubr.bf16.mxu1 %v3324_v1  ;;  %v3026_v1 = vld [vmem:[%s4092_s0 + $0xc0] sm:$0xff] }
 0x619   :  { %v2369_v8 = vunpack.c.l.bf16 %v3026_v1  ;;  %v2370_v10 = vunpack.c.h.bf16 %v3026_v1 }
 0x61a   :  { %2625 = vmatpush1.bf16.msra.mxu0 %v3734_v11  ;;  %2668 = vmatpush1.bf16.msra.mxu1 %v3739_v12  ;;  %v2373_v11 = vunpack.c.l.bf16 %v3028_v7 }
 0x61b   :  { %2626 = vmatprep.subr.bf16.mxu0 %v3748_v13  ;;  %2669 = vmatprep.subr.bf16.mxu1 %v3753_v14  ;;  %v2374_v14 = vunpack.c.h.bf16 %v3028_v7 }
 0x61e   :  { %2627 = vmatpush1.bf16.msra.mxu0 %v3758_v15  ;;  %2670 = vmatpush1.bf16.msra.mxu1 %v3763_v16  ;;  %v2371_v16 = vunpack.c.l.bf16 %v3027_v9 }
 0x61f   :  { %2628 = vmatprep.subr.bf16.mxu0 %v3772_v17  ;;  %2671 = vmatprep.subr.bf16.mxu1 %v3777_v18 }
 0x622   :  { %2629 = vmatpush1.bf16.msra.mxu0 %v3782_v19  ;;  %2672 = vmatpush1.bf16.msra.mxu1 %v3787_v20  ;;  %v3029_v19 = vld [vmem:[%s4092_s0 + $0xd8] sm:$0xff] }
 0x623   :  { %2630 = vmatprep.subr.bf16.mxu0 %v3796_v21  ;;  %2673 = vmatprep.subr.bf16.mxu1 %v3801_v22 }
 0x626   :  { %2631 = vmatpush1.bf16.msra.mxu0 %v3806_v23  ;;  %2674 = vmatpush1.bf16.msra.mxu1 %v3811_v24 }
 0x627   :  { %2632 = vmatprep.subr.bf16.mxu0 %v3820_v25  ;;  %2675 = vmatprep.subr.bf16.mxu1 %v3825_v26 }
 0x62a   :  { %2633 = vmatpush1.bf16.msra.mxu0 %v3830_v27  ;;  %2676 = vmatpush1.bf16.msra.mxu1 %v3835_v28  ;;  %v2375_v28 = vunpack.c.l.bf16 %v3029_v19 }
 0x62b   :  { %2634 = vmatprep.subr.bf16.mxu0 %v3844_v29  ;;  %2677 = vmatprep.subr.bf16.mxu1 %v3849_v30 }
 0x62e   :  { %2635 = vmatpush1.bf16.msra.mxu0 %v3854_v31  ;;  %2678 = vmatpush1.bf16.msra.mxu1 %v3859_v32 }
 0x62f   :  { %2636 = vmatprep.subr.bf16.mxu0 %v3873_v40  ;;  %2679 = vmatprep.subr.bf16.mxu1 %v3883_v44 }
 0x632   :  { %2637 = vmatpush1.bf16.msra.mxu0 %v3868_v56  ;;  %2680 = vmatpush1.bf16.msra.mxu1 %v3878_v43  ;;  %v2372_v56 = vunpack.c.h.bf16 %v3027_v9  ;;  %v2376_v43 = vunpack.c.h.bf16 %v3029_v19 }
 0x6e8   :  { %v2312_v12 = vpop.f32.mrb[24].mxu0  ;;  %v2355_v13 = vpop.f32.mrb[24].mxu1 }
 0x6e9   :  { %v2377_v15 = vadd.f32 %v2369_v8, %v2312_v12  ;;  %v2314_v17 = vpop.f32.mrb[25].mxu0  ;;  %v2357_v18 = vpop.f32.mrb[25].mxu1  ;;  %v2379_v30 = vadd.f32 %v2371_v16, %v2355_v13  ;;  %v3064_v8 = vld [vmem:[%s4092_s0 + $0xf0] sm:$0xff] }
 0x6ea   :  { %v2378_v20 = vadd.f32 %v2370_v10, %v2314_v17  ;;  %v2316_v21 = vpop.f32.mrb[26].mxu0  ;;  %v2359_v22 = vpop.f32.mrb[26].mxu1  ;;  %v2380_v44 = vadd.f32 %v2372_v56, %v2357_v18  ;;  %v3063_v10 = vld [vmem:[%s4092_s0 + $0xe8] sm:$0xff]  ;;  %v2717_v12 = vunpack.c.l.bf16 %v3064_v8 }
 0x6eb   :  { %v2385_v23 = vmul.f32 0.5, %v2377_v15  ;;  %v2381_v24 = vadd.f32 %v2373_v11, %v2316_v21  ;;  %v2318_v25 = vpop.f32.mrb[27].mxu0  ;;  %v2361_v26 = vpop.f32.mrb[27].mxu1  ;;  %v2383_v40 = vadd.f32 %v2375_v28, %v2359_v22  ;;  %v2718_v15 = vunpack.c.h.bf16 %v3064_v8 }
 0x6ec   :  { %v2393_v27 = vmul.f32 0.5, %v2378_v20  ;;  %v2382_v29 = vadd.f32 %v2374_v14, %v2318_v25  ;;  %v2384_v0 = vadd.f32 %v2376_v43, %v2361_v26  ;;  %v2403_v63 = vmul.f32 0.5, %v2380_v44  ;;  %v3065_v20 = vld [vmem:[%s4092_s0 + $0xf8] sm:$0xff] }
 0x6ed   :  { %3284 = vtanh.f32 %v2385_v23  ;;  %v2386_v31 = vmul.f32 0.5, %v2381_v24  ;;  %v2715_v17 = vunpack.c.l.bf16 %v3063_v10 }
 0x6ee   :  { %3286 = vtanh.f32 %v2393_v27  ;;  %v2394_v32 = vmul.f32 0.5, %v2382_v29  ;;  %v2404_v36 = vmul.f32 0.5, %v2384_v0  ;;  %v2719_v29 = vunpack.c.l.bf16 %v3065_v20 }
 0x6ef   :  { %3288 = vtanh.f32 %v2386_v31  ;;  %v2720_v0 = vunpack.c.h.bf16 %v3065_v20 }
 0x6f0   :  { %3290 = vtanh.f32 %v2379_v30 }
 0x6f1   :  { %3292 = vtanh.f32 %v2394_v32  ;;  %v2716_v32 = vunpack.c.h.bf16 %v3063_v10 }
 0x6f2   :  { %3294 = vtanh.f32 %v2383_v40 }
 0x6f3   :  { %3296 = vtanh.f32 %v2403_v63 }
 0x6f4   :  { %3298 = vtanh.f32 %v2404_v36 }
 0x6f7   :  { %v3285_v54 = vpop.eup %3284 }
 0x6f8   :  { %v3287_v33 = vpop.eup %3286  ;;  %v2389_v60 = vmul.f32 0.5, %v3285_v54 }
 0x6f9   :  { %v2397_v59 = vmul.f32 0.5, %v3287_v33  ;;  %v3289_v53 = vpop.eup %3288 }
 0x6fa   :  { %v2391_v6 = vadd.f32 0.5, %v2389_v60  ;;  %v3291_v50 = vpop.eup %3290  ;;  %v2390_v62 = vmul.f32 0.5, %v3289_v53 }
 0x6fb   :  { %v2399_v35 = vadd.f32 0.5, %v2397_v59  ;;  %v3293_v61 = vpop.eup %3292 }
 0x6fc   :  { %v2415_v52 = vmul.f32 %v3291_v50, %v2391_v6  ;;  %v2392_v39 = vadd.f32 0.5, %v2390_v62  ;;  %v2398_v58 = vmul.f32 0.5, %v3293_v61  ;;  %v3295_v45 = vpop.eup %3294 }
 0x6fd   :  { %v2413_v2 = vmul.f32 %v2399_v35, %v4012_v5  ;;  %v3297_v3 = vpop.eup %3296 }
 0x6fe   :  { %v2400_v4 = vadd.f32 0.5, %v2398_v58  ;;  %v2416_v34 = vmul.f32 %v3295_v45, %v2392_v39  ;;  %v3299_v42 = vpop.eup %3298  ;;  %v2407_v48 = vmul.f32 0.5, %v3297_v3 }
 0x6ff   :  { %v4064_v38 = vadd.f32 %v2415_v52, %v2413_v2  ;;  %v2408_v5 = vmul.f32 0.5, %v3299_v42 }
 0x700   :  { %v2414_v49 = vmul.f32 %v2400_v4, %v4016_v47  ;;  %v2409_v41 = vadd.f32 0.5, %v2407_v48  ;;  %v3062_v47 = vld [vmem:[%s4092_s0 + $0xe0] sm:$0xff] }
 0x701   :  { %3300 = vtanh.f32 %v4064_v38  ;;  %v2410_v51 = vadd.f32 0.5, %v2408_v5  ;;  %v2713_v9 = vunpack.c.l.bf16 %v3062_v47  ;;  %v2714_v11 = vunpack.c.h.bf16 %v3062_v47 }
 0x702   :  { %v4068_v55 = vadd.f32 %v2416_v34, %v2414_v49 }
 0x704   :  { %3302 = vtanh.f32 %v4068_v55 }
 0x70b   :  { %v3301_v57 = vpop.eup %3300 }
 0x70c   :  { %v2423_v46 = vmul.f32 %v3301_v57, %v2409_v41 }
 0x70e   :  { %v3303_v37 = vpop.eup %3302 }
 0x70f   :  { %v2424_v1 = vmul.f32 %v3303_v37, %v2410_v51 }
 0x711   :  { %v2429_v7 = vpack.c.bf16 %v2424_v1, %v2423_v46 }
 0x713   :  { %2655 = vmatmul.mubr.bf16.vlgmr.msra.gmra.mrb[28].mxu0 %v2429_v7  ;;  %2698 = vmatmul.mubr.bf16.vlgmr.msra.gmra.mrb[28].mxu1 %v2429_v7 }
 0x7e6   :  { %v2656_v13 = vpop.f32.mrb[28].mxu0  ;;  %v2699_v14 = vpop.f32.mrb[28].mxu1 }
 0x7e7   :  { %v2721_v16 = vadd.f32 %v2713_v9, %v2656_v13  ;;  %v2658_v18 = vpop.f32.mrb[29].mxu0  ;;  %v2701_v19 = vpop.f32.mrb[29].mxu1  ;;  %v2723_v31 = vadd.f32 %v2715_v17, %v2699_v14 }
 0x7e8   :  { %v2722_v21 = vadd.f32 %v2714_v11, %v2658_v18  ;;  %v2660_v22 = vpop.f32.mrb[30].mxu0  ;;  %v2703_v23 = vpop.f32.mrb[30].mxu1  ;;  %v2724_v44 = vadd.f32 %v2716_v32, %v2701_v19 }
 0x7e9   :  { %v2729_v24 = vmul.f32 0.5, %v2721_v16  ;;  %v2725_v25 = vadd.f32 %v2717_v12, %v2660_v22  ;;  %v2662_v26 = vpop.f32.mrb[31].mxu0  ;;  %v2705_v27 = vpop.f32.mrb[31].mxu1  ;;  %v2727_v43 = vadd.f32 %v2719_v29, %v2703_v23 }
 0x7ea   :  { %v2737_v28 = vmul.f32 0.5, %v2722_v21  ;;  %v2726_v30 = vadd.f32 %v2718_v15, %v2662_v26  ;;  %v2747_v54 = vmul.f32 0.5, %v2724_v44  ;;  %v2728_v33 = vadd.f32 %v2720_v0, %v2705_v27 }
 0x7eb   :  { %3304 = vtanh.f32 %v2729_v24  ;;  %v2730_v56 = vmul.f32 0.5, %v2725_v25 }
 0x7ec   :  { %3306 = vtanh.f32 %v2737_v28  ;;  %v2738_v40 = vmul.f32 0.5, %v2726_v30  ;;  %v2748_v53 = vmul.f32 0.5, %v2728_v33 }
 0x7ed   :  { %3308 = vtanh.f32 %v2730_v56 }
 0x7ee   :  { %3310 = vtanh.f32 %v2723_v31 }
 0x7ef   :  { %3312 = vtanh.f32 %v2738_v40 }
 0x7f0   :  { %3314 = vtanh.f32 %v2727_v43 }
 0x7f1   :  { %3316 = vtanh.f32 %v2747_v54 }
 0x7f2   :  { %3318 = vtanh.f32 %v2748_v53 }
 0x7f5   :  { %v3305_v60 = vpop.eup %3304 }
 0x7f6   :  { %v3307_v63 = vpop.eup %3306  ;;  %v2733_v59 = vmul.f32 0.5, %v3305_v60 }
 0x7f7   :  { %v2741_v36 = vmul.f32 0.5, %v3307_v63  ;;  %v3309_v6 = vpop.eup %3308 }
 0x7f8   :  { %v2735_v50 = vadd.f32 0.5, %v2733_v59  ;;  %v3311_v35 = vpop.eup %3310  ;;  %v2734_v61 = vmul.f32 0.5, %v3309_v6 }
 0x7f9   :  { %v2743_v62 = vadd.f32 0.5, %v2741_v36  ;;  %v3313_v52 = vpop.eup %3312 }
 0x7fa   :  { %v2759_v2 = vmul.f32 %v3311_v35, %v2735_v50  ;;  %v2736_v58 = vadd.f32 0.5, %v2734_v61  ;;  %v2742_v45 = vmul.f32 0.5, %v3313_v52  ;;  %v3315_v4 = vpop.eup %3314 }
 0x7fb   :  { %v2757_v39 = vmul.f32 %v2743_v62, %v4064_v38  ;;  %v3317_v48 = vpop.eup %3316 }
 0x7fc   :  { %v2744_v49 = vadd.f32 0.5, %v2742_v45  ;;  %v2760_v3 = vmul.f32 %v3315_v4, %v2736_v58  ;;  %v2751_v57 = vmul.f32 0.5, %v3317_v48  ;;  %v3319_v41 = vpop.eup %3318 }
 0x7fd   :  { %v2761_v34 = vadd.f32 %v2759_v2, %v2757_v39  ;;  %v2752_v37 = vmul.f32 0.5, %v3319_v41 }
 0x7fe   :  { %v2758_v42 = vmul.f32 %v2744_v49, %v4068_v55  ;;  %v2753_v51 = vadd.f32 0.5, %v2751_v57 }
 0x7ff   :  { %3320 = vtanh.f32 %v2761_v34  ;;  %v2754_v38 = vadd.f32 0.5, %v2752_v37 }
 0x800   :  { %v2762_v5 = vadd.f32 %v2760_v3, %v2758_v42 }
 0x802   :  { %3322 = vtanh.f32 %v2762_v5 }
 0x809   :  { %v3321_v46 = vpop.eup %3320 }
 0x80a   :  { %v2767_v1 = vmul.f32 %v3321_v46, %v2753_v51 }
 0x80c   :  { %2776 = vst [vmem:[%s4093_s2] sm:$0xff] %v2767_v1  ;;  %v3323_v7 = vpop.eup %3322 }
 0x80d   :  { %v2768_v47 = vmul.f32 %v3323_v7, %v2754_v38 }
 0x80f   :  { %2777 = vst [vmem:[%s4093_s2 + $0x8] sm:$0xff] %v2768_v47 }

</bundles_post_ra>
